<compile_context>
chip_gen: v5e
topology: v5e:2x2
jax: 0.10.0
libtpu: 0.0.40
codegen_flags: <defaults>
</compile_context>

<pallas_src>
import functools
import math

import jax
import jax.numpy as jnp
from jax.experimental import pallas as pl
from jax.experimental.pallas import tpu as pltpu

LEAKY_SLOPE = 0.1                      # reference uses negative_slope=0.1
LN_EPS = 1e-5                          # torch.nn.LayerNorm default eps
VMEM_LIMIT_BYTES = 48 * 1024 * 1024    # fits v7x's 64 MiB/TC with headroom
LANE = 128


def _round_up(n, m):
    return ((n + m - 1) // m) * m


def _act(y, kind):
    if kind == "relu":
        return jnp.maximum(y, 0.0)
    if kind == "leaky":
        return jnp.where(y > 0, y, LEAKY_SLOPE * y)
    return y


# ----------------------------------------------------------------------------
# Kernel 1: fused 2-layer MLP (node encoder, phi)
# ----------------------------------------------------------------------------
def _mlp2_kernel(x_ref, w1_ref, b1_ref, w2_ref, b2_ref, o_ref, *, act1, act2):
    x = x_ref[...].astype(jnp.bfloat16)
    t = jnp.dot(x, w1_ref[...], preferred_element_type=jnp.float32) + b1_ref[...]
    t = _act(t, act1)
    t = jnp.dot(t.astype(jnp.bfloat16), w2_ref[...],
                preferred_element_type=jnp.float32) + b2_ref[...]
    t = _act(t, act2)
    o_ref[...] = t.astype(o_ref.dtype)


def fused_mlp2(x, w1, b1, w2, b2, *, act1, act2, tile_m, out_dtype):
    """out = act2(act1(x @ w1 + b1) @ w2 + b2), tiled over rows (parallel)."""
    M, K1 = x.shape
    H = w1.shape[1]
    N = w2.shape[1]
    assert M % tile_m == 0 and w1.shape[0] == K1 and w2.shape[0] == H
    flops = 2 * M * (K1 * H + H * N)
    bytes_accessed = 4 * M * (K1 + N) + 2 * (K1 * H + H * N)
    return pl.pallas_call(
        functools.partial(_mlp2_kernel, act1=act1, act2=act2),
        out_shape=jax.ShapeDtypeStruct((M, N), out_dtype),
        grid=(M // tile_m,),
        in_specs=[
            pl.BlockSpec((tile_m, K1), lambda i: (i, 0)),
            pl.BlockSpec((K1, H), lambda i: (0, 0)),
            pl.BlockSpec((1, H), lambda i: (0, 0)),
            pl.BlockSpec((H, N), lambda i: (0, 0)),
            pl.BlockSpec((1, N), lambda i: (0, 0)),
        ],
        out_specs=pl.BlockSpec((tile_m, N), lambda i: (i, 0)),
        compiler_params=pltpu.CompilerParams(
            dimension_semantics=("parallel",),
            vmem_limit_bytes=VMEM_LIMIT_BYTES),
        cost_estimate=pl.CostEstimate(flops=flops, transcendentals=0,
                                      bytes_accessed=bytes_accessed),
    )(x, w1, b1, w2, b2)


# ----------------------------------------------------------------------------
# Kernel 2: tiled matmul with f32 accumulator (net_agg = net_inst_adj @ phi(x))
# ----------------------------------------------------------------------------
def _matmul_acc_kernel(a_ref, b_ref, o_ref, acc_ref):
    @pl.when(pl.program_id(1) == 0)
    def _():
        acc_ref[...] = jnp.zeros_like(acc_ref)

    acc_ref[...] += jnp.dot(a_ref[...], b_ref[...],
                            preferred_element_type=jnp.float32)

    @pl.when(pl.program_id(1) == pl.num_programs(1) - 1)
    def _():
        o_ref[...] = acc_ref[...].astype(o_ref.dtype)


def tiled_matmul(a, b, *, tile_m, tile_k, out_dtype):
    """a @ b, rows 'parallel', K reduction last ('arbitrary'), no bias."""
    M, K = a.shape
    K2, N = b.shape
    assert K == K2 and M % tile_m == 0 and K % tile_k == 0
    flops = 2 * M * K * N
    bytes_accessed = 2 * (M * K + K * N * (M // tile_m)) + 4 * M * N
    return pl.pallas_call(
        _matmul_acc_kernel,
        out_shape=jax.ShapeDtypeStruct((M, N), out_dtype),
        grid=(M // tile_m, K // tile_k),
        in_specs=[
            pl.BlockSpec((tile_m, tile_k), lambda i, k: (i, k)),
            pl.BlockSpec((tile_k, N), lambda i, k: (k, 0)),
        ],
        out_specs=pl.BlockSpec((tile_m, N), lambda i, k: (i, 0)),
        scratch_shapes=[pltpu.VMEM((tile_m, N), jnp.float32)],
        compiler_params=pltpu.CompilerParams(
            dimension_semantics=("parallel", "arbitrary"),
            vmem_limit_bytes=VMEM_LIMIT_BYTES),
        cost_estimate=pl.CostEstimate(flops=flops, transcendentals=0,
                                      bytes_accessed=bytes_accessed),
    )(a, b)


# ----------------------------------------------------------------------------
# Kernel 3: fused HyperConv tail
#   drive/sink aggregation (K-tiled, f32 acc) -> psi1 -> psi2 ->
#   mlp(concat) with split-K weights -> LayerNorm -> leaky_relu -> residual
# ----------------------------------------------------------------------------
def _hyper_tail_kernel(x_ref, drive_ref, sink_ref, netagg_ref,
                       p1aw, p1ab, p1bw, p1bb,
                       p2aw, p2ab, p2bw, p2bb,
                       m1wx, m1wd, m1ws, m1b,
                       m2w, m2b, ln_g, ln_b,
                       o_ref, d_acc, s_acc, *, e_real):
    bf = jnp.bfloat16
    k = pl.program_id(1)

    @pl.when(k == 0)
    def _():
        d_acc[...] = jnp.zeros_like(d_acc)
        s_acc[...] = jnp.zeros_like(s_acc)

    na = netagg_ref[...]
    d_acc[...] += jnp.dot(drive_ref[...], na, preferred_element_type=jnp.float32)
    s_acc[...] += jnp.dot(sink_ref[...], na, preferred_element_type=jnp.float32)

    @pl.when(k == pl.num_programs(1) - 1)
    def _():
        # psi1 / psi2 : Linear -> ReLU -> Linear
        hd = jnp.dot(d_acc[...].astype(bf), p1aw[...],
                     preferred_element_type=jnp.float32) + p1ab[...]
        hd = jnp.maximum(hd, 0.0)
        hd = jnp.dot(hd.astype(bf), p1bw[...],
                     preferred_element_type=jnp.float32) + p1bb[...]
        hs = jnp.dot(s_acc[...].astype(bf), p2aw[...],
                     preferred_element_type=jnp.float32) + p2ab[...]
        hs = jnp.maximum(hs, 0.0)
        hs = jnp.dot(hs.astype(bf), p2bw[...],
                     preferred_element_type=jnp.float32) + p2bb[...]
        # mlp(concat([x, h_drive, h_sink], 1)) without materialising the
        # concat: mlp1's weight split along K into three E-blocks.
        x = x_ref[...]
        pre = (jnp.dot(x.astype(bf), m1wx[...], preferred_element_type=jnp.float32)
               + jnp.dot(hd.astype(bf), m1wd[...], preferred_element_type=jnp.float32)
               + jnp.dot(hs.astype(bf), m1ws[...], preferred_element_type=jnp.float32)
               + m1b[...])
        pre = jnp.maximum(pre, 0.0)
        h = jnp.dot(pre.astype(bf), m2w[...],
                    preferred_element_type=jnp.float32) + m2b[...]
        # LayerNorm over the real e_real features (padded lanes masked out),
        # then leaky_relu(0.1) and the residual add — all fused, all f32.
        mask = jax.lax.broadcasted_iota(jnp.int32, h.shape, 1) < e_real
        hm = jnp.where(mask, h, 0.0)
        mean = jnp.sum(hm, axis=-1, keepdims=True) * (1.0 / e_real)
        c = jnp.where(mask, h - mean, 0.0)
        var = jnp.sum(c * c, axis=-1, keepdims=True) * (1.0 / e_real)
        y = c * jax.lax.rsqrt(var + LN_EPS) * ln_g[...] + ln_b[...]
        y = jnp.where(y > 0, y, LEAKY_SLOPE * y)
        o_ref[...] = (y + x).astype(o_ref.dtype)


def hyper_conv_tail(x, drive, sink, net_agg, lw, *, e_real, tile_m, tile_kn):
    M, ep = x.shape
    nnp = net_agg.shape[0]
    h3 = lw["m1wx"].shape[1]
    assert M % tile_m == 0 and nnp % tile_kn == 0

    def full(shape):
        return pl.BlockSpec(shape, lambda i, k: (0, 0))

    in_specs = [
        pl.BlockSpec((tile_m, ep), lambda i, k: (i, 0)),       # x (residual)
        pl.BlockSpec((tile_m, tile_kn), lambda i, k: (i, k)),  # drive adjacency
        pl.BlockSpec((tile_m, tile_kn), lambda i, k: (i, k)),  # sink adjacency
        pl.BlockSpec((tile_kn, ep), lambda i, k: (k, 0)),      # net_agg
        full((ep, ep)), full((1, ep)), full((ep, ep)), full((1, ep)),   # psi1
        full((ep, ep)), full((1, ep)), full((ep, ep)), full((1, ep)),   # psi2
        full((ep, h3)), full((ep, h3)), full((ep, h3)), full((1, h3)),  # mlp1
        full((h3, ep)), full((1, ep)),                                   # mlp2
        full((1, ep)), full((1, ep)),                                    # LN
    ]
    flops = (4 * M * nnp * ep        # drive + sink aggregations
             + 8 * M * ep * ep       # psi1a/b, psi2a/b
             + 6 * M * ep * h3       # mlp1 (three K-blocks)
             + 2 * M * h3 * ep)      # mlp2
    bytes_accessed = (8 * M * ep + 4 * M * nnp
                      + 2 * nnp * ep * (M // tile_m)
                      + 2 * (4 * ep * ep + 3 * ep * h3 + h3 * ep))
    return pl.pallas_call(
        functools.partial(_hyper_tail_kernel, e_real=e_real),
        out_shape=jax.ShapeDtypeStruct((M, ep), jnp.float32),
        grid=(M // tile_m, nnp // tile_kn),
        in_specs=in_specs,
        out_specs=pl.BlockSpec((tile_m, ep), lambda i, k: (i, 0)),
        scratch_shapes=[pltpu.VMEM((tile_m, ep), jnp.float32),
                        pltpu.VMEM((tile_m, ep), jnp.float32)],
        compiler_params=pltpu.CompilerParams(
            dimension_semantics=("parallel", "arbitrary"),
            vmem_limit_bytes=VMEM_LIMIT_BYTES),
        cost_estimate=pl.CostEstimate(flops=flops, transcendentals=M,
                                      bytes_accessed=bytes_accessed),
    )(x, drive, sink, net_agg,
      lw["p1aw"], lw["p1ab"], lw["p1bw"], lw["p1bb"],
      lw["p2aw"], lw["p2ab"], lw["p2bw"], lw["p2bb"],
      lw["m1wx"], lw["m1wd"], lw["m1ws"], lw["m1b"],
      lw["m2w"], lw["m2b"], lw["ln_g"], lw["ln_b"])


# ----------------------------------------------------------------------------
# Parameter init: torch.nn.Linear-style init, pre-padded to lane-dense shapes
# and pre-cast to bf16 (weights) / f32 (biases, LN affine) ONCE.
# ----------------------------------------------------------------------------
def _linear_padded(key, fan_in, fan_out, in_pad, out_pad):
    kw, kb = jax.random.split(key)
    bound = 1.0 / math.sqrt(fan_in)
    w = jax.random.uniform(kw, (fan_in, fan_out), jnp.float32, -bound, bound)
    b = jax.random.uniform(kb, (fan_out,), jnp.float32, -bound, bound)
    wp = jnp.zeros((in_pad, out_pad), jnp.float32).at[:fan_in, :fan_out].set(w)
    bp = jnp.zeros((1, out_pad), jnp.float32).at[0, :fan_out].set(b)
    return wp.astype(jnp.bfloat16), bp


def init_gnn_node_params(key, num_layer, node_dim, emb_dim):
    E = emb_dim
    dp = _round_up(node_dim, LANE)
    ep = _round_up(E, LANE)
    h2p = _round_up(2 * E, LANE)
    h3p = _round_up(3 * E, LANE)

    keys = jax.random.split(key, 1 + num_layer)
    k1, k2 = jax.random.split(keys[0])
    params = {
        # node_encoder: Linear(node_dim,2E) -> LeakyReLU(0.1) -> Linear(2E,E) -> LeakyReLU(0.1)
        "enc1": _linear_padded(k1, node_dim, 2 * E, dp, h2p),
        "enc2": _linear_padded(k2, 2 * E, E, h2p, ep),
    }
    layers = []
    for l in range(num_layer):
        ks = jax.random.split(keys[1 + l], 8)
        phi1w, phi1b = _linear_padded(ks[0], E, E, ep, ep)
        phi2w, phi2b = _linear_padded(ks[1], E, E, ep, ep)
        p1aw, p1ab = _linear_padded(ks[2], E, E, ep, ep)
        p1bw, p1bb = _linear_padded(ks[3], E, E, ep, ep)
        p2aw, p2ab = _linear_padded(ks[4], E, E, ep, ep)
        p2bw, p2bb = _linear_padded(ks[5], E, E, ep, ep)
        # mlp1: Linear(3E, 3E), split along K into x / h_drive / h_sink blocks
        kw, kb = jax.random.split(ks[6])
        bound = 1.0 / math.sqrt(3 * E)
        w = jax.random.uniform(kw, (3 * E, 3 * E), jnp.float32, -bound, bound)
        b = jax.random.uniform(kb, (3 * E,), jnp.float32, -bound, bound)

        def pad_kblock(wk):
            return (jnp.zeros((ep, h3p), jnp.float32)
                    .at[:E, :3 * E].set(wk).astype(jnp.bfloat16))

        m1wx, m1wd, m1ws = (pad_kblock(w[:E]), pad_kblock(w[E:2 * E]),
                            pad_kblock(w[2 * E:]))
        m1b = jnp.zeros((1, h3p), jnp.float32).at[0, :3 * E].set(b)
        m2w, m2b = _linear_padded(ks[7], 3 * E, E, h3p, ep)
        layers.append({
            "phi1w": phi1w, "phi1b": phi1b, "phi2w": phi2w, "phi2b": phi2b,
            "p1aw": p1aw, "p1ab": p1ab, "p1bw": p1bw, "p1bb": p1bb,
            "p2aw": p2aw, "p2ab": p2ab, "p2bw": p2bw, "p2bb": p2bb,
            "m1wx": m1wx, "m1wd": m1wd, "m1ws": m1ws, "m1b": m1b,
            "m2w": m2w, "m2b": m2b,
            # torch LayerNorm init (ones/zeros); padded lanes stay zero.
            "ln_g": jnp.zeros((1, ep), jnp.float32).at[0, :E].set(1.0),
            "ln_b": jnp.zeros((1, ep), jnp.float32),
        })
    params["layers"] = layers
    return params


# ----------------------------------------------------------------------------
# Forward pass (GNN_node.forward, gnn_type='hyper', norm='layer',
#               residual=True, JK='concat')
# ----------------------------------------------------------------------------
def gnn_node_forward(params, x_pad, net_inst_adj, inst_net_adj_v_drive,
                     inst_net_adj_v_sink, cfg):
    """All array inputs are row/lane padded; cfg = (n_inst, emb_dim, tile_m,
    tile_net) carries the real/static sizes."""
    del inst_net_adj_v_sink  # reference forward passes v_drive for both args
    n_inst, emb_dim, tile_m, tile_net = cfg

    # node_encoder
    h = fused_mlp2(x_pad, *params["enc1"], *params["enc2"],
                   act1="leaky", act2="leaky", tile_m=tile_m,
                   out_dtype=jnp.float32)
    h_list = [h]
    for lw in params["layers"]:
        hin = h_list[-1]
        # phi(x): Linear -> ReLU -> Linear  (bf16 out: only feeds the MXU next)
        h_phi = fused_mlp2(hin, lw["phi1w"], lw["phi1b"], lw["phi2w"], lw["phi2b"],
                           act1="relu", act2="none", tile_m=tile_m,
                           out_dtype=jnp.bfloat16)
        # net_agg = net_inst_adj @ phi(x)
        net_agg = tiled_matmul(net_inst_adj, h_phi, tile_m=tile_net,
                               tile_k=tile_m, out_dtype=jnp.bfloat16)
        # Fused drive/sink aggregation + psi1 + psi2 + concat-free mlp +
        # LayerNorm + leaky_relu(0.1) + residual.
        # NOTE: reproduces the reference passing v_drive for BOTH drive and
        # sink arguments; the kernel itself stays general (takes two adjs).
        h = hyper_conv_tail(hin, inst_net_adj_v_drive, inst_net_adj_v_drive,
                            net_agg, lw, e_real=emb_dim, tile_m=tile_m,
                            tile_kn=tile_net)
        h_list.append(h)
    # JK == 'concat'; strip the row / lane padding.  Pure layout glue.
    # TODO(synk): write each layer's h directly into the JK slab via an
    # aliased column-offset out BlockSpec to skip this final copy.
    return jnp.concatenate([hh[:n_inst, :emb_dim] for hh in h_list], axis=1)


# ----------------------------------------------------------------------------
if __name__ == "__main__":
    NUM_LAYER = 2
    NODE_DIM = 16
    EMB_DIM = 32
    N_INST = 64     # instance nodes
    N_NET = 32      # nets (hyperedges)

    key = jax.random.PRNGKey(0)
    kx, ka1, ka2, ka3, kp = jax.random.split(key, 5)

    x = jax.random.normal(kx, (N_INST, NODE_DIM), jnp.float32)
    net_inst_adj = jax.random.bernoulli(ka1, 0.15, (N_NET, N_INST)).astype(jnp.float32)
    inst_net_adj_v_drive = jax.random.bernoulli(ka2, 0.15, (N_INST, N_NET)).astype(jnp.float32)
    inst_net_adj_v_sink = jax.random.bernoulli(ka3, 0.15, (N_INST, N_NET)).astype(jnp.float32)

    params = init_gnn_node_params(kp, NUM_LAYER, NODE_DIM, EMB_DIM)

    # Tiling / padding config (rows padded to the tile, features to 128 lanes).
    tile_m = min(256, _round_up(N_INST, 8))
    tile_net = min(256, _round_up(N_NET, 8))
    ni_pad = _round_up(N_INST, tile_m)
    nn_pad = _round_up(N_NET, tile_net)
    d_pad = _round_up(NODE_DIM, LANE)

    # Pad once, and pre-cast the 0/1 adjacency matrices to bf16 once
    # (bf16 — not int8 — so the same path is exact on v5e/v6e/v7x MXUs).
    x_pad = jnp.zeros((ni_pad, d_pad), jnp.float32).at[:N_INST, :NODE_DIM].set(x)
    nia_pad = (jnp.zeros((nn_pad, ni_pad), jnp.bfloat16)
               .at[:N_NET, :N_INST].set(net_inst_adj.astype(jnp.bfloat16)))
    drv_pad = (jnp.zeros((ni_pad, nn_pad), jnp.bfloat16)
               .at[:N_INST, :N_NET].set(inst_net_adj_v_drive.astype(jnp.bfloat16)))
    snk_pad = (jnp.zeros((ni_pad, nn_pad), jnp.bfloat16)
               .at[:N_INST, :N_NET].set(inst_net_adj_v_sink.astype(jnp.bfloat16)))

    cfg = (N_INST, EMB_DIM, tile_m, tile_net)
    fwd = jax.jit(gnn_node_forward, static_argnums=(5,))
    out = fwd(params, x_pad, nia_pad, drv_pad, snk_pad, cfg)
    out = jax.block_until_ready(out)

    expected_shape = (N_INST, (NUM_LAYER + 1) * EMB_DIM)  # JK='concat'
    assert out.shape == expected_shape, (out.shape, expected_shape)
    assert bool(jnp.all(jnp.isfinite(out)))
    print("KERNEL_OK")
</pallas_src>

<mosaic_0001>
module attributes {stable_mosaic.version = 11 : i64} {
  func.func @_mlp2_kernel(%arg0: i32, %arg1: memref<64x128xf32, #tpu.memory_space<vmem>>, %arg2: memref<128x128xbf16, #tpu.memory_space<vmem>>, %arg3: memref<1x128xf32, #tpu.memory_space<vmem>>, %arg4: memref<128x128xbf16, #tpu.memory_space<vmem>>, %arg5: memref<1x128xf32, #tpu.memory_space<vmem>>, %arg6: memref<64x128xf32, #tpu.memory_space<vmem>>) attributes {dimension_semantics = [#tpu.dimension_semantics<parallel>], iteration_bounds = array<i64: 1>, scalar_prefetch = 0 : i64, scratch_operands = 0 : i64, tpu.core_type = #tpu.core_type<tc>, window_params = [{transform_indices = @transform_0, window_bounds = array<i64: 64, 128>}, {pipeline_mode = #tpu.pipeline_mode<synchronous>, transform_indices = @transform_1, window_bounds = array<i64: 128, 128>}, {pipeline_mode = #tpu.pipeline_mode<synchronous>, transform_indices = @transform_2, window_bounds = array<i64: 1, 128>}, {pipeline_mode = #tpu.pipeline_mode<synchronous>, transform_indices = @transform_3, window_bounds = array<i64: 128, 128>}, {pipeline_mode = #tpu.pipeline_mode<synchronous>, transform_indices = @transform_4, window_bounds = array<i64: 1, 128>}, {transform_indices = @transform_5, window_bounds = array<i64: 64, 128>}]} {
    %c0 = arith.constant 0 : index
    %c0_0 = arith.constant 0 : index
    %0 = vector.load %arg1[%c0, %c0_0] : memref<64x128xf32, #tpu.memory_space<vmem>>, vector<64x128xf32>
    %1 = arith.truncf %0 : vector<64x128xf32> to vector<64x128xbf16>
    %c0_1 = arith.constant 0 : index
    %c0_2 = arith.constant 0 : index
    %2 = vector.load %arg2[%c0_1, %c0_2] : memref<128x128xbf16, #tpu.memory_space<vmem>>, vector<128x128xbf16>
    %cst = arith.constant dense<0.000000e+00> : vector<64x128xf32>
    %3 = tpu.matmul %1, %2, %cst {dimension_numbers = #tpu.dot_dimension_numbers<[1], [0], [0], [1], [0, 0, 1, 1], [], []>} : vector<64x128xbf16>, vector<128x128xbf16>, vector<64x128xf32> -> vector<64x128xf32>
    %c0_3 = arith.constant 0 : index
    %c0_4 = arith.constant 0 : index
    %4 = vector.load %arg3[%c0_3, %c0_4] : memref<1x128xf32, #tpu.memory_space<vmem>>, vector<1x128xf32>
    %5 = vector.broadcast %4 : vector<1x128xf32> to vector<64x128xf32>
    %6 = arith.addf %3, %5 : vector<64x128xf32>
    %cst_5 = arith.constant 0.000000e+00 : f32
    %7 = vector.broadcast %cst_5 : f32 to vector<64x128xf32>
    %8 = arith.cmpf ogt, %6, %7 : vector<64x128xf32>
    %cst_6 = arith.constant 1.000000e-01 : f32
    %9 = vector.broadcast %cst_6 : f32 to vector<64x128xf32>
    %10 = arith.mulf %9, %6 : vector<64x128xf32>
    %11 = arith.select %8, %6, %10 : vector<64x128xi1>, vector<64x128xf32>
    %12 = arith.truncf %11 : vector<64x128xf32> to vector<64x128xbf16>
    %c0_7 = arith.constant 0 : index
    %c0_8 = arith.constant 0 : index
    %13 = vector.load %arg4[%c0_7, %c0_8] : memref<128x128xbf16, #tpu.memory_space<vmem>>, vector<128x128xbf16>
    %cst_9 = arith.constant dense<0.000000e+00> : vector<64x128xf32>
    %14 = tpu.matmul %12, %13, %cst_9 {dimension_numbers = #tpu.dot_dimension_numbers<[1], [0], [0], [1], [0, 0, 1, 1], [], []>} : vector<64x128xbf16>, vector<128x128xbf16>, vector<64x128xf32> -> vector<64x128xf32>
    %c0_10 = arith.constant 0 : index
    %c0_11 = arith.constant 0 : index
    %15 = vector.load %arg5[%c0_10, %c0_11] : memref<1x128xf32, #tpu.memory_space<vmem>>, vector<1x128xf32>
    %16 = vector.broadcast %15 : vector<1x128xf32> to vector<64x128xf32>
    %17 = arith.addf %14, %16 : vector<64x128xf32>
    %cst_12 = arith.constant 0.000000e+00 : f32
    %18 = vector.broadcast %cst_12 : f32 to vector<64x128xf32>
    %19 = arith.cmpf ogt, %17, %18 : vector<64x128xf32>
    %cst_13 = arith.constant 1.000000e-01 : f32
    %20 = vector.broadcast %cst_13 : f32 to vector<64x128xf32>
    %21 = arith.mulf %20, %17 : vector<64x128xf32>
    %22 = arith.select %19, %17, %21 : vector<64x128xi1>, vector<64x128xf32>
    %c0_14 = arith.constant 0 : index
    %c0_15 = arith.constant 0 : index
    %23 = vector.load %arg6[%c0_14, %c0_15] : memref<64x128xf32, #tpu.memory_space<vmem>>, vector<64x128xf32>
    tpu.vector_store %arg6[%c0_14, %c0_15], %22 {strides = array<i32>} : memref<64x128xf32, #tpu.memory_space<vmem>>, vector<64x128xf32>,
    return
  }
  func.func @transform_0(%arg0: i32) -> (i32, i32) {
    %c0_i32 = arith.constant 0 : i32
    %c0_i32_0 = arith.constant 0 : i32
    return %arg0, %c0_i32 : i32, i32
  }
  func.func @transform_1(%arg0: i32) -> (i32, i32) {
    %c0_i32 = arith.constant 0 : i32
    %c0_i32_0 = arith.constant 0 : i32
    %c0_i32_1 = arith.constant 0 : i32
    return %c0_i32, %c0_i32_0 : i32, i32
  }
  func.func @transform_2(%arg0: i32) -> (i32, i32) {
    %c0_i32 = arith.constant 0 : i32
    %c0_i32_0 = arith.constant 0 : i32
    %c0_i32_1 = arith.constant 0 : i32
    return %c0_i32, %c0_i32_0 : i32, i32
  }
  func.func @transform_3(%arg0: i32) -> (i32, i32) {
    %c0_i32 = arith.constant 0 : i32
    %c0_i32_0 = arith.constant 0 : i32
    %c0_i32_1 = arith.constant 0 : i32
    return %c0_i32, %c0_i32_0 : i32, i32
  }
  func.func @transform_4(%arg0: i32) -> (i32, i32) {
    %c0_i32 = arith.constant 0 : i32
    %c0_i32_0 = arith.constant 0 : i32
    %c0_i32_1 = arith.constant 0 : i32
    return %c0_i32, %c0_i32_0 : i32, i32
  }
  func.func @transform_5(%arg0: i32) -> (i32, i32) {
    %c0_i32 = arith.constant 0 : i32
    %c0_i32_0 = arith.constant 0 : i32
    return %arg0, %c0_i32 : i32, i32
  }
}

module attributes {stable_mosaic.version = 11 : i64} {
  func.func @_mlp2_kernel(%arg0: i32, %arg1: memref<64x128xf32, #tpu.memory_space<vmem>>, %arg2: memref<128x128xbf16, #tpu.memory_space<vmem>>, %arg3: memref<1x128xf32, #tpu.memory_space<vmem>>, %arg4: memref<128x128xbf16, #tpu.memory_space<vmem>>, %arg5: memref<1x128xf32, #tpu.memory_space<vmem>>, %arg6: memref<64x128xbf16, #tpu.memory_space<vmem>>) attributes {dimension_semantics = [#tpu.dimension_semantics<parallel>], iteration_bounds = array<i64: 1>, scalar_prefetch = 0 : i64, scratch_operands = 0 : i64, tpu.core_type = #tpu.core_type<tc>, window_params = [{transform_indices = @transform_0, window_bounds = array<i64: 64, 128>}, {pipeline_mode = #tpu.pipeline_mode<synchronous>, transform_indices = @transform_1, window_bounds = array<i64: 128, 128>}, {pipeline_mode = #tpu.pipeline_mode<synchronous>, transform_indices = @transform_2, window_bounds = array<i64: 1, 128>}, {pipeline_mode = #tpu.pipeline_mode<synchronous>, transform_indices = @transform_3, window_bounds = array<i64: 128, 128>}, {pipeline_mode = #tpu.pipeline_mode<synchronous>, transform_indices = @transform_4, window_bounds = array<i64: 1, 128>}, {transform_indices = @transform_5, window_bounds = array<i64: 64, 128>}]} {
    %c0 = arith.constant 0 : index
    %c0_0 = arith.constant 0 : index
    %0 = vector.load %arg1[%c0, %c0_0] : memref<64x128xf32, #tpu.memory_space<vmem>>, vector<64x128xf32>
    %1 = arith.truncf %0 : vector<64x128xf32> to vector<64x128xbf16>
    %c0_1 = arith.constant 0 : index
    %c0_2 = arith.constant 0 : index
    %2 = vector.load %arg2[%c0_1, %c0_2] : memref<128x128xbf16, #tpu.memory_space<vmem>>, vector<128x128xbf16>
    %cst = arith.constant dense<0.000000e+00> : vector<64x128xf32>
    %3 = tpu.matmul %1, %2, %cst {dimension_numbers = #tpu.dot_dimension_numbers<[1], [0], [0], [1], [0, 0, 1, 1], [], []>} : vector<64x128xbf16>, vector<128x128xbf16>, vector<64x128xf32> -> vector<64x128xf32>
    %c0_3 = arith.constant 0 : index
    %c0_4 = arith.constant 0 : index
    %4 = vector.load %arg3[%c0_3, %c0_4] : memref<1x128xf32, #tpu.memory_space<vmem>>, vector<1x128xf32>
    %5 = vector.broadcast %4 : vector<1x128xf32> to vector<64x128xf32>
    %6 = arith.addf %3, %5 : vector<64x128xf32>
    %cst_5 = arith.constant 0.000000e+00 : f32
    %7 = vector.broadcast %cst_5 : f32 to vector<64x128xf32>
    %8 = arith.maximumf %6, %7 : vector<64x128xf32>
    %9 = arith.truncf %8 : vector<64x128xf32> to vector<64x128xbf16>
    %c0_6 = arith.constant 0 : index
    %c0_7 = arith.constant 0 : index
    %10 = vector.load %arg4[%c0_6, %c0_7] : memref<128x128xbf16, #tpu.memory_space<vmem>>, vector<128x128xbf16>
    %cst_8 = arith.constant dense<0.000000e+00> : vector<64x128xf32>
    %11 = tpu.matmul %9, %10, %cst_8 {dimension_numbers = #tpu.dot_dimension_numbers<[1], [0], [0], [1], [0, 0, 1, 1], [], []>} : vector<64x128xbf16>, vector<128x128xbf16>, vector<64x128xf32> -> vector<64x128xf32>
    %c0_9 = arith.constant 0 : index
    %c0_10 = arith.constant 0 : index
    %12 = vector.load %arg5[%c0_9, %c0_10] : memref<1x128xf32, #tpu.memory_space<vmem>>, vector<1x128xf32>
    %13 = vector.broadcast %12 : vector<1x128xf32> to vector<64x128xf32>
    %14 = arith.addf %11, %13 : vector<64x128xf32>
    %15 = arith.truncf %14 : vector<64x128xf32> to vector<64x128xbf16>
    %c0_11 = arith.constant 0 : index
    %c0_12 = arith.constant 0 : index
    %16 = vector.load %arg6[%c0_11, %c0_12] : memref<64x128xbf16, #tpu.memory_space<vmem>>, vector<64x128xbf16>
    tpu.vector_store %arg6[%c0_11, %c0_12], %15 {strides = array<i32>} : memref<64x128xbf16, #tpu.memory_space<vmem>>, vector<64x128xbf16>,
    return
  }
  func.func @transform_0(%arg0: i32) -> (i32, i32) {
    %c0_i32 = arith.constant 0 : i32
    %c0_i32_0 = arith.constant 0 : i32
    return %arg0, %c0_i32 : i32, i32
  }
  func.func @transform_1(%arg0: i32) -> (i32, i32) {
    %c0_i32 = arith.constant 0 : i32
    %c0_i32_0 = arith.constant 0 : i32
    %c0_i32_1 = arith.constant 0 : i32
    return %c0_i32, %c0_i32_0 : i32, i32
  }
  func.func @transform_2(%arg0: i32) -> (i32, i32) {
    %c0_i32 = arith.constant 0 : i32
    %c0_i32_0 = arith.constant 0 : i32
    %c0_i32_1 = arith.constant 0 : i32
    return %c0_i32, %c0_i32_0 : i32, i32
  }
  func.func @transform_3(%arg0: i32) -> (i32, i32) {
    %c0_i32 = arith.constant 0 : i32
    %c0_i32_0 = arith.constant 0 : i32
    %c0_i32_1 = arith.constant 0 : i32
    return %c0_i32, %c0_i32_0 : i32, i32
  }
  func.func @transform_4(%arg0: i32) -> (i32, i32) {
    %c0_i32 = arith.constant 0 : i32
    %c0_i32_0 = arith.constant 0 : i32
    %c0_i32_1 = arith.constant 0 : i32
    return %c0_i32, %c0_i32_0 : i32, i32
  }
  func.func @transform_5(%arg0: i32) -> (i32, i32) {
    %c0_i32 = arith.constant 0 : i32
    %c0_i32_0 = arith.constant 0 : i32
    return %arg0, %c0_i32 : i32, i32
  }
}

module attributes {stable_mosaic.version = 11 : i64} {
  func.func @_matmul_acc_kernel(%arg0: i32, %arg1: i32, %arg2: memref<32x64xbf16, #tpu.memory_space<vmem>>, %arg3: memref<64x128xbf16, #tpu.memory_space<vmem>>, %arg4: memref<32x128xbf16, #tpu.memory_space<vmem>>, %arg5: memref<32x128xf32, #tpu.memory_space<vmem>>) attributes {dimension_semantics = [#tpu.dimension_semantics<parallel>, #tpu.dimension_semantics<arbitrary>], iteration_bounds = array<i64: 1, 1>, scalar_prefetch = 0 : i64, scratch_operands = 1 : i64, tpu.core_type = #tpu.core_type<tc>, window_params = [{transform_indices = @transform_0, window_bounds = array<i64: 32, 64>}, {transform_indices = @transform_1, window_bounds = array<i64: 64, 128>}, {transform_indices = @transform_2, window_bounds = array<i64: 32, 128>}]} {
    %c0_i32 = arith.constant 0 : i32
    %0 = arith.cmpi eq, %arg1, %c0_i32 : i32
    %1 = arith.extui %0 : i1 to i32
    %c0_i32_0 = arith.constant 0 : i32
    %2 = arith.cmpi ne, %1, %c0_i32_0 : i32
    scf.if %2 {
      %cst_10 = arith.constant 0.000000e+00 : f32
      %12 = vector.broadcast %cst_10 : f32 to vector<32x128xf32>
      %c0_11 = arith.constant 0 : index
      %c0_12 = arith.constant 0 : index
      %13 = vector.load %arg5[%c0_11, %c0_12] : memref<32x128xf32, #tpu.memory_space<vmem>>, vector<32x128xf32>
      tpu.vector_store %arg5[%c0_11, %c0_12], %12 {strides = array<i32>} : memref<32x128xf32, #tpu.memory_space<vmem>>, vector<32x128xf32>,
    } else {
    }
    %c0 = arith.constant 0 : index
    %c0_1 = arith.constant 0 : index
    %3 = vector.load %arg5[%c0, %c0_1] : memref<32x128xf32, #tpu.memory_space<vmem>>, vector<32x128xf32>
    %c0_2 = arith.constant 0 : index
    %c0_3 = arith.constant 0 : index
    %4 = vector.load %arg2[%c0_2, %c0_3] : memref<32x64xbf16, #tpu.memory_space<vmem>>, vector<32x64xbf16>
    %c0_4 = arith.constant 0 : index
    %c0_5 = arith.constant 0 : index
    %5 = vector.load %arg3[%c0_4, %c0_5] : memref<64x128xbf16, #tpu.memory_space<vmem>>, vector<64x128xbf16>
    %cst = arith.constant dense<0.000000e+00> : vector<32x128xf32>
    %6 = tpu.matmul %4, %5, %cst {dimension_numbers = #tpu.dot_dimension_numbers<[1], [0], [0], [1], [0, 0, 1, 1], [], []>} : vector<32x64xbf16>, vector<64x128xbf16>, vector<32x128xf32> -> vector<32x128xf32>
    %7 = arith.addf %3, %6 : vector<32x128xf32>
    %c0_6 = arith.constant 0 : index
    %c0_7 = arith.constant 0 : index
    %8 = vector.load %arg5[%c0_6, %c0_7] : memref<32x128xf32, #tpu.memory_space<vmem>>, vector<32x128xf32>
    tpu.vector_store %arg5[%c0_6, %c0_7], %7 {strides = array<i32>} : memref<32x128xf32, #tpu.memory_space<vmem>>, vector<32x128xf32>,
    %c0_i32_8 = arith.constant 0 : i32
    %9 = arith.cmpi eq, %arg1, %c0_i32_8 : i32
    %10 = arith.extui %9 : i1 to i32
    %c0_i32_9 = arith.constant 0 : i32
    %11 = arith.cmpi ne, %10, %c0_i32_9 : i32
    scf.if %11 {
      %c0_10 = arith.constant 0 : index
      %c0_11 = arith.constant 0 : index
      %12 = vector.load %arg5[%c0_10, %c0_11] : memref<32x128xf32, #tpu.memory_space<vmem>>, vector<32x128xf32>
      %13 = arith.truncf %12 : vector<32x128xf32> to vector<32x128xbf16>
      %c0_12 = arith.constant 0 : index
      %c0_13 = arith.constant 0 : index
      %14 = vector.load %arg4[%c0_12, %c0_13] : memref<32x128xbf16, #tpu.memory_space<vmem>>, vector<32x128xbf16>
      tpu.vector_store %arg4[%c0_12, %c0_13], %13 {strides = array<i32>} : memref<32x128xbf16, #tpu.memory_space<vmem>>, vector<32x128xbf16>,
    } else {
    }
    return
  }
  func.func @transform_0(%arg0: i32, %arg1: i32) -> (i32, i32) {
    %c0_i32 = arith.constant 0 : i32
    return %arg0, %arg1 : i32, i32
  }
  func.func @transform_1(%arg0: i32, %arg1: i32) -> (i32, i32) {
    %c0_i32 = arith.constant 0 : i32
    %c0_i32_0 = arith.constant 0 : i32
    return %arg1, %c0_i32 : i32, i32
  }
  func.func @transform_2(%arg0: i32, %arg1: i32) -> (i32, i32) {
    %c0_i32 = arith.constant 0 : i32
    %c0_i32_0 = arith.constant 0 : i32
    return %arg0, %c0_i32 : i32, i32
  }
}

module attributes {stable_mosaic.version = 11 : i64} {
  func.func @_hyper_tail_kernel(%arg0: i32, %arg1: i32, %arg2: memref<64x128xf32, #tpu.memory_space<vmem>>, %arg3: memref<64x32xbf16, #tpu.memory_space<vmem>>, %arg4: memref<64x32xbf16, #tpu.memory_space<vmem>>, %arg5: memref<32x128xbf16, #tpu.memory_space<vmem>>, %arg6: memref<128x128xbf16, #tpu.memory_space<vmem>>, %arg7: memref<1x128xf32, #tpu.memory_space<vmem>>, %arg8: memref<128x128xbf16, #tpu.memory_space<vmem>>, %arg9: memref<1x128xf32, #tpu.memory_space<vmem>>, %arg10: memref<128x128xbf16, #tpu.memory_space<vmem>>, %arg11: memref<1x128xf32, #tpu.memory_space<vmem>>, %arg12: memref<128x128xbf16, #tpu.memory_space<vmem>>, %arg13: memref<1x128xf32, #tpu.memory_space<vmem>>, %arg14: memref<128x128xbf16, #tpu.memory_space<vmem>>, %arg15: memref<128x128xbf16, #tpu.memory_space<vmem>>, %arg16: memref<128x128xbf16, #tpu.memory_space<vmem>>, %arg17: memref<1x128xf32, #tpu.memory_space<vmem>>, %arg18: memref<128x128xbf16, #tpu.memory_space<vmem>>, %arg19: memref<1x128xf32, #tpu.memory_space<vmem>>, %arg20: memref<1x128xf32, #tpu.memory_space<vmem>>, %arg21: memref<1x128xf32, #tpu.memory_space<vmem>>, %arg22: memref<64x128xf32, #tpu.memory_space<vmem>>, %arg23: memref<64x128xf32, #tpu.memory_space<vmem>>, %arg24: memref<64x128xf32, #tpu.memory_space<vmem>>) attributes {dimension_semantics = [#tpu.dimension_semantics<parallel>, #tpu.dimension_semantics<arbitrary>], iteration_bounds = array<i64: 1, 1>, scalar_prefetch = 0 : i64, scratch_operands = 2 : i64, tpu.core_type = #tpu.core_type<tc>, window_params = [{transform_indices = @transform_0, window_bounds = array<i64: 64, 128>}, {transform_indices = @transform_1, window_bounds = array<i64: 64, 32>}, {transform_indices = @transform_2, window_bounds = array<i64: 64, 32>}, {transform_indices = @transform_3, window_bounds = array<i64: 32, 128>}, {pipeline_mode = #tpu.pipeline_mode<synchronous>, transform_indices = @transform_4, window_bounds = array<i64: 128, 128>}, {pipeline_mode = #tpu.pipeline_mode<synchronous>, transform_indices = @transform_5, window_bounds = array<i64: 1, 128>}, {pipeline_mode = #tpu.pipeline_mode<synchronous>, transform_indices = @transform_6, window_bounds = array<i64: 128, 128>}, {pipeline_mode = #tpu.pipeline_mode<synchronous>, transform_indices = @transform_7, window_bounds = array<i64: 1, 128>}, {pipeline_mode = #tpu.pipeline_mode<synchronous>, transform_indices = @transform_8, window_bounds = array<i64: 128, 128>}, {pipeline_mode = #tpu.pipeline_mode<synchronous>, transform_indices = @transform_9, window_bounds = array<i64: 1, 128>}, {pipeline_mode = #tpu.pipeline_mode<synchronous>, transform_indices = @transform_10, window_bounds = array<i64: 128, 128>}, {pipeline_mode = #tpu.pipeline_mode<synchronous>, transform_indices = @transform_11, window_bounds = array<i64: 1, 128>}, {pipeline_mode = #tpu.pipeline_mode<synchronous>, transform_indices = @transform_12, window_bounds = array<i64: 128, 128>}, {pipeline_mode = #tpu.pipeline_mode<synchronous>, transform_indices = @transform_13, window_bounds = array<i64: 128, 128>}, {pipeline_mode = #tpu.pipeline_mode<synchronous>, transform_indices = @transform_14, window_bounds = array<i64: 128, 128>}, {pipeline_mode = #tpu.pipeline_mode<synchronous>, transform_indices = @transform_15, window_bounds = array<i64: 1, 128>}, {pipeline_mode = #tpu.pipeline_mode<synchronous>, transform_indices = @transform_16, window_bounds = array<i64: 128, 128>}, {pipeline_mode = #tpu.pipeline_mode<synchronous>, transform_indices = @transform_17, window_bounds = array<i64: 1, 128>}, {pipeline_mode = #tpu.pipeline_mode<synchronous>, transform_indices = @transform_18, window_bounds = array<i64: 1, 128>}, {pipeline_mode = #tpu.pipeline_mode<synchronous>, transform_indices = @transform_19, window_bounds = array<i64: 1, 128>}, {transform_indices = @transform_20, window_bounds = array<i64: 64, 128>}]} {
    %c0_i32 = arith.constant 0 : i32
    %0 = arith.cmpi eq, %arg1, %c0_i32 : i32
    %1 = arith.extui %0 : i1 to i32
    %c0_i32_0 = arith.constant 0 : i32
    %2 = arith.cmpi ne, %1, %c0_i32_0 : i32
    scf.if %2 {
      %cst_17 = arith.constant 0.000000e+00 : f32
      %17 = vector.broadcast %cst_17 : f32 to vector<64x128xf32>
      %c0_18 = arith.constant 0 : index
      %c0_19 = arith.constant 0 : index
      %18 = vector.load %arg23[%c0_18, %c0_19] : memref<64x128xf32, #tpu.memory_space<vmem>>, vector<64x128xf32>
      tpu.vector_store %arg23[%c0_18, %c0_19], %17 {strides = array<i32>} : memref<64x128xf32, #tpu.memory_space<vmem>>, vector<64x128xf32>,
      %cst_20 = arith.constant 0.000000e+00 : f32
      %19 = vector.broadcast %cst_20 : f32 to vector<64x128xf32>
      %c0_21 = arith.constant 0 : index
      %c0_22 = arith.constant 0 : index
      %20 = vector.load %arg24[%c0_21, %c0_22] : memref<64x128xf32, #tpu.memory_space<vmem>>, vector<64x128xf32>
      tpu.vector_store %arg24[%c0_21, %c0_22], %19 {strides = array<i32>} : memref<64x128xf32, #tpu.memory_space<vmem>>, vector<64x128xf32>,
    } else {
    }
    %c0 = arith.constant 0 : index
    %c0_1 = arith.constant 0 : index
    %3 = vector.load %arg5[%c0, %c0_1] : memref<32x128xbf16, #tpu.memory_space<vmem>>, vector<32x128xbf16>
    %c0_2 = arith.constant 0 : index
    %c0_3 = arith.constant 0 : index
    %4 = vector.load %arg23[%c0_2, %c0_3] : memref<64x128xf32, #tpu.memory_space<vmem>>, vector<64x128xf32>
    %c0_4 = arith.constant 0 : index
    %c0_5 = arith.constant 0 : index
    %5 = vector.load %arg3[%c0_4, %c0_5] : memref<64x32xbf16, #tpu.memory_space<vmem>>, vector<64x32xbf16>
    %cst = arith.constant dense<0.000000e+00> : vector<64x128xf32>
    %6 = tpu.matmul %5, %3, %cst {dimension_numbers = #tpu.dot_dimension_numbers<[1], [0], [0], [1], [0, 0, 1, 1], [], []>} : vector<64x32xbf16>, vector<32x128xbf16>, vector<64x128xf32> -> vector<64x128xf32>
    %7 = arith.addf %4, %6 : vector<64x128xf32>
    %c0_6 = arith.constant 0 : index
    %c0_7 = arith.constant 0 : index
    %8 = vector.load %arg23[%c0_6, %c0_7] : memref<64x128xf32, #tpu.memory_space<vmem>>, vector<64x128xf32>
    tpu.vector_store %arg23[%c0_6, %c0_7], %7 {strides = array<i32>} : memref<64x128xf32, #tpu.memory_space<vmem>>, vector<64x128xf32>,
    %c0_8 = arith.constant 0 : index
    %c0_9 = arith.constant 0 : index
    %9 = vector.load %arg24[%c0_8, %c0_9] : memref<64x128xf32, #tpu.memory_space<vmem>>, vector<64x128xf32>
    %c0_10 = arith.constant 0 : index
    %c0_11 = arith.constant 0 : index
    %10 = vector.load %arg4[%c0_10, %c0_11] : memref<64x32xbf16, #tpu.memory_space<vmem>>, vector<64x32xbf16>
    %cst_12 = arith.constant dense<0.000000e+00> : vector<64x128xf32>
    %11 = tpu.matmul %10, %3, %cst_12 {dimension_numbers = #tpu.dot_dimension_numbers<[1], [0], [0], [1], [0, 0, 1, 1], [], []>} : vector<64x32xbf16>, vector<32x128xbf16>, vector<64x128xf32> -> vector<64x128xf32>
    %12 = arith.addf %9, %11 : vector<64x128xf32>
    %c0_13 = arith.constant 0 : index
    %c0_14 = arith.constant 0 : index
    %13 = vector.load %arg24[%c0_13, %c0_14] : memref<64x128xf32, #tpu.memory_space<vmem>>, vector<64x128xf32>
    tpu.vector_store %arg24[%c0_13, %c0_14], %12 {strides = array<i32>} : memref<64x128xf32, #tpu.memory_space<vmem>>, vector<64x128xf32>,
    %c0_i32_15 = arith.constant 0 : i32
    %14 = arith.cmpi eq, %arg1, %c0_i32_15 : i32
    %15 = arith.extui %14 : i1 to i32
    %c0_i32_16 = arith.constant 0 : i32
    %16 = arith.cmpi ne, %15, %c0_i32_16 : i32
    scf.if %16 {
      %c0_17 = arith.constant 0 : index
      %c0_18 = arith.constant 0 : index
      %17 = vector.load %arg23[%c0_17, %c0_18] : memref<64x128xf32, #tpu.memory_space<vmem>>, vector<64x128xf32>
      %18 = arith.truncf %17 : vector<64x128xf32> to vector<64x128xbf16>
      %c0_19 = arith.constant 0 : index
      %c0_20 = arith.constant 0 : index
      %19 = vector.load %arg6[%c0_19, %c0_20] : memref<128x128xbf16, #tpu.memory_space<vmem>>, vector<128x128xbf16>
      %cst_21 = arith.constant dense<0.000000e+00> : vector<64x128xf32>
      %20 = tpu.matmul %18, %19, %cst_21 {dimension_numbers = #tpu.dot_dimension_numbers<[1], [0], [0], [1], [0, 0, 1, 1], [], []>} : vector<64x128xbf16>, vector<128x128xbf16>, vector<64x128xf32> -> vector<64x128xf32>
      %c0_22 = arith.constant 0 : index
      %c0_23 = arith.constant 0 : index
      %21 = vector.load %arg7[%c0_22, %c0_23] : memref<1x128xf32, #tpu.memory_space<vmem>>, vector<1x128xf32>
      %22 = vector.broadcast %21 : vector<1x128xf32> to vector<64x128xf32>
      %23 = arith.addf %20, %22 : vector<64x128xf32>
      %cst_24 = arith.constant 0.000000e+00 : f32
      %24 = vector.broadcast %cst_24 : f32 to vector<64x128xf32>
      %25 = arith.maximumf %23, %24 : vector<64x128xf32>
      %26 = arith.truncf %25 : vector<64x128xf32> to vector<64x128xbf16>
      %c0_25 = arith.constant 0 : index
      %c0_26 = arith.constant 0 : index
      %27 = vector.load %arg8[%c0_25, %c0_26] : memref<128x128xbf16, #tpu.memory_space<vmem>>, vector<128x128xbf16>
      %cst_27 = arith.constant dense<0.000000e+00> : vector<64x128xf32>
      %28 = tpu.matmul %26, %27, %cst_27 {dimension_numbers = #tpu.dot_dimension_numbers<[1], [0], [0], [1], [0, 0, 1, 1], [], []>} : vector<64x128xbf16>, vector<128x128xbf16>, vector<64x128xf32> -> vector<64x128xf32>
      %c0_28 = arith.constant 0 : index
      %c0_29 = arith.constant 0 : index
      %29 = vector.load %arg9[%c0_28, %c0_29] : memref<1x128xf32, #tpu.memory_space<vmem>>, vector<1x128xf32>
      %30 = vector.broadcast %29 : vector<1x128xf32> to vector<64x128xf32>
      %31 = arith.addf %28, %30 : vector<64x128xf32>
      %c0_30 = arith.constant 0 : index
      %c0_31 = arith.constant 0 : index
      %32 = vector.load %arg24[%c0_30, %c0_31] : memref<64x128xf32, #tpu.memory_space<vmem>>, vector<64x128xf32>
      %33 = arith.truncf %32 : vector<64x128xf32> to vector<64x128xbf16>
      %c0_32 = arith.constant 0 : index
      %c0_33 = arith.constant 0 : index
      %34 = vector.load %arg10[%c0_32, %c0_33] : memref<128x128xbf16, #tpu.memory_space<vmem>>, vector<128x128xbf16>
      %cst_34 = arith.constant dense<0.000000e+00> : vector<64x128xf32>
      %35 = tpu.matmul %33, %34, %cst_34 {dimension_numbers = #tpu.dot_dimension_numbers<[1], [0], [0], [1], [0, 0, 1, 1], [], []>} : vector<64x128xbf16>, vector<128x128xbf16>, vector<64x128xf32> -> vector<64x128xf32>
      %c0_35 = arith.constant 0 : index
      %c0_36 = arith.constant 0 : index
      %36 = vector.load %arg11[%c0_35, %c0_36] : memref<1x128xf32, #tpu.memory_space<vmem>>, vector<1x128xf32>
      %37 = vector.broadcast %36 : vector<1x128xf32> to vector<64x128xf32>
      %38 = arith.addf %35, %37 : vector<64x128xf32>
      %cst_37 = arith.constant 0.000000e+00 : f32
      %39 = vector.broadcast %cst_37 : f32 to vector<64x128xf32>
      %40 = arith.maximumf %38, %39 : vector<64x128xf32>
      %41 = arith.truncf %40 : vector<64x128xf32> to vector<64x128xbf16>
      %c0_38 = arith.constant 0 : index
      %c0_39 = arith.constant 0 : index
      %42 = vector.load %arg12[%c0_38, %c0_39] : memref<128x128xbf16, #tpu.memory_space<vmem>>, vector<128x128xbf16>
      %cst_40 = arith.constant dense<0.000000e+00> : vector<64x128xf32>
      %43 = tpu.matmul %41, %42, %cst_40 {dimension_numbers = #tpu.dot_dimension_numbers<[1], [0], [0], [1], [0, 0, 1, 1], [], []>} : vector<64x128xbf16>, vector<128x128xbf16>, vector<64x128xf32> -> vector<64x128xf32>
      %c0_41 = arith.constant 0 : index
      %c0_42 = arith.constant 0 : index
      %44 = vector.load %arg13[%c0_41, %c0_42] : memref<1x128xf32, #tpu.memory_space<vmem>>, vector<1x128xf32>
      %45 = vector.broadcast %44 : vector<1x128xf32> to vector<64x128xf32>
      %46 = arith.addf %43, %45 : vector<64x128xf32>
      %c0_43 = arith.constant 0 : index
      %c0_44 = arith.constant 0 : index
      %47 = vector.load %arg2[%c0_43, %c0_44] : memref<64x128xf32, #tpu.memory_space<vmem>>, vector<64x128xf32>
      %48 = arith.truncf %47 : vector<64x128xf32> to vector<64x128xbf16>
      %c0_45 = arith.constant 0 : index
      %c0_46 = arith.constant 0 : index
      %49 = vector.load %arg14[%c0_45, %c0_46] : memref<128x128xbf16, #tpu.memory_space<vmem>>, vector<128x128xbf16>
      %cst_47 = arith.constant dense<0.000000e+00> : vector<64x128xf32>
      %50 = tpu.matmul %48, %49, %cst_47 {dimension_numbers = #tpu.dot_dimension_numbers<[1], [0], [0], [1], [0, 0, 1, 1], [], []>} : vector<64x128xbf16>, vector<128x128xbf16>, vector<64x128xf32> -> vector<64x128xf32>
      %51 = arith.truncf %31 : vector<64x128xf32> to vector<64x128xbf16>
      %c0_48 = arith.constant 0 : index
      %c0_49 = arith.constant 0 : index
      %52 = vector.load %arg15[%c0_48, %c0_49] : memref<128x128xbf16, #tpu.memory_space<vmem>>, vector<128x128xbf16>
      %cst_50 = arith.constant dense<0.000000e+00> : vector<64x128xf32>
      %53 = tpu.matmul %51, %52, %cst_50 {dimension_numbers = #tpu.dot_dimension_numbers<[1], [0], [0], [1], [0, 0, 1, 1], [], []>} : vector<64x128xbf16>, vector<128x128xbf16>, vector<64x128xf32> -> vector<64x128xf32>
      %54 = arith.addf %50, %53 : vector<64x128xf32>
      %55 = arith.truncf %46 : vector<64x128xf32> to vector<64x128xbf16>
      %c0_51 = arith.constant 0 : index
      %c0_52 = arith.constant 0 : index
      %56 = vector.load %arg16[%c0_51, %c0_52] : memref<128x128xbf16, #tpu.memory_space<vmem>>, vector<128x128xbf16>
      %cst_53 = arith.constant dense<0.000000e+00> : vector<64x128xf32>
      %57 = tpu.matmul %55, %56, %cst_53 {dimension_numbers = #tpu.dot_dimension_numbers<[1], [0], [0], [1], [0, 0, 1, 1], [], []>} : vector<64x128xbf16>, vector<128x128xbf16>, vector<64x128xf32> -> vector<64x128xf32>
      %58 = arith.addf %54, %57 : vector<64x128xf32>
      %c0_54 = arith.constant 0 : index
      %c0_55 = arith.constant 0 : index
      %59 = vector.load %arg17[%c0_54, %c0_55] : memref<1x128xf32, #tpu.memory_space<vmem>>, vector<1x128xf32>
      %60 = vector.broadcast %59 : vector<1x128xf32> to vector<64x128xf32>
      %61 = arith.addf %58, %60 : vector<64x128xf32>
      %cst_56 = arith.constant 0.000000e+00 : f32
      %62 = vector.broadcast %cst_56 : f32 to vector<64x128xf32>
      %63 = arith.maximumf %61, %62 : vector<64x128xf32>
      %64 = arith.truncf %63 : vector<64x128xf32> to vector<64x128xbf16>
      %c0_57 = arith.constant 0 : index
      %c0_58 = arith.constant 0 : index
      %65 = vector.load %arg18[%c0_57, %c0_58] : memref<128x128xbf16, #tpu.memory_space<vmem>>, vector<128x128xbf16>
      %cst_59 = arith.constant dense<0.000000e+00> : vector<64x128xf32>
      %66 = tpu.matmul %64, %65, %cst_59 {dimension_numbers = #tpu.dot_dimension_numbers<[1], [0], [0], [1], [0, 0, 1, 1], [], []>} : vector<64x128xbf16>, vector<128x128xbf16>, vector<64x128xf32> -> vector<64x128xf32>
      %c0_60 = arith.constant 0 : index
      %c0_61 = arith.constant 0 : index
      %67 = vector.load %arg19[%c0_60, %c0_61] : memref<1x128xf32, #tpu.memory_space<vmem>>, vector<1x128xf32>
      %68 = vector.broadcast %67 : vector<1x128xf32> to vector<64x128xf32>
      %69 = arith.addf %66, %68 : vector<64x128xf32>
      %70 = tpu.iota {dimensions = array<i32: 1>} : vector<64x128xi32>
      %c32_i32 = arith.constant 32 : i32
      %71 = vector.broadcast %c32_i32 : i32 to vector<64x128xi32>
      %72 = arith.cmpi slt, %70, %71 : vector<64x128xi32>
      %cst_62 = arith.constant 0.000000e+00 : f32
      %73 = vector.broadcast %cst_62 : f32 to vector<64x128xf32>
      %74 = arith.select %72, %69, %73 : vector<64x128xi1>, vector<64x128xf32>
      %cst_63 = arith.constant dense<0.000000e+00> : vector<64xf32>
      %75 = vector.multi_reduction <add>, %74, %cst_63 [1] : vector<64x128xf32> to vector<64xf32>
      %76 = vector.shape_cast %75 : vector<64xf32> to vector<64x1xf32>
      %cst_64 = arith.constant 3.125000e-02 : f32
      %77 = vector.broadcast %cst_64 : f32 to vector<64x1xf32>
      %78 = arith.mulf %76, %77 : vector<64x1xf32>
      %79 = vector.broadcast %78 : vector<64x1xf32> to vector<64x128xf32>
      %80 = arith.subf %69, %79 : vector<64x128xf32>
      %cst_65 = arith.constant 0.000000e+00 : f32
      %81 = vector.broadcast %cst_65 : f32 to vector<64x128xf32>
      %82 = arith.select %72, %80, %81 : vector<64x128xi1>, vector<64x128xf32>
      %83 = arith.mulf %82, %82 : vector<64x128xf32>
      %cst_66 = arith.constant dense<0.000000e+00> : vector<64xf32>
      %84 = vector.multi_reduction <add>, %83, %cst_66 [1] : vector<64x128xf32> to vector<64xf32>
      %85 = vector.shape_cast %84 : vector<64xf32> to vector<64x1xf32>
      %cst_67 = arith.constant 3.125000e-02 : f32
      %86 = vector.broadcast %cst_67 : f32 to vector<64x1xf32>
      %87 = arith.mulf %85, %86 : vector<64x1xf32>
      %cst_68 = arith.constant 9.99999974E-6 : f32
      %88 = vector.broadcast %cst_68 : f32 to vector<64x1xf32>
      %89 = arith.addf %87, %88 : vector<64x1xf32>
      %90 = math.rsqrt %89 : vector<64x1xf32>
      %91 = vector.broadcast %90 : vector<64x1xf32> to vector<64x128xf32>
      %92 = arith.mulf %82, %91 : vector<64x128xf32>
      %c0_69 = arith.constant 0 : index
      %c0_70 = arith.constant 0 : index
      %93 = vector.load %arg20[%c0_69, %c0_70] : memref<1x128xf32, #tpu.memory_space<vmem>>, vector<1x128xf32>
      %94 = vector.broadcast %93 : vector<1x128xf32> to vector<64x128xf32>
      %95 = arith.mulf %92, %94 : vector<64x128xf32>
      %c0_71 = arith.constant 0 : index
      %c0_72 = arith.constant 0 : index
      %96 = vector.load %arg21[%c0_71, %c0_72] : memref<1x128xf32, #tpu.memory_space<vmem>>, vector<1x128xf32>
      %97 = vector.broadcast %96 : vector<1x128xf32> to vector<64x128xf32>
      %98 = arith.addf %95, %97 : vector<64x128xf32>
      %cst_73 = arith.constant 0.000000e+00 : f32
      %99 = vector.broadcast %cst_73 : f32 to vector<64x128xf32>
      %100 = arith.cmpf ogt, %98, %99 : vector<64x128xf32>
      %cst_74 = arith.constant 1.000000e-01 : f32
      %101 = vector.broadcast %cst_74 : f32 to vector<64x128xf32>
      %102 = arith.mulf %101, %98 : vector<64x128xf32>
      %103 = arith.select %100, %98, %102 : vector<64x128xi1>, vector<64x128xf32>
      %104 = arith.addf %103, %47 : vector<64x128xf32>
      %c0_75 = arith.constant 0 : index
      %c0_76 = arith.constant 0 : index
      %105 = vector.load %arg22[%c0_75, %c0_76] : memref<64x128xf32, #tpu.memory_space<vmem>>, vector<64x128xf32>
      tpu.vector_store %arg22[%c0_75, %c0_76], %104 {strides = array<i32>} : memref<64x128xf32, #tpu.memory_space<vmem>>, vector<64x128xf32>,
    } else {
    }
    return
  }
  func.func @transform_0(%arg0: i32, %arg1: i32) -> (i32, i32) {
    %c0_i32 = arith.constant 0 : i32
    %c0_i32_0 = arith.constant 0 : i32
    return %arg0, %c0_i32 : i32, i32
  }
  func.func @transform_1(%arg0: i32, %arg1: i32) -> (i32, i32) {
    %c0_i32 = arith.constant 0 : i32
    return %arg0, %arg1 : i32, i32
  }
  func.func @transform_2(%arg0: i32, %arg1: i32) -> (i32, i32) {
    %c0_i32 = arith.constant 0 : i32
    return %arg0, %arg1 : i32, i32
  }
  func.func @transform_3(%arg0: i32, %arg1: i32) -> (i32, i32) {
    %c0_i32 = arith.constant 0 : i32
    %c0_i32_0 = arith.constant 0 : i32
    return %arg1, %c0_i32 : i32, i32
  }
  func.func @transform_4(%arg0: i32, %arg1: i32) -> (i32, i32) {
    %c0_i32 = arith.constant 0 : i32
    %c0_i32_0 = arith.constant 0 : i32
    %c0_i32_1 = arith.constant 0 : i32
    return %c0_i32, %c0_i32_0 : i32, i32
  }
  func.func @transform_5(%arg0: i32, %arg1: i32) -> (i32, i32) {
    %c0_i32 = arith.constant 0 : i32
    %c0_i32_0 = arith.constant 0 : i32
    %c0_i32_1 = arith.constant 0 : i32
    return %c0_i32, %c0_i32_0 : i32, i32
  }
  func.func @transform_6(%arg0: i32, %arg1: i32) -> (i32, i32) {
    %c0_i32 = arith.constant 0 : i32
    %c0_i32_0 = arith.constant 0 : i32
    %c0_i32_1 = arith.constant 0 : i32
    return %c0_i32, %c0_i32_0 : i32, i32
  }
  func.func @transform_7(%arg0: i32, %arg1: i32) -> (i32, i32) {
    %c0_i32 = arith.constant 0 : i32
    %c0_i32_0 = arith.constant 0 : i32
    %c0_i32_1 = arith.constant 0 : i32
    return %c0_i32, %c0_i32_0 : i32, i32
  }
  func.func @transform_8(%arg0: i32, %arg1: i32) -> (i32, i32) {
    %c0_i32 = arith.constant 0 : i32
    %c0_i32_0 = arith.constant 0 : i32
    %c0_i32_1 = arith.constant 0 : i32
    return %c0_i32, %c0_i32_0 : i32, i32
  }
  func.func @transform_9(%arg0: i32, %arg1: i32) -> (i32, i32) {
    %c0_i32 = arith.constant 0 : i32
    %c0_i32_0 = arith.constant 0 : i32
    %c0_i32_1 = arith.constant 0 : i32
    return %c0_i32, %c0_i32_0 : i32, i32
  }
  func.func @transform_10(%arg0: i32, %arg1: i32) -> (i32, i32) {
    %c0_i32 = arith.constant 0 : i32
    %c0_i32_0 = arith.constant 0 : i32
    %c0_i32_1 = arith.constant 0 : i32
    return %c0_i32, %c0_i32_0 : i32, i32
  }
  func.func @transform_11(%arg0: i32, %arg1: i32) -> (i32, i32) {
    %c0_i32 = arith.constant 0 : i32
    %c0_i32_0 = arith.constant 0 : i32
    %c0_i32_1 = arith.constant 0 : i32
    return %c0_i32, %c0_i32_0 : i32, i32
  }
  func.func @transform_12(%arg0: i32, %arg1: i32) -> (i32, i32) {
    %c0_i32 = arith.constant 0 : i32
    %c0_i32_0 = arith.constant 0 : i32
    %c0_i32_1 = arith.constant 0 : i32
    return %c0_i32, %c0_i32_0 : i32, i32
  }
  func.func @transform_13(%arg0: i32, %arg1: i32) -> (i32, i32) {
    %c0_i32 = arith.constant 0 : i32
    %c0_i32_0 = arith.constant 0 : i32
    %c0_i32_1 = arith.constant 0 : i32
    return %c0_i32, %c0_i32_0 : i32, i32
  }
  func.func @transform_14(%arg0: i32, %arg1: i32) -> (i32, i32) {
    %c0_i32 = arith.constant 0 : i32
    %c0_i32_0 = arith.constant 0 : i32
    %c0_i32_1 = arith.constant 0 : i32
    return %c0_i32, %c0_i32_0 : i32, i32
  }
  func.func @transform_15(%arg0: i32, %arg1: i32) -> (i32, i32) {
    %c0_i32 = arith.constant 0 : i32
    %c0_i32_0 = arith.constant 0 : i32
    %c0_i32_1 = arith.constant 0 : i32
    return %c0_i32, %c0_i32_0 : i32, i32
  }
  func.func @transform_16(%arg0: i32, %arg1: i32) -> (i32, i32) {
    %c0_i32 = arith.constant 0 : i32
    %c0_i32_0 = arith.constant 0 : i32
    %c0_i32_1 = arith.constant 0 : i32
    return %c0_i32, %c0_i32_0 : i32, i32
  }
  func.func @transform_17(%arg0: i32, %arg1: i32) -> (i32, i32) {
    %c0_i32 = arith.constant 0 : i32
    %c0_i32_0 = arith.constant 0 : i32
    %c0_i32_1 = arith.constant 0 : i32
    return %c0_i32, %c0_i32_0 : i32, i32
  }
  func.func @transform_18(%arg0: i32, %arg1: i32) -> (i32, i32) {
    %c0_i32 = arith.constant 0 : i32
    %c0_i32_0 = arith.constant 0 : i32
    %c0_i32_1 = arith.constant 0 : i32
    return %c0_i32, %c0_i32_0 : i32, i32
  }
  func.func @transform_19(%arg0: i32, %arg1: i32) -> (i32, i32) {
    %c0_i32 = arith.constant 0 : i32
    %c0_i32_0 = arith.constant 0 : i32
    %c0_i32_1 = arith.constant 0 : i32
    return %c0_i32, %c0_i32_0 : i32, i32
  }
  func.func @transform_20(%arg0: i32, %arg1: i32) -> (i32, i32) {
    %c0_i32 = arith.constant 0 : i32
    %c0_i32_0 = arith.constant 0 : i32
    return %arg0, %c0_i32 : i32, i32
  }
}

module attributes {stable_mosaic.version = 11 : i64} {
  func.func @_mlp2_kernel(%arg0: i32, %arg1: memref<64x128xf32, #tpu.memory_space<vmem>>, %arg2: memref<128x128xbf16, #tpu.memory_space<vmem>>, %arg3: memref<1x128xf32, #tpu.memory_space<vmem>>, %arg4: memref<128x128xbf16, #tpu.memory_space<vmem>>, %arg5: memref<1x128xf32, #tpu.memory_space<vmem>>, %arg6: memref<64x128xbf16, #tpu.memory_space<vmem>>) attributes {dimension_semantics = [#tpu.dimension_semantics<parallel>], iteration_bounds = array<i64: 1>, scalar_prefetch = 0 : i64, scratch_operands = 0 : i64, tpu.core_type = #tpu.core_type<tc>, window_params = [{transform_indices = @transform_0, window_bounds = array<i64: 64, 128>}, {pipeline_mode = #tpu.pipeline_mode<synchronous>, transform_indices = @transform_1, window_bounds = array<i64: 128, 128>}, {pipeline_mode = #tpu.pipeline_mode<synchronous>, transform_indices = @transform_2, window_bounds = array<i64: 1, 128>}, {pipeline_mode = #tpu.pipeline_mode<synchronous>, transform_indices = @transform_3, window_bounds = array<i64: 128, 128>}, {pipeline_mode = #tpu.pipeline_mode<synchronous>, transform_indices = @transform_4, window_bounds = array<i64: 1, 128>}, {transform_indices = @transform_5, window_bounds = array<i64: 64, 128>}]} {
    %c0 = arith.constant 0 : index
    %c0_0 = arith.constant 0 : index
    %0 = vector.load %arg1[%c0, %c0_0] : memref<64x128xf32, #tpu.memory_space<vmem>>, vector<64x128xf32>
    %1 = arith.truncf %0 : vector<64x128xf32> to vector<64x128xbf16>
    %c0_1 = arith.constant 0 : index
    %c0_2 = arith.constant 0 : index
    %2 = vector.load %arg2[%c0_1, %c0_2] : memref<128x128xbf16, #tpu.memory_space<vmem>>, vector<128x128xbf16>
    %cst = arith.constant dense<0.000000e+00> : vector<64x128xf32>
    %3 = tpu.matmul %1, %2, %cst {dimension_numbers = #tpu.dot_dimension_numbers<[1], [0], [0], [1], [0, 0, 1, 1], [], []>} : vector<64x128xbf16>, vector<128x128xbf16>, vector<64x128xf32> -> vector<64x128xf32>
    %c0_3 = arith.constant 0 : index
    %c0_4 = arith.constant 0 : index
    %4 = vector.load %arg3[%c0_3, %c0_4] : memref<1x128xf32, #tpu.memory_space<vmem>>, vector<1x128xf32>
    %5 = vector.broadcast %4 : vector<1x128xf32> to vector<64x128xf32>
    %6 = arith.addf %3, %5 : vector<64x128xf32>
    %cst_5 = arith.constant 0.000000e+00 : f32
    %7 = vector.broadcast %cst_5 : f32 to vector<64x128xf32>
    %8 = arith.maximumf %6, %7 : vector<64x128xf32>
    %9 = arith.truncf %8 : vector<64x128xf32> to vector<64x128xbf16>
    %c0_6 = arith.constant 0 : index
    %c0_7 = arith.constant 0 : index
    %10 = vector.load %arg4[%c0_6, %c0_7] : memref<128x128xbf16, #tpu.memory_space<vmem>>, vector<128x128xbf16>
    %cst_8 = arith.constant dense<0.000000e+00> : vector<64x128xf32>
    %11 = tpu.matmul %9, %10, %cst_8 {dimension_numbers = #tpu.dot_dimension_numbers<[1], [0], [0], [1], [0, 0, 1, 1], [], []>} : vector<64x128xbf16>, vector<128x128xbf16>, vector<64x128xf32> -> vector<64x128xf32>
    %c0_9 = arith.constant 0 : index
    %c0_10 = arith.constant 0 : index
    %12 = vector.load %arg5[%c0_9, %c0_10] : memref<1x128xf32, #tpu.memory_space<vmem>>, vector<1x128xf32>
    %13 = vector.broadcast %12 : vector<1x128xf32> to vector<64x128xf32>
    %14 = arith.addf %11, %13 : vector<64x128xf32>
    %15 = arith.truncf %14 : vector<64x128xf32> to vector<64x128xbf16>
    %c0_11 = arith.constant 0 : index
    %c0_12 = arith.constant 0 : index
    %16 = vector.load %arg6[%c0_11, %c0_12] : memref<64x128xbf16, #tpu.memory_space<vmem>>, vector<64x128xbf16>
    tpu.vector_store %arg6[%c0_11, %c0_12], %15 {strides = array<i32>} : memref<64x128xbf16, #tpu.memory_space<vmem>>, vector<64x128xbf16>,
    return
  }
  func.func @transform_0(%arg0: i32) -> (i32, i32) {
    %c0_i32 = arith.constant 0 : i32
    %c0_i32_0 = arith.constant 0 : i32
    return %arg0, %c0_i32 : i32, i32
  }
  func.func @transform_1(%arg0: i32) -> (i32, i32) {
    %c0_i32 = arith.constant 0 : i32
    %c0_i32_0 = arith.constant 0 : i32
    %c0_i32_1 = arith.constant 0 : i32
    return %c0_i32, %c0_i32_0 : i32, i32
  }
  func.func @transform_2(%arg0: i32) -> (i32, i32) {
    %c0_i32 = arith.constant 0 : i32
    %c0_i32_0 = arith.constant 0 : i32
    %c0_i32_1 = arith.constant 0 : i32
    return %c0_i32, %c0_i32_0 : i32, i32
  }
  func.func @transform_3(%arg0: i32) -> (i32, i32) {
    %c0_i32 = arith.constant 0 : i32
    %c0_i32_0 = arith.constant 0 : i32
    %c0_i32_1 = arith.constant 0 : i32
    return %c0_i32, %c0_i32_0 : i32, i32
  }
  func.func @transform_4(%arg0: i32) -> (i32, i32) {
    %c0_i32 = arith.constant 0 : i32
    %c0_i32_0 = arith.constant 0 : i32
    %c0_i32_1 = arith.constant 0 : i32
    return %c0_i32, %c0_i32_0 : i32, i32
  }
  func.func @transform_5(%arg0: i32) -> (i32, i32) {
    %c0_i32 = arith.constant 0 : i32
    %c0_i32_0 = arith.constant 0 : i32
    return %arg0, %c0_i32 : i32, i32
  }
}

module attributes {stable_mosaic.version = 11 : i64} {
  func.func @_hyper_tail_kernel(%arg0: i32, %arg1: i32, %arg2: memref<64x128xf32, #tpu.memory_space<vmem>>, %arg3: memref<64x32xbf16, #tpu.memory_space<vmem>>, %arg4: memref<64x32xbf16, #tpu.memory_space<vmem>>, %arg5: memref<32x128xbf16, #tpu.memory_space<vmem>>, %arg6: memref<128x128xbf16, #tpu.memory_space<vmem>>, %arg7: memref<1x128xf32, #tpu.memory_space<vmem>>, %arg8: memref<128x128xbf16, #tpu.memory_space<vmem>>, %arg9: memref<1x128xf32, #tpu.memory_space<vmem>>, %arg10: memref<128x128xbf16, #tpu.memory_space<vmem>>, %arg11: memref<1x128xf32, #tpu.memory_space<vmem>>, %arg12: memref<128x128xbf16, #tpu.memory_space<vmem>>, %arg13: memref<1x128xf32, #tpu.memory_space<vmem>>, %arg14: memref<128x128xbf16, #tpu.memory_space<vmem>>, %arg15: memref<128x128xbf16, #tpu.memory_space<vmem>>, %arg16: memref<128x128xbf16, #tpu.memory_space<vmem>>, %arg17: memref<1x128xf32, #tpu.memory_space<vmem>>, %arg18: memref<128x128xbf16, #tpu.memory_space<vmem>>, %arg19: memref<1x128xf32, #tpu.memory_space<vmem>>, %arg20: memref<1x128xf32, #tpu.memory_space<vmem>>, %arg21: memref<1x128xf32, #tpu.memory_space<vmem>>, %arg22: memref<64x128xf32, #tpu.memory_space<vmem>>, %arg23: memref<64x128xf32, #tpu.memory_space<vmem>>, %arg24: memref<64x128xf32, #tpu.memory_space<vmem>>) attributes {dimension_semantics = [#tpu.dimension_semantics<parallel>, #tpu.dimension_semantics<arbitrary>], iteration_bounds = array<i64: 1, 1>, scalar_prefetch = 0 : i64, scratch_operands = 2 : i64, tpu.core_type = #tpu.core_type<tc>, window_params = [{transform_indices = @transform_0, window_bounds = array<i64: 64, 128>}, {transform_indices = @transform_1, window_bounds = array<i64: 64, 32>}, {transform_indices = @transform_2, window_bounds = array<i64: 64, 32>}, {transform_indices = @transform_3, window_bounds = array<i64: 32, 128>}, {pipeline_mode = #tpu.pipeline_mode<synchronous>, transform_indices = @transform_4, window_bounds = array<i64: 128, 128>}, {pipeline_mode = #tpu.pipeline_mode<synchronous>, transform_indices = @transform_5, window_bounds = array<i64: 1, 128>}, {pipeline_mode = #tpu.pipeline_mode<synchronous>, transform_indices = @transform_6, window_bounds = array<i64: 128, 128>}, {pipeline_mode = #tpu.pipeline_mode<synchronous>, transform_indices = @transform_7, window_bounds = array<i64: 1, 128>}, {pipeline_mode = #tpu.pipeline_mode<synchronous>, transform_indices = @transform_8, window_bounds = array<i64: 128, 128>}, {pipeline_mode = #tpu.pipeline_mode<synchronous>, transform_indices = @transform_9, window_bounds = array<i64: 1, 128>}, {pipeline_mode = #tpu.pipeline_mode<synchronous>, transform_indices = @transform_10, window_bounds = array<i64: 128, 128>}, {pipeline_mode = #tpu.pipeline_mode<synchronous>, transform_indices = @transform_11, window_bounds = array<i64: 1, 128>}, {pipeline_mode = #tpu.pipeline_mode<synchronous>, transform_indices = @transform_12, window_bounds = array<i64: 128, 128>}, {pipeline_mode = #tpu.pipeline_mode<synchronous>, transform_indices = @transform_13, window_bounds = array<i64: 128, 128>}, {pipeline_mode = #tpu.pipeline_mode<synchronous>, transform_indices = @transform_14, window_bounds = array<i64: 128, 128>}, {pipeline_mode = #tpu.pipeline_mode<synchronous>, transform_indices = @transform_15, window_bounds = array<i64: 1, 128>}, {pipeline_mode = #tpu.pipeline_mode<synchronous>, transform_indices = @transform_16, window_bounds = array<i64: 128, 128>}, {pipeline_mode = #tpu.pipeline_mode<synchronous>, transform_indices = @transform_17, window_bounds = array<i64: 1, 128>}, {pipeline_mode = #tpu.pipeline_mode<synchronous>, transform_indices = @transform_18, window_bounds = array<i64: 1, 128>}, {pipeline_mode = #tpu.pipeline_mode<synchronous>, transform_indices = @transform_19, window_bounds = array<i64: 1, 128>}, {transform_indices = @transform_20, window_bounds = array<i64: 64, 128>}]} {
    %c0_i32 = arith.constant 0 : i32
    %0 = arith.cmpi eq, %arg1, %c0_i32 : i32
    %1 = arith.extui %0 : i1 to i32
    %c0_i32_0 = arith.constant 0 : i32
    %2 = arith.cmpi ne, %1, %c0_i32_0 : i32
    scf.if %2 {
      %cst_17 = arith.constant 0.000000e+00 : f32
      %17 = vector.broadcast %cst_17 : f32 to vector<64x128xf32>
      %c0_18 = arith.constant 0 : index
      %c0_19 = arith.constant 0 : index
      %18 = vector.load %arg23[%c0_18, %c0_19] : memref<64x128xf32, #tpu.memory_space<vmem>>, vector<64x128xf32>
      tpu.vector_store %arg23[%c0_18, %c0_19], %17 {strides = array<i32>} : memref<64x128xf32, #tpu.memory_space<vmem>>, vector<64x128xf32>,
      %cst_20 = arith.constant 0.000000e+00 : f32
      %19 = vector.broadcast %cst_20 : f32 to vector<64x128xf32>
      %c0_21 = arith.constant 0 : index
      %c0_22 = arith.constant 0 : index
      %20 = vector.load %arg24[%c0_21, %c0_22] : memref<64x128xf32, #tpu.memory_space<vmem>>, vector<64x128xf32>
      tpu.vector_store %arg24[%c0_21, %c0_22], %19 {strides = array<i32>} : memref<64x128xf32, #tpu.memory_space<vmem>>, vector<64x128xf32>,
    } else {
    }
    %c0 = arith.constant 0 : index
    %c0_1 = arith.constant 0 : index
    %3 = vector.load %arg5[%c0, %c0_1] : memref<32x128xbf16, #tpu.memory_space<vmem>>, vector<32x128xbf16>
    %c0_2 = arith.constant 0 : index
    %c0_3 = arith.constant 0 : index
    %4 = vector.load %arg23[%c0_2, %c0_3] : memref<64x128xf32, #tpu.memory_space<vmem>>, vector<64x128xf32>
    %c0_4 = arith.constant 0 : index
    %c0_5 = arith.constant 0 : index
    %5 = vector.load %arg3[%c0_4, %c0_5] : memref<64x32xbf16, #tpu.memory_space<vmem>>, vector<64x32xbf16>
    %cst = arith.constant dense<0.000000e+00> : vector<64x128xf32>
    %6 = tpu.matmul %5, %3, %cst {dimension_numbers = #tpu.dot_dimension_numbers<[1], [0], [0], [1], [0, 0, 1, 1], [], []>} : vector<64x32xbf16>, vector<32x128xbf16>, vector<64x128xf32> -> vector<64x128xf32>
    %7 = arith.addf %4, %6 : vector<64x128xf32>
    %c0_6 = arith.constant 0 : index
    %c0_7 = arith.constant 0 : index
    %8 = vector.load %arg23[%c0_6, %c0_7] : memref<64x128xf32, #tpu.memory_space<vmem>>, vector<64x128xf32>
    tpu.vector_store %arg23[%c0_6, %c0_7], %7 {strides = array<i32>} : memref<64x128xf32, #tpu.memory_space<vmem>>, vector<64x128xf32>,
    %c0_8 = arith.constant 0 : index
    %c0_9 = arith.constant 0 : index
    %9 = vector.load %arg24[%c0_8, %c0_9] : memref<64x128xf32, #tpu.memory_space<vmem>>, vector<64x128xf32>
    %c0_10 = arith.constant 0 : index
    %c0_11 = arith.constant 0 : index
    %10 = vector.load %arg4[%c0_10, %c0_11] : memref<64x32xbf16, #tpu.memory_space<vmem>>, vector<64x32xbf16>
    %cst_12 = arith.constant dense<0.000000e+00> : vector<64x128xf32>
    %11 = tpu.matmul %10, %3, %cst_12 {dimension_numbers = #tpu.dot_dimension_numbers<[1], [0], [0], [1], [0, 0, 1, 1], [], []>} : vector<64x32xbf16>, vector<32x128xbf16>, vector<64x128xf32> -> vector<64x128xf32>
    %12 = arith.addf %9, %11 : vector<64x128xf32>
    %c0_13 = arith.constant 0 : index
    %c0_14 = arith.constant 0 : index
    %13 = vector.load %arg24[%c0_13, %c0_14] : memref<64x128xf32, #tpu.memory_space<vmem>>, vector<64x128xf32>
    tpu.vector_store %arg24[%c0_13, %c0_14], %12 {strides = array<i32>} : memref<64x128xf32, #tpu.memory_space<vmem>>, vector<64x128xf32>,
    %c0_i32_15 = arith.constant 0 : i32
    %14 = arith.cmpi eq, %arg1, %c0_i32_15 : i32
    %15 = arith.extui %14 : i1 to i32
    %c0_i32_16 = arith.constant 0 : i32
    %16 = arith.cmpi ne, %15, %c0_i32_16 : i32
    scf.if %16 {
      %c0_17 = arith.constant 0 : index
      %c0_18 = arith.constant 0 : index
      %17 = vector.load %arg23[%c0_17, %c0_18] : memref<64x128xf32, #tpu.memory_space<vmem>>, vector<64x128xf32>
      %18 = arith.truncf %17 : vector<64x128xf32> to vector<64x128xbf16>
      %c0_19 = arith.constant 0 : index
      %c0_20 = arith.constant 0 : index
      %19 = vector.load %arg6[%c0_19, %c0_20] : memref<128x128xbf16, #tpu.memory_space<vmem>>, vector<128x128xbf16>
      %cst_21 = arith.constant dense<0.000000e+00> : vector<64x128xf32>
      %20 = tpu.matmul %18, %19, %cst_21 {dimension_numbers = #tpu.dot_dimension_numbers<[1], [0], [0], [1], [0, 0, 1, 1], [], []>} : vector<64x128xbf16>, vector<128x128xbf16>, vector<64x128xf32> -> vector<64x128xf32>
      %c0_22 = arith.constant 0 : index
      %c0_23 = arith.constant 0 : index
      %21 = vector.load %arg7[%c0_22, %c0_23] : memref<1x128xf32, #tpu.memory_space<vmem>>, vector<1x128xf32>
      %22 = vector.broadcast %21 : vector<1x128xf32> to vector<64x128xf32>
      %23 = arith.addf %20, %22 : vector<64x128xf32>
      %cst_24 = arith.constant 0.000000e+00 : f32
      %24 = vector.broadcast %cst_24 : f32 to vector<64x128xf32>
      %25 = arith.maximumf %23, %24 : vector<64x128xf32>
      %26 = arith.truncf %25 : vector<64x128xf32> to vector<64x128xbf16>
      %c0_25 = arith.constant 0 : index
      %c0_26 = arith.constant 0 : index
      %27 = vector.load %arg8[%c0_25, %c0_26] : memref<128x128xbf16, #tpu.memory_space<vmem>>, vector<128x128xbf16>
      %cst_27 = arith.constant dense<0.000000e+00> : vector<64x128xf32>
      %28 = tpu.matmul %26, %27, %cst_27 {dimension_numbers = #tpu.dot_dimension_numbers<[1], [0], [0], [1], [0, 0, 1, 1], [], []>} : vector<64x128xbf16>, vector<128x128xbf16>, vector<64x128xf32> -> vector<64x128xf32>
      %c0_28 = arith.constant 0 : index
      %c0_29 = arith.constant 0 : index
      %29 = vector.load %arg9[%c0_28, %c0_29] : memref<1x128xf32, #tpu.memory_space<vmem>>, vector<1x128xf32>
      %30 = vector.broadcast %29 : vector<1x128xf32> to vector<64x128xf32>
      %31 = arith.addf %28, %30 : vector<64x128xf32>
      %c0_30 = arith.constant 0 : index
      %c0_31 = arith.constant 0 : index
      %32 = vector.load %arg24[%c0_30, %c0_31] : memref<64x128xf32, #tpu.memory_space<vmem>>, vector<64x128xf32>
      %33 = arith.truncf %32 : vector<64x128xf32> to vector<64x128xbf16>
      %c0_32 = arith.constant 0 : index
      %c0_33 = arith.constant 0 : index
      %34 = vector.load %arg10[%c0_32, %c0_33] : memref<128x128xbf16, #tpu.memory_space<vmem>>, vector<128x128xbf16>
      %cst_34 = arith.constant dense<0.000000e+00> : vector<64x128xf32>
      %35 = tpu.matmul %33, %34, %cst_34 {dimension_numbers = #tpu.dot_dimension_numbers<[1], [0], [0], [1], [0, 0, 1, 1], [], []>} : vector<64x128xbf16>, vector<128x128xbf16>, vector<64x128xf32> -> vector<64x128xf32>
      %c0_35 = arith.constant 0 : index
      %c0_36 = arith.constant 0 : index
      %36 = vector.load %arg11[%c0_35, %c0_36] : memref<1x128xf32, #tpu.memory_space<vmem>>, vector<1x128xf32>
      %37 = vector.broadcast %36 : vector<1x128xf32> to vector<64x128xf32>
      %38 = arith.addf %35, %37 : vector<64x128xf32>
      %cst_37 = arith.constant 0.000000e+00 : f32
      %39 = vector.broadcast %cst_37 : f32 to vector<64x128xf32>
      %40 = arith.maximumf %38, %39 : vector<64x128xf32>
      %41 = arith.truncf %40 : vector<64x128xf32> to vector<64x128xbf16>
      %c0_38 = arith.constant 0 : index
      %c0_39 = arith.constant 0 : index
      %42 = vector.load %arg12[%c0_38, %c0_39] : memref<128x128xbf16, #tpu.memory_space<vmem>>, vector<128x128xbf16>
      %cst_40 = arith.constant dense<0.000000e+00> : vector<64x128xf32>
      %43 = tpu.matmul %41, %42, %cst_40 {dimension_numbers = #tpu.dot_dimension_numbers<[1], [0], [0], [1], [0, 0, 1, 1], [], []>} : vector<64x128xbf16>, vector<128x128xbf16>, vector<64x128xf32> -> vector<64x128xf32>
      %c0_41 = arith.constant 0 : index
      %c0_42 = arith.constant 0 : index
      %44 = vector.load %arg13[%c0_41, %c0_42] : memref<1x128xf32, #tpu.memory_space<vmem>>, vector<1x128xf32>
      %45 = vector.broadcast %44 : vector<1x128xf32> to vector<64x128xf32>
      %46 = arith.addf %43, %45 : vector<64x128xf32>
      %c0_43 = arith.constant 0 : index
      %c0_44 = arith.constant 0 : index
      %47 = vector.load %arg2[%c0_43, %c0_44] : memref<64x128xf32, #tpu.memory_space<vmem>>, vector<64x128xf32>
      %48 = arith.truncf %47 : vector<64x128xf32> to vector<64x128xbf16>
      %c0_45 = arith.constant 0 : index
      %c0_46 = arith.constant 0 : index
      %49 = vector.load %arg14[%c0_45, %c0_46] : memref<128x128xbf16, #tpu.memory_space<vmem>>, vector<128x128xbf16>
      %cst_47 = arith.constant dense<0.000000e+00> : vector<64x128xf32>
      %50 = tpu.matmul %48, %49, %cst_47 {dimension_numbers = #tpu.dot_dimension_numbers<[1], [0], [0], [1], [0, 0, 1, 1], [], []>} : vector<64x128xbf16>, vector<128x128xbf16>, vector<64x128xf32> -> vector<64x128xf32>
      %51 = arith.truncf %31 : vector<64x128xf32> to vector<64x128xbf16>
      %c0_48 = arith.constant 0 : index
      %c0_49 = arith.constant 0 : index
      %52 = vector.load %arg15[%c0_48, %c0_49] : memref<128x128xbf16, #tpu.memory_space<vmem>>, vector<128x128xbf16>
      %cst_50 = arith.constant dense<0.000000e+00> : vector<64x128xf32>
      %53 = tpu.matmul %51, %52, %cst_50 {dimension_numbers = #tpu.dot_dimension_numbers<[1], [0], [0], [1], [0, 0, 1, 1], [], []>} : vector<64x128xbf16>, vector<128x128xbf16>, vector<64x128xf32> -> vector<64x128xf32>
      %54 = arith.addf %50, %53 : vector<64x128xf32>
      %55 = arith.truncf %46 : vector<64x128xf32> to vector<64x128xbf16>
      %c0_51 = arith.constant 0 : index
      %c0_52 = arith.constant 0 : index
      %56 = vector.load %arg16[%c0_51, %c0_52] : memref<128x128xbf16, #tpu.memory_space<vmem>>, vector<128x128xbf16>
      %cst_53 = arith.constant dense<0.000000e+00> : vector<64x128xf32>
      %57 = tpu.matmul %55, %56, %cst_53 {dimension_numbers = #tpu.dot_dimension_numbers<[1], [0], [0], [1], [0, 0, 1, 1], [], []>} : vector<64x128xbf16>, vector<128x128xbf16>, vector<64x128xf32> -> vector<64x128xf32>
      %58 = arith.addf %54, %57 : vector<64x128xf32>
      %c0_54 = arith.constant 0 : index
      %c0_55 = arith.constant 0 : index
      %59 = vector.load %arg17[%c0_54, %c0_55] : memref<1x128xf32, #tpu.memory_space<vmem>>, vector<1x128xf32>
      %60 = vector.broadcast %59 : vector<1x128xf32> to vector<64x128xf32>
      %61 = arith.addf %58, %60 : vector<64x128xf32>
      %cst_56 = arith.constant 0.000000e+00 : f32
      %62 = vector.broadcast %cst_56 : f32 to vector<64x128xf32>
      %63 = arith.maximumf %61, %62 : vector<64x128xf32>
      %64 = arith.truncf %63 : vector<64x128xf32> to vector<64x128xbf16>
      %c0_57 = arith.constant 0 : index
      %c0_58 = arith.constant 0 : index
      %65 = vector.load %arg18[%c0_57, %c0_58] : memref<128x128xbf16, #tpu.memory_space<vmem>>, vector<128x128xbf16>
      %cst_59 = arith.constant dense<0.000000e+00> : vector<64x128xf32>
      %66 = tpu.matmul %64, %65, %cst_59 {dimension_numbers = #tpu.dot_dimension_numbers<[1], [0], [0], [1], [0, 0, 1, 1], [], []>} : vector<64x128xbf16>, vector<128x128xbf16>, vector<64x128xf32> -> vector<64x128xf32>
      %c0_60 = arith.constant 0 : index
      %c0_61 = arith.constant 0 : index
      %67 = vector.load %arg19[%c0_60, %c0_61] : memref<1x128xf32, #tpu.memory_space<vmem>>, vector<1x128xf32>
      %68 = vector.broadcast %67 : vector<1x128xf32> to vector<64x128xf32>
      %69 = arith.addf %66, %68 : vector<64x128xf32>
      %70 = tpu.iota {dimensions = array<i32: 1>} : vector<64x128xi32>
      %c32_i32 = arith.constant 32 : i32
      %71 = vector.broadcast %c32_i32 : i32 to vector<64x128xi32>
      %72 = arith.cmpi slt, %70, %71 : vector<64x128xi32>
      %cst_62 = arith.constant 0.000000e+00 : f32
      %73 = vector.broadcast %cst_62 : f32 to vector<64x128xf32>
      %74 = arith.select %72, %69, %73 : vector<64x128xi1>, vector<64x128xf32>
      %cst_63 = arith.constant dense<0.000000e+00> : vector<64xf32>
      %75 = vector.multi_reduction <add>, %74, %cst_63 [1] : vector<64x128xf32> to vector<64xf32>
      %76 = vector.shape_cast %75 : vector<64xf32> to vector<64x1xf32>
      %cst_64 = arith.constant 3.125000e-02 : f32
      %77 = vector.broadcast %cst_64 : f32 to vector<64x1xf32>
      %78 = arith.mulf %76, %77 : vector<64x1xf32>
      %79 = vector.broadcast %78 : vector<64x1xf32> to vector<64x128xf32>
      %80 = arith.subf %69, %79 : vector<64x128xf32>
      %cst_65 = arith.constant 0.000000e+00 : f32
      %81 = vector.broadcast %cst_65 : f32 to vector<64x128xf32>
      %82 = arith.select %72, %80, %81 : vector<64x128xi1>, vector<64x128xf32>
      %83 = arith.mulf %82, %82 : vector<64x128xf32>
      %cst_66 = arith.constant dense<0.000000e+00> : vector<64xf32>
      %84 = vector.multi_reduction <add>, %83, %cst_66 [1] : vector<64x128xf32> to vector<64xf32>
      %85 = vector.shape_cast %84 : vector<64xf32> to vector<64x1xf32>
      %cst_67 = arith.constant 3.125000e-02 : f32
      %86 = vector.broadcast %cst_67 : f32 to vector<64x1xf32>
      %87 = arith.mulf %85, %86 : vector<64x1xf32>
      %cst_68 = arith.constant 9.99999974E-6 : f32
      %88 = vector.broadcast %cst_68 : f32 to vector<64x1xf32>
      %89 = arith.addf %87, %88 : vector<64x1xf32>
      %90 = math.rsqrt %89 : vector<64x1xf32>
      %91 = vector.broadcast %90 : vector<64x1xf32> to vector<64x128xf32>
      %92 = arith.mulf %82, %91 : vector<64x128xf32>
      %c0_69 = arith.constant 0 : index
      %c0_70 = arith.constant 0 : index
      %93 = vector.load %arg20[%c0_69, %c0_70] : memref<1x128xf32, #tpu.memory_space<vmem>>, vector<1x128xf32>
      %94 = vector.broadcast %93 : vector<1x128xf32> to vector<64x128xf32>
      %95 = arith.mulf %92, %94 : vector<64x128xf32>
      %c0_71 = arith.constant 0 : index
      %c0_72 = arith.constant 0 : index
      %96 = vector.load %arg21[%c0_71, %c0_72] : memref<1x128xf32, #tpu.memory_space<vmem>>, vector<1x128xf32>
      %97 = vector.broadcast %96 : vector<1x128xf32> to vector<64x128xf32>
      %98 = arith.addf %95, %97 : vector<64x128xf32>
      %cst_73 = arith.constant 0.000000e+00 : f32
      %99 = vector.broadcast %cst_73 : f32 to vector<64x128xf32>
      %100 = arith.cmpf ogt, %98, %99 : vector<64x128xf32>
      %cst_74 = arith.constant 1.000000e-01 : f32
      %101 = vector.broadcast %cst_74 : f32 to vector<64x128xf32>
      %102 = arith.mulf %101, %98 : vector<64x128xf32>
      %103 = arith.select %100, %98, %102 : vector<64x128xi1>, vector<64x128xf32>
      %104 = arith.addf %103, %47 : vector<64x128xf32>
      %c0_75 = arith.constant 0 : index
      %c0_76 = arith.constant 0 : index
      %105 = vector.load %arg22[%c0_75, %c0_76] : memref<64x128xf32, #tpu.memory_space<vmem>>, vector<64x128xf32>
      tpu.vector_store %arg22[%c0_75, %c0_76], %104 {strides = array<i32>} : memref<64x128xf32, #tpu.memory_space<vmem>>, vector<64x128xf32>,
    } else {
    }
    return
  }
  func.func @transform_0(%arg0: i32, %arg1: i32) -> (i32, i32) {
    %c0_i32 = arith.constant 0 : i32
    %c0_i32_0 = arith.constant 0 : i32
    return %arg0, %c0_i32 : i32, i32
  }
  func.func @transform_1(%arg0: i32, %arg1: i32) -> (i32, i32) {
    %c0_i32 = arith.constant 0 : i32
    return %arg0, %arg1 : i32, i32
  }
  func.func @transform_2(%arg0: i32, %arg1: i32) -> (i32, i32) {
    %c0_i32 = arith.constant 0 : i32
    return %arg0, %arg1 : i32, i32
  }
  func.func @transform_3(%arg0: i32, %arg1: i32) -> (i32, i32) {
    %c0_i32 = arith.constant 0 : i32
    %c0_i32_0 = arith.constant 0 : i32
    return %arg1, %c0_i32 : i32, i32
  }
  func.func @transform_4(%arg0: i32, %arg1: i32) -> (i32, i32) {
    %c0_i32 = arith.constant 0 : i32
    %c0_i32_0 = arith.constant 0 : i32
    %c0_i32_1 = arith.constant 0 : i32
    return %c0_i32, %c0_i32_0 : i32, i32
  }
  func.func @transform_5(%arg0: i32, %arg1: i32) -> (i32, i32) {
    %c0_i32 = arith.constant 0 : i32
    %c0_i32_0 = arith.constant 0 : i32
    %c0_i32_1 = arith.constant 0 : i32
    return %c0_i32, %c0_i32_0 : i32, i32
  }
  func.func @transform_6(%arg0: i32, %arg1: i32) -> (i32, i32) {
    %c0_i32 = arith.constant 0 : i32
    %c0_i32_0 = arith.constant 0 : i32
    %c0_i32_1 = arith.constant 0 : i32
    return %c0_i32, %c0_i32_0 : i32, i32
  }
  func.func @transform_7(%arg0: i32, %arg1: i32) -> (i32, i32) {
    %c0_i32 = arith.constant 0 : i32
    %c0_i32_0 = arith.constant 0 : i32
    %c0_i32_1 = arith.constant 0 : i32
    return %c0_i32, %c0_i32_0 : i32, i32
  }
  func.func @transform_8(%arg0: i32, %arg1: i32) -> (i32, i32) {
    %c0_i32 = arith.constant 0 : i32
    %c0_i32_0 = arith.constant 0 : i32
    %c0_i32_1 = arith.constant 0 : i32
    return %c0_i32, %c0_i32_0 : i32, i32
  }
  func.func @transform_9(%arg0: i32, %arg1: i32) -> (i32, i32) {
    %c0_i32 = arith.constant 0 : i32
    %c0_i32_0 = arith.constant 0 : i32
    %c0_i32_1 = arith.constant 0 : i32
    return %c0_i32, %c0_i32_0 : i32, i32
  }
  func.func @transform_10(%arg0: i32, %arg1: i32) -> (i32, i32) {
    %c0_i32 = arith.constant 0 : i32
    %c0_i32_0 = arith.constant 0 : i32
    %c0_i32_1 = arith.constant 0 : i32
    return %c0_i32, %c0_i32_0 : i32, i32
  }
  func.func @transform_11(%arg0: i32, %arg1: i32) -> (i32, i32) {
    %c0_i32 = arith.constant 0 : i32
    %c0_i32_0 = arith.constant 0 : i32
    %c0_i32_1 = arith.constant 0 : i32
    return %c0_i32, %c0_i32_0 : i32, i32
  }
  func.func @transform_12(%arg0: i32, %arg1: i32) -> (i32, i32) {
    %c0_i32 = arith.constant 0 : i32
    %c0_i32_0 = arith.constant 0 : i32
    %c0_i32_1 = arith.constant 0 : i32
    return %c0_i32, %c0_i32_0 : i32, i32
  }
  func.func @transform_13(%arg0: i32, %arg1: i32) -> (i32, i32) {
    %c0_i32 = arith.constant 0 : i32
    %c0_i32_0 = arith.constant 0 : i32
    %c0_i32_1 = arith.constant 0 : i32
    return %c0_i32, %c0_i32_0 : i32, i32
  }
  func.func @transform_14(%arg0: i32, %arg1: i32) -> (i32, i32) {
    %c0_i32 = arith.constant 0 : i32
    %c0_i32_0 = arith.constant 0 : i32
    %c0_i32_1 = arith.constant 0 : i32
    return %c0_i32, %c0_i32_0 : i32, i32
  }
  func.func @transform_15(%arg0: i32, %arg1: i32) -> (i32, i32) {
    %c0_i32 = arith.constant 0 : i32
    %c0_i32_0 = arith.constant 0 : i32
    %c0_i32_1 = arith.constant 0 : i32
    return %c0_i32, %c0_i32_0 : i32, i32
  }
  func.func @transform_16(%arg0: i32, %arg1: i32) -> (i32, i32) {
    %c0_i32 = arith.constant 0 : i32
    %c0_i32_0 = arith.constant 0 : i32
    %c0_i32_1 = arith.constant 0 : i32
    return %c0_i32, %c0_i32_0 : i32, i32
  }
  func.func @transform_17(%arg0: i32, %arg1: i32) -> (i32, i32) {
    %c0_i32 = arith.constant 0 : i32
    %c0_i32_0 = arith.constant 0 : i32
    %c0_i32_1 = arith.constant 0 : i32
    return %c0_i32, %c0_i32_0 : i32, i32
  }
  func.func @transform_18(%arg0: i32, %arg1: i32) -> (i32, i32) {
    %c0_i32 = arith.constant 0 : i32
    %c0_i32_0 = arith.constant 0 : i32
    %c0_i32_1 = arith.constant 0 : i32
    return %c0_i32, %c0_i32_0 : i32, i32
  }
  func.func @transform_19(%arg0: i32, %arg1: i32) -> (i32, i32) {
    %c0_i32 = arith.constant 0 : i32
    %c0_i32_0 = arith.constant 0 : i32
    %c0_i32_1 = arith.constant 0 : i32
    return %c0_i32, %c0_i32_0 : i32, i32
  }
  func.func @transform_20(%arg0: i32, %arg1: i32) -> (i32, i32) {
    %c0_i32 = arith.constant 0 : i32
    %c0_i32_0 = arith.constant 0 : i32
    return %arg0, %c0_i32 : i32, i32
  }
}

</mosaic_0001>

<bundles_post_ra>
// kernel: gnn_node_forward.9
= control target key start
LH: loop header
LB: loop body
LE: loop exit
PB: predicated region body
PF: predicated region fallthrough
CT: control target
= control target key end

     0   :  { %vm70_vm0 = vcmask 523264   ;;  %s209_s1 = inlined_call_operand.vmem [shape: bf16[64,128], index: 1, kind: input, shape index: {}]   ;;  %s210_s0 = inlined_call_operand.vmem [shape: bf16[32,64], index: 0, kind: input, shape index: {}]   ;;  %s211_s2 = inlined_call_operand.vmem [shape: bf16[32,128], index: 2, kind: output, shape index: {}]  }
   0x1   :  { %v154_v0 = vld [vmem:[%s209_s1 + $0x18] sm:$0xff]  ;;  %v153_v1 = vld [vmem:[%s209_s1 + $0x10] sm:$0xff]  ;;  %v152_v2 = vld [vmem:[%s209_s1 + $0x8] sm:$0xff] }
   0x2   :  { %81 = vmatpush.bf16.msra.mxu0 %v154_v0  ;;  %166 = vmatpush.bf16.msra.mxu1 %v154_v0  ;;  %v151_v3 = vld [vmem:[%s209_s1] sm:$0xff]  ;;  %v150_v5 = vld [vmem:[%s210_s0 + $0x8] sm:$0xff] }
   0x3   :  { %v149_v4 = vld [vmem:[%s210_s0] sm:$0xff] }
   0x6   :  { %82 = vmatpush.bf16.msra.mxu0 %v153_v1  ;;  %167 = vmatpush.bf16.msra.mxu1 %v153_v1 }
   0xa   :  { %83 = vmatpush.bf16.msra.mxu0 %v152_v2  ;;  %168 = vmatpush.bf16.msra.mxu1 %v152_v2 }
   0xe   :  { %84 = vmatpush.bf16.msra.mxu0 %v151_v3  ;;  %169 = vmatpush.bf16.msra.mxu1 %v151_v3 }
  0x11   :  { %147 = vmatmul.msk.bf16.vlgmr.msra.gmra.mxu0 %vm70_vm0, %v149_v4  ;;  %148 = vmatmul.msk.bf16.vlgmr.msra.gmra.mxu1 %vm70_vm0, %v150_v5 }
  0x8e   :  { %v86_v6 = vpop.f32.mrf.mxu0  ;;  %v91_v7 = vpop.f32.mrf.mxu1 }
  0x96   :  { %v88_v8 = vpop.f32.mrf.mxu0  ;;  %v93_v9 = vpop.f32.mrf.mxu1 }
  0x97   :  { %v158_v10 = vpack.c.bf16 %v88_v8, %v86_v6  ;;  %v163_v11 = vpack.c.bf16 %v93_v9, %v91_v7 }
  0x99   :  { %159 = vst [vmem:[%s211_s2] sm:$0xff] %v158_v10  }
  0x9a   :  { %165 = vst [vmem:[%s211_s2 + $0x8] sm:$0xff] %v163_v11  }

// kernel: gnn_node_forward.8
= control target key start
LH: loop header
LB: loop body
LE: loop exit
PB: predicated region body
PF: predicated region fallthrough
CT: control target
= control target key end

     0   :  { %10 = vsyncpa [#allocation3], 0  ;;  %s585_s0 = inlined_call_operand.vmem [shape: f32[64,128], index: 0, kind: input, shape index: {}]   ;;  %s586_s1 = inlined_call_operand.vmem [shape: bf16[128,128], index: 1, kind: input, shape index: {}]   ;;  %s587_s2 = inlined_call_operand.hbm [shape: f32[1,128], index: 2, kind: input, shape index: {}]   ;;  %s588_s3 = inlined_call_operand.vmem [shape: bf16[128,128], index: 3, kind: input, shape index: {}]   ;;  %s589_s4 = inlined_call_operand.hbm [shape: f32[1,128], index: 4, kind: input, shape index: {}]   ;;  %s590_s5 = inlined_call_operand.vmem [shape: bf16[64,128], index: 5, kind: output, shape index: {}]  }
   0x1   :  { %s21_s20 = sshll.u32 %s587_s2, 4  ;;  %s22_s20 = int_to_ptr.hbm [resolvable:$true] %s21_s20 }
   0x2   :  { %11 = vsyncpa [#allocation5], 0  ;;  %s463_s21 = smov [#allocation2]   ;;  %s34_s25 = sshll.u32 %s589_s4, 4  ;;  %s35_s25 = int_to_ptr.hbm [resolvable:$true] %s34_s25 }
   0x3   :  { %s23_s22 = sshll.u32 %s463_s21, 4  ;;  %s464_s26 = smov [#allocation4]   ;;  %s24_s22 = int_to_ptr.vmem [resolvable:$true] %s23_s22 }
   0x4   :  { %26 = dma.hbm_to_vmem [thread:$0]  %s22_s20, 16, %s24_s22, [#allocation3]  }
   0x5   :  { %s36_s27 = sshll.u32 %s464_s26, 4  ;;  %s37_s27 = int_to_ptr.vmem [resolvable:$true] %s36_s27 }
   0x6   :  { %39 = dma.hbm_to_vmem [thread:$0]  %s35_s25, 16, %s37_s27, [#allocation5]  }
   0x7   :  { %459 = dma.done.wait [#allocation3], 16  }
   0x8   :  { %460 = vsyncadd [#allocation3], 4294967280 }
   0x9   :  { %461 = dma.done.wait [#allocation5], 16  }
   0xa   :  { %462 = vsyncadd [#allocation5], 4294967280  ;;  %v359_v0 = vld [vmem:[%s586_s1 + $0x38] sm:$0xff]  ;;  %v358_v1 = vld [vmem:[%s586_s1 + $0x30] sm:$0xff] }
   0xb   :  { %128 = vmatpush.bf16.msra.mxu0 %v359_v0  ;;  %391 = vmatpush.bf16.msra.mxu2 %v359_v0  ;;  %v357_v2 = vld [vmem:[%s586_s1 + $0x28] sm:$0xff]  ;;  %v356_v3 = vld [vmem:[%s586_s1 + $0x20] sm:$0xff]  ;;  %v355_v4 = vld [vmem:[%s586_s1 + $0x18] sm:$0xff] }
   0xc   :  { %v367_v5 = vld [vmem:[%s588_s3 + $0x38] sm:$0xff]  ;;  %v354_v6 = vld [vmem:[%s586_s1 + $0x10] sm:$0xff]  ;;  %v353_v8 = vld [vmem:[%s586_s1 + $0x8] sm:$0xff] }
   0xd   :  { %237 = vmatpush.bf16.msra.mxu1 %v367_v5  ;;  %v366_v7 = vld [vmem:[%s588_s3 + $0x30] sm:$0xff]  ;;  %399 = vmatpush.bf16.msra.mxu3 %v367_v5  ;;  %v365_v9 = vld [vmem:[%s588_s3 + $0x28] sm:$0xff]  ;;  %v352_v10 = vld [vmem:[%s586_s1] sm:$0xff] }
   0xe   :  { %v48_v11 = vld [vmem:[%s585_s0] sm:$0xff]  ;;  %v49_v12 = vld [vmem:[%s585_s0 + $0x8] sm:$0xff]  ;;  %v50_v18 = vld [vmem:[%s585_s0 + $0x10] sm:$0xff] }
   0xf   :  { %129 = vmatpush.bf16.msra.mxu0 %v358_v1  ;;  %392 = vmatpush.bf16.msra.mxu2 %v358_v1  ;;  %v52_v13 = vld [vmem:[%s585_s0 + $0x20] sm:$0xff]  ;;  %v53_v14 = vld [vmem:[%s585_s0 + $0x28] sm:$0xff]  ;;  %v56_v16 = vpack.c.bf16 %v49_v12, %v48_v11  ;;  %v51_v19 = vld [vmem:[%s585_s0 + $0x18] sm:$0xff] }
  0x10   :  { %v364_v15 = vld [vmem:[%s588_s3 + $0x20] sm:$0xff]  ;;  %v58_v17 = vpack.c.bf16 %v53_v14, %v52_v13  ;;  %v54_v20 = vld [vmem:[%s585_s0 + $0x30] sm:$0xff]  ;;  %v55_v21 = vld [vmem:[%s585_s0 + $0x38] sm:$0xff]  ;;  %v57_v22 = vpack.c.bf16 %v51_v19, %v50_v18 }
  0x11   :  { %238 = vmatpush.bf16.msra.mxu1 %v366_v7  ;;  %400 = vmatpush.bf16.msra.mxu3 %v366_v7  ;;  %v59_v23 = vpack.c.bf16 %v55_v21, %v54_v20  ;;  %v363_v24 = vld [vmem:[%s588_s3 + $0x18] sm:$0xff]  ;;  %v362_v25 = vld [vmem:[%s588_s3 + $0x10] sm:$0xff]  ;;  %v361_v26 = vld [vmem:[%s588_s3 + $0x8] sm:$0xff] }
  0x12   :  { %v360_v27 = vld [vmem:[%s588_s3] sm:$0xff] }
  0x13   :  { %130 = vmatpush.bf16.msra.mxu0 %v357_v2  ;;  %393 = vmatpush.bf16.msra.mxu2 %v357_v2  ;;  %v409_v29 = vld [vmem:[#allocation2] ss:$0 sm:$0xff]  ;;  %v410_v58 = vld [vmem:[#allocation4] ss:$0 sm:$0xff] }
  0x15   :  { %239 = vmatpush.bf16.msra.mxu1 %v365_v9  ;;  %401 = vmatpush.bf16.msra.mxu3 %v365_v9 }
  0x17   :  { %131 = vmatpush.bf16.msra.mxu0 %v356_v3  ;;  %394 = vmatpush.bf16.msra.mxu2 %v356_v3 }
  0x19   :  { %240 = vmatpush.bf16.msra.mxu1 %v364_v15  ;;  %402 = vmatpush.bf16.msra.mxu3 %v364_v15 }
  0x1b   :  { %132 = vmatpush.bf16.msra.mxu0 %v355_v4  ;;  %395 = vmatpush.bf16.msra.mxu2 %v355_v4 }
  0x1d   :  { %241 = vmatpush.bf16.msra.mxu1 %v363_v24  ;;  %403 = vmatpush.bf16.msra.mxu3 %v363_v24 }
  0x1f   :  { %133 = vmatpush.bf16.msra.mxu0 %v354_v6  ;;  %396 = vmatpush.bf16.msra.mxu2 %v354_v6 }
  0x21   :  { %242 = vmatpush.bf16.msra.mxu1 %v362_v25  ;;  %404 = vmatpush.bf16.msra.mxu3 %v362_v25 }
  0x23   :  { %134 = vmatpush.bf16.msra.mxu0 %v353_v8  ;;  %397 = vmatpush.bf16.msra.mxu2 %v353_v8 }
  0x25   :  { %243 = vmatpush.bf16.msra.mxu1 %v361_v26  ;;  %405 = vmatpush.bf16.msra.mxu3 %v361_v26 }
  0x27   :  { %135 = vmatpush.bf16.msra.mxu0 %v352_v10  ;;  %398 = vmatpush.bf16.msra.mxu2 %v352_v10 }
  0x29   :  { %244 = vmatpush.bf16.msra.mxu1 %v360_v27  ;;  %406 = vmatpush.bf16.msra.mxu3 %v360_v27 }
  0x2a   :  { %136 = vmatmul.bf16.vlgmr.msra.gmra.mxu0 %v56_v16  ;;  %146 = vmatmul.bf16.vlgmr.msra.gmra.mxu2 %v58_v17 }
  0x3a   :  { %141 = vmatmul.bf16.gmra.mxu0 %v57_v22  ;;  %151 = vmatmul.bf16.gmra.mxu2 %v59_v23 }
  0xa7   :  { %v137_v28 = vpop.f32.mrf.mxu0 }
  0xa8   :  { %v138_v30 = vadd.f32 %v409_v29, %v137_v28 }
  0xaa   :  { %v157_v33 = vmax.f32 %v138_v30, 0.0 }
  0xad   :  { %v147_v31 = vpop.f32.mrf.mxu2 }
  0xae   :  { %v148_v36 = vadd.f32 %v409_v29, %v147_v31 }
  0xaf   :  { %v139_v32 = vpop.f32.mrf.mxu0 }
  0xb0   :  { %v140_v34 = vadd.f32 %v409_v29, %v139_v32  ;;  %v161_v41 = vmax.f32 %v148_v36, 0.0 }
  0xb2   :  { %v158_v35 = vmax.f32 %v140_v34, 0.0 }
  0xb4   :  { %v165_v37 = vpack.c.bf16 %v158_v35, %v157_v33 }
  0xb5   :  { %v149_v38 = vpop.f32.mrf.mxu2 }
  0xb6   :  { %v150_v39 = vadd.f32 %v409_v29, %v149_v38  ;;  %245 = vmatmul.bf16.vlgmr.msra.gmra.mxu1 %v165_v37 }
  0xb7   :  { %v142_v40 = vpop.f32.mrf.mxu0 }
  0xb8   :  { %v162_v42 = vmax.f32 %v150_v39, 0.0  ;;  %v143_v44 = vadd.f32 %v409_v29, %v142_v40 }
  0xba   :  { %v167_v43 = vpack.c.bf16 %v162_v42, %v161_v41  ;;  %v159_v47 = vmax.f32 %v143_v44, 0.0 }
  0xbc   :  { %255 = vmatmul.bf16.vlgmr.msra.gmra.mxu3 %v167_v43 }
  0xbd   :  { %v152_v45 = vpop.f32.mrf.mxu2 }
  0xbe   :  { %v153_v50 = vadd.f32 %v409_v29, %v152_v45 }
  0xbf   :  { %v144_v46 = vpop.f32.mrf.mxu0 }
  0xc0   :  { %v145_v48 = vadd.f32 %v409_v29, %v144_v46  ;;  %v163_v54 = vmax.f32 %v153_v50, 0.0 }
  0xc2   :  { %v160_v49 = vmax.f32 %v145_v48, 0.0 }
  0xc4   :  { %v166_v51 = vpack.c.bf16 %v160_v49, %v159_v47 }
  0xc5   :  { %v154_v52 = vpop.f32.mrf.mxu2 }
  0xc6   :  { %v155_v53 = vadd.f32 %v409_v29, %v154_v52  ;;  %250 = vmatmul.bf16.gmra.mxu1 %v166_v51 }
  0xc8   :  { %v164_v55 = vmax.f32 %v155_v53, 0.0 }
  0xca   :  { %v168_v56 = vpack.c.bf16 %v164_v55, %v163_v54 }
  0xcc   :  { %260 = vmatmul.bf16.gmra.mxu3 %v168_v56 }
 0x133   :  { %v246_v57 = vpop.f32.mrf.mxu1 }
 0x134   :  { %v247_v60 = vadd.f32 %v410_v58, %v246_v57 }
 0x13b   :  { %v248_v59 = vpop.f32.mrf.mxu1 }
 0x13c   :  { %v249_v61 = vadd.f32 %v410_v58, %v248_v59 }
 0x13e   :  { %v371_v62 = vpack.c.bf16 %v249_v61, %v247_v60 }
 0x13f   :  { %v256_v63 = vpop.f32.mrf.mxu3 }
 0x140   :  { %372 = vst [vmem:[%s590_s5] sm:$0xff] %v371_v62   ;;  %v257_v2 = vadd.f32 %v410_v58, %v256_v63 }
 0x143   :  { %v251_v0 = vpop.f32.mrf.mxu1 }
 0x144   :  { %v252_v6 = vadd.f32 %v410_v58, %v251_v0 }
 0x147   :  { %v258_v1 = vpop.f32.mrf.mxu3 }
 0x148   :  { %v259_v3 = vadd.f32 %v410_v58, %v258_v1 }
 0x14a   :  { %v381_v4 = vpack.c.bf16 %v259_v3, %v257_v2 }
 0x14b   :  { %v253_v5 = vpop.f32.mrf.mxu1 }
 0x14c   :  { %389 = vst [vmem:[%s590_s5 + $0x10] sm:$0xff] %v381_v4   ;;  %v254_v7 = vadd.f32 %v410_v58, %v253_v5 }
 0x14e   :  { %v376_v8 = vpack.c.bf16 %v254_v7, %v252_v6 }
 0x14f   :  { %v261_v9 = vpop.f32.mrf.mxu3 }
 0x150   :  { %388 = vst [vmem:[%s590_s5 + $0x8] sm:$0xff] %v376_v8   ;;  %v262_v11 = vadd.f32 %v410_v58, %v261_v9 }
 0x157   :  { %v263_v10 = vpop.f32.mrf.mxu3 }
 0x158   :  { %v264_v12 = vadd.f32 %v410_v58, %v263_v10 }
 0x15a   :  { %v386_v13 = vpack.c.bf16 %v264_v12, %v262_v11 }
 0x15c   :  { %390 = vst [vmem:[%s590_s5 + $0x18] sm:$0xff] %v386_v13  }
 0x15d   :  { %286 = vsyncpa [#allocation3], 1 }
 0x15e   :  { %287 = vsyncpa [#allocation5], 1 }

// kernel: gnn_node_forward.7
= control target key start
LH: loop header
LB: loop body
LE: loop exit
PB: predicated region body
PF: predicated region fallthrough
CT: control target
= control target key end

     0   :  { %10 = vsyncpa [#allocation3], 0  ;;  %s654_s0 = inlined_call_operand.vmem [shape: f32[64,128], index: 0, kind: input, shape index: {}]   ;;  %s655_s1 = inlined_call_operand.hbm [shape: bf16[128,128], index: 1, kind: input, shape index: {}]   ;;  %s656_s2 = inlined_call_operand.hbm [shape: f32[1,128], index: 2, kind: input, shape index: {}]   ;;  %s657_s3 = inlined_call_operand.hbm [shape: bf16[128,128], index: 3, kind: input, shape index: {}]   ;;  %s658_s4 = inlined_call_operand.hbm [shape: f32[1,128], index: 4, kind: input, shape index: {}]   ;;  %s659_s5 = inlined_call_operand.vmem [shape: f32[64,128], index: 5, kind: output, shape index: {}]  }
   0x1   :  { %11 = vsyncpa [#allocation5], 0  ;;  %s33_s20 = sshll.u32 %s656_s2, 4  ;;  %s34_s20 = int_to_ptr.hbm [resolvable:$true] %s33_s20 }
   0x2   :  { %12 = vsyncpa [#allocation8], 0  ;;  %s558_s21 = smov [#allocation4]   ;;  %s19_s25 = sshll.u32 %s655_s1, 4  ;;  %s20_s25 = int_to_ptr.hbm [resolvable:$true] %s19_s25 }
   0x3   :  { %s35_s22 = sshll.u32 %s558_s21, 4  ;;  %s559_s26 = smov [#allocation2]   ;;  %s36_s22 = int_to_ptr.vmem [resolvable:$true] %s35_s22 }
   0x4   :  { %38 = dma.hbm_to_vmem [thread:$0]  %s34_s20, 16, %s36_s22, [#allocation5]  }
   0x5   :  { %s21_s27 = sshll.u32 %s559_s26, 4  ;;  %s560_s28 = smov 64   ;;  %s22_s27 = int_to_ptr.vmem [resolvable:$true] %s21_s27 }
   0x6   :  { %s561_s29 = smov 4   ;;  %s43_s2 = sshll.u32 %s657_s3, 4  ;;  %s44_s2 = int_to_ptr.hbm [resolvable:$true] %s43_s2 }
   0x7   :  { %27 = dma.hbm_to_vmem [thread:$0]  %s20_s25, 1024, %s22_s27, [#allocation3], %s560_s28, %s560_s28, %s561_s29  }
   0x8   :  { %s562_s7 = smov [#allocation6]   ;;  %s57_s1 = sshll.u32 %s658_s4, 4  ;;  %s58_s1 = int_to_ptr.hbm [resolvable:$true] %s57_s1 }
   0x9   :  { %s45_s8 = sshll.u32 %s562_s7, 4  ;;  %s563_s11 = smov [#allocation7]   ;;  %s46_s8 = int_to_ptr.vmem [resolvable:$true] %s45_s8 }
   0xa   :  { %51 = dma.hbm_to_vmem [thread:$0]  %s44_s2, 1024, %s46_s8, [#allocation5], %s560_s28, %s560_s28, %s561_s29  }
   0xb   :  { %s59_s12 = sshll.u32 %s563_s11, 4  ;;  %s60_s12 = int_to_ptr.vmem [resolvable:$true] %s59_s12 }
   0xc   :  { %62 = dma.hbm_to_vmem [thread:$0]  %s58_s1, 16, %s60_s12, [#allocation8]  }
   0xd   :  { %552 = dma.done.wait [#allocation3], 1024  }
   0xe   :  { %553 = vsyncadd [#allocation3], 4294966272 }
   0xf   :  { %554 = dma.done.wait [#allocation5], 1040  }
  0x10   :  { %555 = vsyncadd [#allocation5], 4294966256 }
  0x11   :  { %556 = dma.done.wait [#allocation8], 16  }
  0x12   :  { %557 = vsyncadd [#allocation8], 4294967280  ;;  %v423_v0 = vld [vmem:[#allocation2 + $0x38] sm:$0xff]  ;;  %v422_v1 = vld [vmem:[#allocation2 + $0x30] sm:$0xff] }
  0x13   :  { %159 = vmatpush.bf16.msra.mxu0 %v423_v0  ;;  %432 = vmatpush.bf16.msra.mxu2 %v423_v0  ;;  %v421_v2 = vld [vmem:[#allocation2 + $0x28] sm:$0xff]  ;;  %v420_v3 = vld [vmem:[#allocation2 + $0x20] sm:$0xff]  ;;  %v419_v4 = vld [vmem:[#allocation2 + $0x18] sm:$0xff] }
  0x14   :  { %v431_v5 = vld [vmem:[#allocation6 + $0x38] sm:$0xff]  ;;  %v418_v6 = vld [vmem:[#allocation2 + $0x10] sm:$0xff]  ;;  %v417_v8 = vld [vmem:[#allocation2 + $0x8] sm:$0xff] }
  0x15   :  { %284 = vmatpush.bf16.msra.mxu1 %v431_v5  ;;  %v430_v7 = vld [vmem:[#allocation6 + $0x30] sm:$0xff]  ;;  %440 = vmatpush.bf16.msra.mxu3 %v431_v5  ;;  %v429_v9 = vld [vmem:[#allocation6 + $0x28] sm:$0xff]  ;;  %v416_v10 = vld [vmem:[#allocation2] sm:$0xff] }
  0x16   :  { %v79_v11 = vld [vmem:[%s654_s0] sm:$0xff]  ;;  %v80_v12 = vld [vmem:[%s654_s0 + $0x8] sm:$0xff]  ;;  %v81_v18 = vld [vmem:[%s654_s0 + $0x10] sm:$0xff] }
  0x17   :  { %160 = vmatpush.bf16.msra.mxu0 %v422_v1  ;;  %433 = vmatpush.bf16.msra.mxu2 %v422_v1  ;;  %v83_v13 = vld [vmem:[%s654_s0 + $0x20] sm:$0xff]  ;;  %v84_v14 = vld [vmem:[%s654_s0 + $0x28] sm:$0xff]  ;;  %v87_v16 = vpack.c.bf16 %v80_v12, %v79_v11  ;;  %v82_v19 = vld [vmem:[%s654_s0 + $0x18] sm:$0xff] }
  0x18   :  { %v428_v15 = vld [vmem:[#allocation6 + $0x20] sm:$0xff]  ;;  %v89_v17 = vpack.c.bf16 %v84_v14, %v83_v13  ;;  %v85_v20 = vld [vmem:[%s654_s0 + $0x30] sm:$0xff]  ;;  %v86_v21 = vld [vmem:[%s654_s0 + $0x38] sm:$0xff]  ;;  %v88_v22 = vpack.c.bf16 %v82_v19, %v81_v18 }
  0x19   :  { %285 = vmatpush.bf16.msra.mxu1 %v430_v7  ;;  %441 = vmatpush.bf16.msra.mxu3 %v430_v7  ;;  %v90_v23 = vpack.c.bf16 %v86_v21, %v85_v20  ;;  %v427_v24 = vld [vmem:[#allocation6 + $0x18] sm:$0xff]  ;;  %v426_v25 = vld [vmem:[#allocation6 + $0x10] sm:$0xff]  ;;  %v425_v26 = vld [vmem:[#allocation6 + $0x8] sm:$0xff] }
  0x1a   :  { %v424_v27 = vld [vmem:[#allocation6] sm:$0xff]  ;;  %v454_v29 = vld [vmem:[#allocation4] ss:$0 sm:$0xff] }
  0x1b   :  { %161 = vmatpush.bf16.msra.mxu0 %v421_v2  ;;  %434 = vmatpush.bf16.msra.mxu2 %v421_v2  ;;  %v455_v1 = vld [vmem:[#allocation7] ss:$0 sm:$0xff] }
  0x1d   :  { %286 = vmatpush.bf16.msra.mxu1 %v429_v9  ;;  %442 = vmatpush.bf16.msra.mxu3 %v429_v9 }
  0x1f   :  { %162 = vmatpush.bf16.msra.mxu0 %v420_v3  ;;  %435 = vmatpush.bf16.msra.mxu2 %v420_v3 }
  0x21   :  { %287 = vmatpush.bf16.msra.mxu1 %v428_v15  ;;  %443 = vmatpush.bf16.msra.mxu3 %v428_v15 }
  0x23   :  { %163 = vmatpush.bf16.msra.mxu0 %v419_v4  ;;  %436 = vmatpush.bf16.msra.mxu2 %v419_v4 }
  0x25   :  { %288 = vmatpush.bf16.msra.mxu1 %v427_v24  ;;  %444 = vmatpush.bf16.msra.mxu3 %v427_v24 }
  0x27   :  { %164 = vmatpush.bf16.msra.mxu0 %v418_v6  ;;  %437 = vmatpush.bf16.msra.mxu2 %v418_v6 }
  0x29   :  { %289 = vmatpush.bf16.msra.mxu1 %v426_v25  ;;  %445 = vmatpush.bf16.msra.mxu3 %v426_v25 }
  0x2b   :  { %165 = vmatpush.bf16.msra.mxu0 %v417_v8  ;;  %438 = vmatpush.bf16.msra.mxu2 %v417_v8 }
  0x2d   :  { %290 = vmatpush.bf16.msra.mxu1 %v425_v26  ;;  %446 = vmatpush.bf16.msra.mxu3 %v425_v26 }
  0x2f   :  { %166 = vmatpush.bf16.msra.mxu0 %v416_v10  ;;  %439 = vmatpush.bf16.msra.mxu2 %v416_v10 }
  0x31   :  { %291 = vmatpush.bf16.msra.mxu1 %v424_v27  ;;  %447 = vmatpush.bf16.msra.mxu3 %v424_v27 }
  0x32   :  { %167 = vmatmul.bf16.vlgmr.msra.gmra.mxu0 %v87_v16  ;;  %177 = vmatmul.bf16.vlgmr.msra.gmra.mxu2 %v89_v17 }
  0x42   :  { %172 = vmatmul.bf16.gmra.mxu0 %v88_v22  ;;  %182 = vmatmul.bf16.gmra.mxu2 %v90_v23 }
  0xaf   :  { %v168_v28 = vpop.f32.mrf.mxu0 }
  0xb0   :  { %v169_v30 = vadd.f32 %v454_v29, %v168_v28 }
  0xb2   :  { %v196_v32 = vmul.f32 0.1, %v169_v30  ;;  %vm188_vm0 = vcmp.gt.f32.partialorder %v169_v30, 0.0 }
  0xb4   :  { %v204_v37 = vsel %vm188_vm0, %v169_v30, %v196_v32 }
  0xb5   :  { %v178_v31 = vpop.f32.mrf.mxu2 }
  0xb6   :  { %v179_v35 = vadd.f32 %v454_v29, %v178_v31 }
  0xb7   :  { %v170_v33 = vpop.f32.mrf.mxu0 }
  0xb8   :  { %v171_v34 = vadd.f32 %v454_v29, %v170_v33  ;;  %v200_v41 = vmul.f32 0.1, %v179_v35  ;;  %vm192_vm2 = vcmp.gt.f32.partialorder %v179_v35, 0.0 }
  0xba   :  { %v197_v36 = vmul.f32 0.1, %v171_v34  ;;  %vm189_vm1 = vcmp.gt.f32.partialorder %v171_v34, 0.0  ;;  %v208_v46 = vsel %vm192_vm2, %v179_v35, %v200_v41 }
  0xbc   :  { %v205_v38 = vsel %vm189_vm1, %v171_v34, %v197_v36 }
  0xbd   :  { %v180_v39 = vpop.f32.mrf.mxu2  ;;  %v212_v40 = vpack.c.bf16 %v205_v38, %v204_v37 }
  0xbe   :  { %v181_v42 = vadd.f32 %v454_v29, %v180_v39 }
  0xbf   :  { %v173_v43 = vpop.f32.mrf.mxu0  ;;  %292 = vmatmul.bf16.vlgmr.msra.gmra.mxu1 %v212_v40 }
  0xc0   :  { %v201_v44 = vmul.f32 0.1, %v181_v42  ;;  %vm193_vm3 = vcmp.gt.f32.partialorder %v181_v42, 0.0  ;;  %v174_v45 = vadd.f32 %v454_v29, %v173_v43 }
  0xc2   :  { %v209_v47 = vsel %vm193_vm3, %v181_v42, %v201_v44  ;;  %v198_v50 = vmul.f32 0.1, %v174_v45  ;;  %vm190_vm4 = vcmp.gt.f32.partialorder %v174_v45, 0.0 }
  0xc3   :  { %v214_v48 = vpack.c.bf16 %v209_v47, %v208_v46 }
  0xc4   :  { %v206_v55 = vsel %vm190_vm4, %v174_v45, %v198_v50 }
  0xc5   :  { %v183_v49 = vpop.f32.mrf.mxu2  ;;  %302 = vmatmul.bf16.vlgmr.msra.gmra.mxu3 %v214_v48 }
  0xc6   :  { %v184_v53 = vadd.f32 %v454_v29, %v183_v49 }
  0xc7   :  { %v175_v51 = vpop.f32.mrf.mxu0 }
  0xc8   :  { %v176_v52 = vadd.f32 %v454_v29, %v175_v51  ;;  %v202_v59 = vmul.f32 0.1, %v184_v53  ;;  %vm194_vm6 = vcmp.gt.f32.partialorder %v184_v53, 0.0 }
  0xca   :  { %v199_v54 = vmul.f32 0.1, %v176_v52  ;;  %vm191_vm5 = vcmp.gt.f32.partialorder %v176_v52, 0.0  ;;  %v210_v62 = vsel %vm194_vm6, %v184_v53, %v202_v59 }
  0xcc   :  { %v207_v56 = vsel %vm191_vm5, %v176_v52, %v199_v54 }
  0xcd   :  { %v185_v57 = vpop.f32.mrf.mxu2  ;;  %v213_v58 = vpack.c.bf16 %v207_v56, %v206_v55 }
  0xce   :  { %v186_v60 = vadd.f32 %v454_v29, %v185_v57 }
  0xcf   :  { %297 = vmatmul.bf16.gmra.mxu1 %v213_v58 }
  0xd0   :  { %v203_v61 = vmul.f32 0.1, %v186_v60  ;;  %vm195_vm7 = vcmp.gt.f32.partialorder %v186_v60, 0.0 }
  0xd2   :  { %v211_v63 = vsel %vm195_vm7, %v186_v60, %v203_v61 }
  0xd3   :  { %v215_v0 = vpack.c.bf16 %v211_v63, %v210_v62 }
  0xd5   :  { %307 = vmatmul.bf16.gmra.mxu3 %v215_v0 }
 0x13c   :  { %v293_v2 = vpop.f32.mrf.mxu1 }
 0x13d   :  { %v294_v3 = vadd.f32 %v455_v1, %v293_v2 }
 0x13f   :  { %vm313_vm8 = vcmp.gt.f32.partialorder %v294_v3, 0.0  ;;  %v321_v4 = vmul.f32 0.1, %v294_v3 }
 0x141   :  { %v329_v5 = vsel %vm313_vm8, %v294_v3, %v321_v4 }
 0x142   :  { %337 = vst [vmem:[%s659_s5] sm:$0xff] %v329_v5 }
 0x144   :  { %v295_v6 = vpop.f32.mrf.mxu1 }
 0x145   :  { %v296_v7 = vadd.f32 %v455_v1, %v295_v6 }
 0x147   :  { %vm314_vm9 = vcmp.gt.f32.partialorder %v296_v7, 0.0  ;;  %v322_v8 = vmul.f32 0.1, %v296_v7 }
 0x148   :  { %v303_v9 = vpop.f32.mrf.mxu3 }
 0x149   :  { %v330_v10 = vsel %vm314_vm9, %v296_v7, %v322_v8  ;;  %v304_v11 = vadd.f32 %v455_v1, %v303_v9 }
 0x14a   :  { %338 = vst [vmem:[%s659_s5 + $0x8] sm:$0xff] %v330_v10 }
 0x14b   :  { %vm317_vm10 = vcmp.gt.f32.partialorder %v304_v11, 0.0  ;;  %v325_v12 = vmul.f32 0.1, %v304_v11 }
 0x14c   :  { %v298_v13 = vpop.f32.mrf.mxu1 }
 0x14d   :  { %v333_v14 = vsel %vm317_vm10, %v304_v11, %v325_v12  ;;  %v299_v15 = vadd.f32 %v455_v1, %v298_v13 }
 0x14e   :  { %341 = vst [vmem:[%s659_s5 + $0x20] sm:$0xff] %v333_v14 }
 0x14f   :  { %vm315_vm11 = vcmp.gt.f32.partialorder %v299_v15, 0.0  ;;  %v323_v16 = vmul.f32 0.1, %v299_v15 }
 0x150   :  { %v305_v17 = vpop.f32.mrf.mxu3 }
 0x151   :  { %v331_v18 = vsel %vm315_vm11, %v299_v15, %v323_v16  ;;  %v306_v19 = vadd.f32 %v455_v1, %v305_v17 }
 0x152   :  { %339 = vst [vmem:[%s659_s5 + $0x10] sm:$0xff] %v331_v18 }
 0x153   :  { %vm318_vm12 = vcmp.gt.f32.partialorder %v306_v19, 0.0  ;;  %v326_v20 = vmul.f32 0.1, %v306_v19 }
 0x154   :  { %v300_v21 = vpop.f32.mrf.mxu1 }
 0x155   :  { %v334_v22 = vsel %vm318_vm12, %v306_v19, %v326_v20  ;;  %v301_v23 = vadd.f32 %v455_v1, %v300_v21 }
 0x156   :  { %342 = vst [vmem:[%s659_s5 + $0x28] sm:$0xff] %v334_v22 }
 0x157   :  { %vm316_vm13 = vcmp.gt.f32.partialorder %v301_v23, 0.0  ;;  %v324_v24 = vmul.f32 0.1, %v301_v23 }
 0x158   :  { %v308_v25 = vpop.f32.mrf.mxu3 }
 0x159   :  { %v332_v26 = vsel %vm316_vm13, %v301_v23, %v324_v24  ;;  %v309_v27 = vadd.f32 %v455_v1, %v308_v25 }
 0x15a   :  { %340 = vst [vmem:[%s659_s5 + $0x18] sm:$0xff] %v332_v26 }
 0x15b   :  { %vm319_vm14 = vcmp.gt.f32.partialorder %v309_v27, 0.0  ;;  %v327_v28 = vmul.f32 0.1, %v309_v27 }
 0x15d   :  { %v335_v29 = vsel %vm319_vm14, %v309_v27, %v327_v28 }
 0x15e   :  { %343 = vst [vmem:[%s659_s5 + $0x30] sm:$0xff] %v335_v29 }
 0x160   :  { %v310_v30 = vpop.f32.mrf.mxu3 }
 0x161   :  { %v311_v31 = vadd.f32 %v455_v1, %v310_v30 }
 0x163   :  { %vm320_vm15 = vcmp.gt.f32.partialorder %v311_v31, 0.0  ;;  %v328_v32 = vmul.f32 0.1, %v311_v31 }
 0x165   :  { %v336_v33 = vsel %vm320_vm15, %v311_v31, %v328_v32 }
 0x166   :  { %344 = vst [vmem:[%s659_s5 + $0x38] sm:$0xff] %v336_v33 }
 0x167   :  { %349 = vsyncpa [#allocation3], 1 }
 0x168   :  { %350 = vsyncpa [#allocation5], 1 }
 0x169   :  { %351 = vsyncpa [#allocation8], 1 }

// kernel: gnn_node_forward.11
= control target key start
LH: loop header
LB: loop body
LE: loop exit
PB: predicated region body
PF: predicated region fallthrough
CT: control target
= control target key end

     0   :  { %s499_s1 = inlined_call_operand.vmem [shape: bf16[128,128], index: 1, kind: input, shape index: {}]   ;;  %s500_s2 = inlined_call_operand.vmem [shape: f32[1,128], index: 2, kind: input, shape index: {}]   ;;  %s501_s3 = inlined_call_operand.vmem [shape: bf16[128,128], index: 3, kind: input, shape index: {}]   ;;  %s502_s0 = inlined_call_operand.vmem [shape: f32[64,128], index: 0, kind: input, shape index: {}]   ;;  %s503_s4 = inlined_call_operand.vmem [shape: f32[1,128], index: 4, kind: input, shape index: {}]   ;;  %s504_s5 = inlined_call_operand.vmem [shape: bf16[64,128], index: 5, kind: output, shape index: {}]  }
   0x1   :  { %v329_v0 = vld [vmem:[%s499_s1 + $0x38] sm:$0xff]  ;;  %v328_v1 = vld [vmem:[%s499_s1 + $0x30] sm:$0xff]  ;;  %v327_v2 = vld [vmem:[%s499_s1 + $0x28] sm:$0xff] }
   0x2   :  { %100 = vmatpush.bf16.msra.mxu0 %v329_v0  ;;  %361 = vmatpush.bf16.msra.mxu2 %v329_v0  ;;  %v326_v3 = vld [vmem:[%s499_s1 + $0x20] sm:$0xff]  ;;  %v325_v4 = vld [vmem:[%s499_s1 + $0x18] sm:$0xff]  ;;  %v324_v6 = vld [vmem:[%s499_s1 + $0x10] sm:$0xff] }
   0x3   :  { %v337_v5 = vld [vmem:[%s501_s3 + $0x38] sm:$0xff]  ;;  %v336_v7 = vld [vmem:[%s501_s3 + $0x30] sm:$0xff]  ;;  %v323_v8 = vld [vmem:[%s499_s1 + $0x8] sm:$0xff] }
   0x4   :  { %209 = vmatpush.bf16.msra.mxu1 %v337_v5  ;;  %369 = vmatpush.bf16.msra.mxu3 %v337_v5  ;;  %v335_v9 = vld [vmem:[%s501_s3 + $0x28] sm:$0xff]  ;;  %v322_v10 = vld [vmem:[%s499_s1] sm:$0xff]  ;;  %v22_v18 = vld [vmem:[%s502_s0 + $0x10] sm:$0xff] }
   0x5   :  { %v20_v11 = vld [vmem:[%s502_s0] sm:$0xff]  ;;  %v21_v12 = vld [vmem:[%s502_s0 + $0x8] sm:$0xff]  ;;  %v23_v19 = vld [vmem:[%s502_s0 + $0x18] sm:$0xff] }
   0x6   :  { %101 = vmatpush.bf16.msra.mxu0 %v328_v1  ;;  %362 = vmatpush.bf16.msra.mxu2 %v328_v1  ;;  %v24_v13 = vld [vmem:[%s502_s0 + $0x20] sm:$0xff]  ;;  %v25_v14 = vld [vmem:[%s502_s0 + $0x28] sm:$0xff]  ;;  %v28_v16 = vpack.c.bf16 %v21_v12, %v20_v11  ;;  %v26_v20 = vld [vmem:[%s502_s0 + $0x30] sm:$0xff]  ;;  %v29_v22 = vpack.c.bf16 %v23_v19, %v22_v18 }
   0x7   :  { %v334_v15 = vld [vmem:[%s501_s3 + $0x20] sm:$0xff]  ;;  %v30_v17 = vpack.c.bf16 %v25_v14, %v24_v13  ;;  %v27_v21 = vld [vmem:[%s502_s0 + $0x38] sm:$0xff]  ;;  %v332_v25 = vld [vmem:[%s501_s3 + $0x10] sm:$0xff] }
   0x8   :  { %210 = vmatpush.bf16.msra.mxu1 %v336_v7  ;;  %370 = vmatpush.bf16.msra.mxu3 %v336_v7  ;;  %v31_v23 = vpack.c.bf16 %v27_v21, %v26_v20  ;;  %v333_v24 = vld [vmem:[%s501_s3 + $0x18] sm:$0xff]  ;;  %v331_v26 = vld [vmem:[%s501_s3 + $0x8] sm:$0xff]  ;;  %v330_v27 = vld [vmem:[%s501_s3] sm:$0xff] }
   0x9   :  { %v377_v29 = vld [vmem:[%s500_s2] ss:$0 sm:$0xff] }
   0xa   :  { %102 = vmatpush.bf16.msra.mxu0 %v327_v2  ;;  %363 = vmatpush.bf16.msra.mxu2 %v327_v2  ;;  %v378_v58 = vld [vmem:[%s503_s4] ss:$0 sm:$0xff] }
   0xc   :  { %211 = vmatpush.bf16.msra.mxu1 %v335_v9  ;;  %371 = vmatpush.bf16.msra.mxu3 %v335_v9 }
   0xe   :  { %103 = vmatpush.bf16.msra.mxu0 %v326_v3  ;;  %364 = vmatpush.bf16.msra.mxu2 %v326_v3 }
  0x10   :  { %212 = vmatpush.bf16.msra.mxu1 %v334_v15  ;;  %372 = vmatpush.bf16.msra.mxu3 %v334_v15 }
  0x12   :  { %104 = vmatpush.bf16.msra.mxu0 %v325_v4  ;;  %365 = vmatpush.bf16.msra.mxu2 %v325_v4 }
  0x14   :  { %213 = vmatpush.bf16.msra.mxu1 %v333_v24  ;;  %373 = vmatpush.bf16.msra.mxu3 %v333_v24 }
  0x16   :  { %105 = vmatpush.bf16.msra.mxu0 %v324_v6  ;;  %366 = vmatpush.bf16.msra.mxu2 %v324_v6 }
  0x18   :  { %214 = vmatpush.bf16.msra.mxu1 %v332_v25  ;;  %374 = vmatpush.bf16.msra.mxu3 %v332_v25 }
  0x1a   :  { %106 = vmatpush.bf16.msra.mxu0 %v323_v8  ;;  %367 = vmatpush.bf16.msra.mxu2 %v323_v8 }
  0x1c   :  { %215 = vmatpush.bf16.msra.mxu1 %v331_v26  ;;  %375 = vmatpush.bf16.msra.mxu3 %v331_v26 }
  0x1e   :  { %107 = vmatpush.bf16.msra.mxu0 %v322_v10  ;;  %368 = vmatpush.bf16.msra.mxu2 %v322_v10 }
  0x20   :  { %216 = vmatpush.bf16.msra.mxu1 %v330_v27  ;;  %376 = vmatpush.bf16.msra.mxu3 %v330_v27 }
  0x21   :  { %108 = vmatmul.bf16.vlgmr.msra.gmra.mxu0 %v28_v16  ;;  %118 = vmatmul.bf16.vlgmr.msra.gmra.mxu2 %v30_v17 }
  0x31   :  { %113 = vmatmul.bf16.gmra.mxu0 %v29_v22  ;;  %123 = vmatmul.bf16.gmra.mxu2 %v31_v23 }
  0x9e   :  { %v109_v28 = vpop.f32.mrf.mxu0 }
  0x9f   :  { %v110_v30 = vadd.f32 %v377_v29, %v109_v28 }
  0xa1   :  { %v129_v33 = vmax.f32 %v110_v30, 0.0 }
  0xa4   :  { %v119_v31 = vpop.f32.mrf.mxu2 }
  0xa5   :  { %v120_v36 = vadd.f32 %v377_v29, %v119_v31 }
  0xa6   :  { %v111_v32 = vpop.f32.mrf.mxu0 }
  0xa7   :  { %v112_v34 = vadd.f32 %v377_v29, %v111_v32  ;;  %v133_v41 = vmax.f32 %v120_v36, 0.0 }
  0xa9   :  { %v130_v35 = vmax.f32 %v112_v34, 0.0 }
  0xab   :  { %v137_v37 = vpack.c.bf16 %v130_v35, %v129_v33 }
  0xac   :  { %v121_v38 = vpop.f32.mrf.mxu2 }
  0xad   :  { %v122_v39 = vadd.f32 %v377_v29, %v121_v38  ;;  %217 = vmatmul.bf16.vlgmr.msra.gmra.mxu1 %v137_v37 }
  0xae   :  { %v114_v40 = vpop.f32.mrf.mxu0 }
  0xaf   :  { %v134_v42 = vmax.f32 %v122_v39, 0.0  ;;  %v115_v44 = vadd.f32 %v377_v29, %v114_v40 }
  0xb1   :  { %v139_v43 = vpack.c.bf16 %v134_v42, %v133_v41  ;;  %v131_v47 = vmax.f32 %v115_v44, 0.0 }
  0xb3   :  { %227 = vmatmul.bf16.vlgmr.msra.gmra.mxu3 %v139_v43 }
  0xb4   :  { %v124_v45 = vpop.f32.mrf.mxu2 }
  0xb5   :  { %v125_v50 = vadd.f32 %v377_v29, %v124_v45 }
  0xb6   :  { %v116_v46 = vpop.f32.mrf.mxu0 }
  0xb7   :  { %v117_v48 = vadd.f32 %v377_v29, %v116_v46  ;;  %v135_v54 = vmax.f32 %v125_v50, 0.0 }
  0xb9   :  { %v132_v49 = vmax.f32 %v117_v48, 0.0 }
  0xbb   :  { %v138_v51 = vpack.c.bf16 %v132_v49, %v131_v47 }
  0xbc   :  { %v126_v52 = vpop.f32.mrf.mxu2 }
  0xbd   :  { %v127_v53 = vadd.f32 %v377_v29, %v126_v52  ;;  %222 = vmatmul.bf16.gmra.mxu1 %v138_v51 }
  0xbf   :  { %v136_v55 = vmax.f32 %v127_v53, 0.0 }
  0xc1   :  { %v140_v56 = vpack.c.bf16 %v136_v55, %v135_v54 }
  0xc3   :  { %232 = vmatmul.bf16.gmra.mxu3 %v140_v56 }
 0x12a   :  { %v218_v57 = vpop.f32.mrf.mxu1 }
 0x12b   :  { %v219_v60 = vadd.f32 %v378_v58, %v218_v57 }
 0x132   :  { %v220_v59 = vpop.f32.mrf.mxu1 }
 0x133   :  { %v221_v61 = vadd.f32 %v378_v58, %v220_v59 }
 0x135   :  { %v341_v62 = vpack.c.bf16 %v221_v61, %v219_v60 }
 0x136   :  { %v228_v63 = vpop.f32.mrf.mxu3 }
 0x137   :  { %342 = vst [vmem:[%s504_s5] sm:$0xff] %v341_v62   ;;  %v229_v2 = vadd.f32 %v378_v58, %v228_v63 }
 0x13a   :  { %v223_v0 = vpop.f32.mrf.mxu1 }
 0x13b   :  { %v224_v6 = vadd.f32 %v378_v58, %v223_v0 }
 0x13e   :  { %v230_v1 = vpop.f32.mrf.mxu3 }
 0x13f   :  { %v231_v3 = vadd.f32 %v378_v58, %v230_v1 }
 0x141   :  { %v351_v4 = vpack.c.bf16 %v231_v3, %v229_v2 }
 0x142   :  { %v225_v5 = vpop.f32.mrf.mxu1 }
 0x143   :  { %359 = vst [vmem:[%s504_s5 + $0x10] sm:$0xff] %v351_v4   ;;  %v226_v7 = vadd.f32 %v378_v58, %v225_v5 }
 0x145   :  { %v346_v8 = vpack.c.bf16 %v226_v7, %v224_v6 }
 0x146   :  { %v233_v9 = vpop.f32.mrf.mxu3 }
 0x147   :  { %358 = vst [vmem:[%s504_s5 + $0x8] sm:$0xff] %v346_v8   ;;  %v234_v11 = vadd.f32 %v378_v58, %v233_v9 }
 0x14e   :  { %v235_v10 = vpop.f32.mrf.mxu3 }
 0x14f   :  { %v236_v12 = vadd.f32 %v378_v58, %v235_v10 }
 0x151   :  { %v356_v13 = vpack.c.bf16 %v236_v12, %v234_v11 }
 0x153   :  { %360 = vst [vmem:[%s504_s5 + $0x18] sm:$0xff] %v356_v13  }

// kernel: gnn_node_forward.10
= control target key start
LH: loop header
LB: loop body
LE: loop exit
PB: predicated region body
PF: predicated region fallthrough
CT: control target
= control target key end

     0   :  { %s2555_s0 = inlined_call_operand.vmem [shape: f32[64,128], index: 0, kind: input, shape index: {}]   ;;  %s2556_s1 = inlined_call_operand.vmem [shape: bf16[64,32], index: 1, kind: input, shape index: {}, may-alias: {1,2}]   ;;  %s2557_s2 = inlined_call_operand.vmem [shape: bf16[64,32], index: 2, kind: input, shape index: {}, may-alias: {1,2}]   ;;  %s2558_s3 = inlined_call_operand.vmem [shape: bf16[32,128], index: 3, kind: input, shape index: {}]   ;;  %s2559_s4 = inlined_call_operand.vmem [shape: bf16[128,128], index: 4, kind: input, shape index: {}]   ;;  %s2560_s5 = inlined_call_operand.vmem [shape: f32[1,128], index: 5, kind: input, shape index: {}]   ;;  %s2561_s6 = inlined_call_operand.vmem [shape: bf16[128,128], index: 6, kind: input, shape index: {}]   ;;  %s2562_s7 = inlined_call_operand.vmem [shape: f32[1,128], index: 7, kind: input, shape index: {}]   ;;  %s2563_s8 = inlined_call_operand.vmem [shape: bf16[128,128], index: 8, kind: input, shape index: {}]   ;;  %s2564_s9 = inlined_call_operand.vmem [shape: f32[1,128], index: 9, kind: input, shape index: {}]   ;;  %s2565_s10 = inlined_call_operand.vmem [shape: bf16[128,128], index: 10, kind: input, shape index: {}]   ;;  %s2566_s11 = inlined_call_operand.vmem [shape: f32[1,128], index: 11, kind: input, shape index: {}]   ;;  %s2567_s12 = inlined_call_operand.vmem [shape: bf16[128,128], index: 12, kind: input, shape index: {}]   ;;  %s2568_s13 = inlined_call_operand.vmem [shape: bf16[128,128], index: 13, kind: input, shape index: {}]   ;;  %s2569_s14 = inlined_call_operand.vmem [shape: bf16[128,128], index: 14, kind: input, shape index: {}]   ;;  %s2570_s15 = inlined_call_operand.hbm [shape: f32[1,128], index: 15, kind: input, shape index: {}]   ;;  %s2571_s16 = inlined_call_operand.hbm [shape: bf16[128,128], index: 16, kind: input, shape index: {}]   ;;  %s2572_s17 = inlined_call_operand.hbm [shape: f32[1,128], index: 17, kind: input, shape index: {}]   ;;  %s2573_s18 = inlined_call_operand.hbm [shape: f32[1,128], index: 18, kind: input, shape index: {}]   ;;  %s2574_s19 = inlined_call_operand.hbm [shape: f32[1,128], index: 19, kind: input, shape index: {}]   ;;  %s2575_s20 = inlined_call_operand.vmem [shape: f32[64,128], index: 20, kind: output, shape index: {}]  }
   0x1   :  { %2581 = sst [smem:[#allocation15_spill]] %s2555_s0 }
   0x2   :  { %2582 = sst [smem:[#allocation16_spill]] %s2556_s1 }
   0x3   :  { %2583 = sst [smem:[#allocation17_spill]] %s2557_s2 }
   0x4   :  { %2584 = sst [smem:[#allocation18_spill]] %s2558_s3 }
   0x5   :  { %2585 = sst [smem:[#allocation19_spill]] %s2559_s4 }
   0x6   :  { %25 = vsyncpa [#allocation5], 0 }
   0x7   :  { %26 = vsyncpa [#allocation7], 0  ;;  %s73_s23 = sshll.u32 %s2571_s16, 4  ;;  %s74_s23 = int_to_ptr.hbm [resolvable:$true] %s73_s23 }
   0x8   :  { %27 = vsyncpa [#allocation10], 0  ;;  %s2015_s24 = smov [#allocation6]   ;;  %s98_s26 = sshll.u32 %s2573_s18, 4  ;;  %s99_s26 = int_to_ptr.hbm [resolvable:$true] %s98_s26 }
   0x9   :  { %s75_s2 = sshll.u32 %s2015_s24, 4  ;;  %s2016_s27 = smov 64   ;;  %s76_s2 = int_to_ptr.vmem [resolvable:$true] %s75_s2 }
   0xa   :  { %s2017_s28 = smov 4   ;;  %s2018_s4 = smov [#allocation9]  }
   0xb   :  { %81 = dma.hbm_to_vmem [thread:$0]  %s74_s23, 1024, %s76_s2, [#allocation7], %s2016_s27, %s2016_s27, %s2017_s28  }
   0xc   :  { %s100_s29 = sshll.u32 %s2018_s4, 4  ;;  %s63_s21 = sshll.u32 %s2570_s15, 4  ;;  %s101_s29 = int_to_ptr.vmem [resolvable:$true] %s100_s29  ;;  %s64_s21 = int_to_ptr.hbm [resolvable:$true] %s63_s21 }
   0xd   :  { %103 = dma.hbm_to_vmem [thread:$0]  %s99_s26, 16, %s101_s29, [#allocation10]  }
   0xe   :  { %s87_s22 = sshll.u32 %s2572_s17, 4  ;;  %s2019_s24 = smov [#allocation4]   ;;  %s88_s22 = int_to_ptr.hbm [resolvable:$true] %s87_s22 }
   0xf   :  { %s65_s25 = sshll.u32 %s2019_s24, 4  ;;  %s2020_s18 = smov [#allocation8]   ;;  %s66_s25 = int_to_ptr.vmem [resolvable:$true] %s65_s25 }
  0x10   :  { %68 = dma.hbm_to_vmem [thread:$0]  %s64_s21, 16, %s66_s25, [#allocation5]  }
  0x11   :  { %s89_s23 = sshll.u32 %s2020_s18, 4  ;;  %s109_s27 = sshll.u32 %s2574_s19, 4  ;;  %s90_s23 = int_to_ptr.vmem [resolvable:$true] %s89_s23  ;;  %s110_s27 = int_to_ptr.hbm [resolvable:$true] %s109_s27 }
  0x12   :  { %92 = dma.hbm_to_vmem [thread:$0]  %s88_s22, 16, %s90_s23, [#allocation7]  }
  0x13   :  { %s2021_s15 = smov [#allocation11]  }
  0x14   :  { %s111_s26 = sshll.u32 %s2021_s15, 4  ;;  %s112_s26 = int_to_ptr.vmem [resolvable:$true] %s111_s26 }
  0x15   :  { %114 = dma.hbm_to_vmem [thread:$0]  %s110_s27, 16, %s112_s26, [#allocation10]  }
  0x16   :  { %2009 = dma.done.wait [#allocation5], 16  }
  0x17   :  { %2010 = vsyncadd [#allocation5], 4294967280 }
  0x18   :  { %2011 = dma.done.wait [#allocation7], 1040  }
  0x19   :  { %2012 = vsyncadd [#allocation7], 4294966256 }
  0x1a   :  { %2013 = dma.done.wait [#allocation10], 32  }
  0x1b   :  { %2014 = vsyncadd [#allocation10], 4294967264  ;;  %s2586_s4 = sld [smem:[#allocation18_spill]]  ;;  %v1813_v3 = vld [vmem:[%s2563_s8 + $0x38] sm:$0xff]  ;;  %vm208_vm0 = vcmask 261120   ;;  %v1812_v9 = vld [vmem:[%s2563_s8 + $0x30] sm:$0xff] }
  0x1c   :  { %s2587_s21 = sld [smem:[#allocation19_spill]]  ;;  %v1811_v11 = vld [vmem:[%s2563_s8 + $0x28] sm:$0xff]  ;;  %v1810_v13 = vld [vmem:[%s2563_s8 + $0x20] sm:$0xff]  ;;  %v1809_v15 = vld [vmem:[%s2563_s8 + $0x18] sm:$0xff] }
  0x1d   :  { %s2588_s25 = sld [smem:[#allocation16_spill]]  ;;  %v1808_v21 = vld [vmem:[%s2563_s8 + $0x10] sm:$0xff]  ;;  %v1807_v23 = vld [vmem:[%s2563_s8 + $0x8] sm:$0xff]  ;;  %v1806_v25 = vld [vmem:[%s2563_s8] sm:$0xff] }
  0x1e   :  { %s2589_s2 = sld [smem:[#allocation17_spill]]  ;;  %v1821_v40 = vld [vmem:[%s2565_s10 + $0x38] sm:$0xff]  ;;  %v1820_v42 = vld [vmem:[%s2565_s10 + $0x30] sm:$0xff]  ;;  %v1819_v45 = vld [vmem:[%s2565_s10 + $0x28] sm:$0xff] }
  0x1f   :  { %v1805_v41 = vld [vmem:[%s2561_s6 + $0x38] sm:$0xff]  ;;  %v1804_v43 = vld [vmem:[%s2561_s6 + $0x30] sm:$0xff]  ;;  %v1803_v46 = vld [vmem:[%s2561_s6 + $0x28] sm:$0xff] }
  0x20   :  { %v1818_v48 = vld [vmem:[%s2565_s10 + $0x20] sm:$0xff]  ;;  %v1817_v57 = vld [vmem:[%s2565_s10 + $0x18] sm:$0xff]  ;;  %v1816_v59 = vld [vmem:[%s2565_s10 + $0x10] sm:$0xff] }
  0x21   :  { %v1781_v0 = vld [vmem:[%s2586_s4 + $0x8] sm:$0xff]  ;;  %v1780_v1 = vld [vmem:[%s2586_s4] sm:$0xff]  ;;  %v1801_v60 = vld [vmem:[%s2561_s6 + $0x18] sm:$0xff] }
  0x22   :  { %227 = vmatpush.bf16.msra.mxu0 %v1781_v0  ;;  %320 = vmatpush.bf16.msra.mxu1 %v1781_v0  ;;  %v1797_v2 = vld [vmem:[%s2587_s21 + $0x38] sm:$0xff]  ;;  %v1796_v8 = vld [vmem:[%s2587_s21 + $0x30] sm:$0xff]  ;;  %v1795_v10 = vld [vmem:[%s2587_s21 + $0x28] sm:$0xff] }
  0x23   :  { %1854 = vmatpush.bf16.msra.mxu2 %v1781_v0  ;;  %1856 = vmatpush.bf16.msra.mxu3 %v1781_v0  ;;  %v1782_v4 = vld [vmem:[%s2588_s25] sm:$0xff]  ;;  %v1784_v6 = vld [vmem:[%s2588_s25 + $0x10] sm:$0xff]  ;;  %v1793_v14 = vld [vmem:[%s2587_s21 + $0x18] sm:$0xff] }
  0x24   :  { %v1786_v5 = vld [vmem:[%s2589_s2] sm:$0xff]  ;;  %v1788_v7 = vld [vmem:[%s2589_s2 + $0x10] sm:$0xff]  ;;  %v1783_v16 = vld [vmem:[%s2588_s25 + $0x8] sm:$0xff] }
  0x25   :  { %v1794_v12 = vld [vmem:[%s2587_s21 + $0x20] sm:$0xff]  ;;  %v1787_v17 = vld [vmem:[%s2589_s2 + $0x8] sm:$0xff]  ;;  %v1785_v18 = vld [vmem:[%s2588_s25 + $0x18] sm:$0xff] }
  0x26   :  { %228 = vmatpush.bf16.msra.mxu0 %v1780_v1  ;;  %321 = vmatpush.bf16.msra.mxu1 %v1780_v1  ;;  %v1789_v19 = vld [vmem:[%s2589_s2 + $0x18] sm:$0xff]  ;;  %v1792_v20 = vld [vmem:[%s2587_s21 + $0x10] sm:$0xff]  ;;  %v1791_v22 = vld [vmem:[%s2587_s21 + $0x8] sm:$0xff] }
  0x27   :  { %1855 = vmatpush.bf16.msra.mxu2 %v1780_v1  ;;  %1857 = vmatpush.bf16.msra.mxu3 %v1780_v1  ;;  %v1790_v24 = vld [vmem:[%s2587_s21] sm:$0xff]  ;;  %v1815_v61 = vld [vmem:[%s2565_s10 + $0x8] sm:$0xff]  ;;  %v1800_v62 = vld [vmem:[%s2561_s6 + $0x10] sm:$0xff] }
  0x28   :  { %v1802_v58 = vld [vmem:[%s2561_s6 + $0x20] sm:$0xff]  ;;  %v1799_v0 = vld [vmem:[%s2561_s6 + $0x8] sm:$0xff] }
  0x29   :  { %1500 = vmatmul.msk.bf16.vlgmr.msra.gmra.mxu0 %vm208_vm0, %v1782_v4  ;;  %1520 = vmatmul.msk.bf16.vlgmr.msra.gmra.mxu1 %vm208_vm0, %v1786_v5  ;;  %v1814_v63 = vld [vmem:[%s2565_s10] sm:$0xff]  ;;  %s2590_s10 = sld [smem:[#allocation15_spill]] }
  0x2a   :  { %660 = vmatpush.bf16.msrb.mxu0 %v1813_v3  ;;  %1502 = vmatmul.msk.bf16.vlgmr.msra.gmra.mxu2 %vm208_vm0, %v1784_v6  ;;  %v1798_v1 = vld [vmem:[%s2561_s6] sm:$0xff] }
  0x2b   :  { %442 = vmatpush.bf16.msrb.mxu2 %v1797_v2  ;;  %1522 = vmatmul.msk.bf16.vlgmr.msra.gmra.mxu3 %vm208_vm0, %v1788_v7  ;;  %v2279_v3 = vld [vmem:[%s2564_s9] ss:$0 sm:$0xff] }
  0x2c   :  { %769 = vmatpush.bf16.msrb.mxu1 %v1821_v40  ;;  %551 = vmatpush.bf16.msrb.mxu3 %v1805_v41  ;;  %v1844_v41 = vld [vmem:[%s2569_s14 + $0x30] sm:$0xff] }
  0x2e   :  { %661 = vmatpush.bf16.msrb.mxu0 %v1812_v9 }
  0x2f   :  { %443 = vmatpush.bf16.msrb.mxu2 %v1796_v8  ;;  %v2285_v8 = vld [vmem:[%s2560_s5] ss:$0 sm:$0xff] }
  0x30   :  { %770 = vmatpush.bf16.msrb.mxu1 %v1820_v42  ;;  %552 = vmatpush.bf16.msrb.mxu3 %v1804_v43 }
  0x32   :  { %662 = vmatpush.bf16.msrb.mxu0 %v1811_v11 }
  0x33   :  { %444 = vmatpush.bf16.msrb.mxu2 %v1795_v10 }
  0x34   :  { %771 = vmatpush.bf16.msrb.mxu1 %v1819_v45  ;;  %553 = vmatpush.bf16.msrb.mxu3 %v1803_v46  ;;  %v1835_v45 = vld [vmem:[%s2568_s13 + $0x28] sm:$0xff] }
  0x35   :  { %v1827_v46 = vld [vmem:[%s2567_s12 + $0x28] sm:$0xff] }
  0x36   :  { %663 = vmatpush.bf16.msrb.mxu0 %v1810_v13 }
  0x37   :  { %445 = vmatpush.bf16.msrb.mxu2 %v1794_v12 }
  0x38   :  { %772 = vmatpush.bf16.msrb.mxu1 %v1818_v48  ;;  %554 = vmatpush.bf16.msrb.mxu3 %v1802_v58 }
  0x39   :  { %1501 = vmatmul.msk.bf16.gmra.mxu0 %vm208_vm0, %v1783_v16  ;;  %1521 = vmatmul.msk.bf16.gmra.mxu1 %vm208_vm0, %v1787_v17 }
  0x3a   :  { %664 = vmatpush.bf16.msrb.mxu0 %v1809_v15  ;;  %1503 = vmatmul.msk.bf16.gmra.mxu2 %vm208_vm0, %v1785_v18 }
  0x3b   :  { %446 = vmatpush.bf16.msrb.mxu2 %v1793_v14  ;;  %1523 = vmatmul.msk.bf16.gmra.mxu3 %vm208_vm0, %v1789_v19 }
  0x3c   :  { %773 = vmatpush.bf16.msrb.mxu1 %v1817_v57  ;;  %555 = vmatpush.bf16.msrb.mxu3 %v1801_v60  ;;  %v1825_v60 = vld [vmem:[%s2567_s12 + $0x18] sm:$0xff] }
  0x3e   :  { %665 = vmatpush.bf16.msrb.mxu0 %v1808_v21 }
  0x3f   :  { %447 = vmatpush.bf16.msrb.mxu2 %v1792_v20 }
  0x40   :  { %774 = vmatpush.bf16.msrb.mxu1 %v1816_v59  ;;  %556 = vmatpush.bf16.msrb.mxu3 %v1800_v62  ;;  %v1833_v59 = vld [vmem:[%s2568_s13 + $0x18] sm:$0xff] }
  0x42   :  { %666 = vmatpush.bf16.msrb.mxu0 %v1807_v23 }
  0x43   :  { %448 = vmatpush.bf16.msrb.mxu2 %v1791_v22 }
  0x44   :  { %775 = vmatpush.bf16.msrb.mxu1 %v1815_v61  ;;  %557 = vmatpush.bf16.msrb.mxu3 %v1799_v0  ;;  %v1841_v61 = vld [vmem:[%s2569_s14 + $0x18] sm:$0xff] }
  0x46   :  { %667 = vmatpush.bf16.msrb.mxu0 %v1806_v25 }
  0x47   :  { %449 = vmatpush.bf16.msrb.mxu2 %v1790_v24 }
  0x48   :  { %776 = vmatpush.bf16.msrb.mxu1 %v1814_v63  ;;  %558 = vmatpush.bf16.msrb.mxu3 %v1798_v1 }
  0xa6   :  { %v230_v26 = vpop.f32.mrf.mxu0  ;;  %v323_v27 = vpop.f32.mrf.mxu1 }
  0xad   :  { %v240_v35 = vpop.f32.mrf.mxu2 }
  0xae   :  { %v232_v28 = vpop.f32.mrf.mxu0  ;;  %v325_v29 = vpop.f32.mrf.mxu1 }
  0xaf   :  { %v370_v30 = vpack.c.bf16 %v232_v28, %v230_v26  ;;  %v588_v31 = vpack.c.bf16 %v325_v29, %v323_v27  ;;  %v333_v34 = vpop.f32.mrf.mxu3 }
  0xb1   :  { %450 = vmatmul.bf16.vlgmr.msrb.gmra.mxu2 %v370_v30  ;;  %668 = vmatmul.bf16.vlgmr.msrb.gmra.mxu0 %v588_v31 }
  0xb5   :  { %v242_v47 = vpop.f32.mrf.mxu2 }
  0xb6   :  { %v235_v32 = vpop.f32.mrf.mxu0  ;;  %v328_v33 = vpop.f32.mrf.mxu1  ;;  %v372_v50 = vpack.c.bf16 %v242_v47, %v240_v35  ;;  %v1829_v35 = vld [vmem:[%s2567_s12 + $0x38] sm:$0xff]  ;;  %v1843_v47 = vld [vmem:[%s2569_s14 + $0x28] sm:$0xff] }
  0xb7   :  { %v335_v44 = vpop.f32.mrf.mxu3  ;;  %971 = vmatpush.bf16.msra.mxu3 %v1829_v35 }
  0xb8   :  { %v590_v49 = vpack.c.bf16 %v335_v44, %v333_v34  ;;  %v1837_v34 = vld [vmem:[%s2568_s13 + $0x38] sm:$0xff] }
  0xb9   :  { %894 = vmatpush.bf16.msra.mxu2 %v1837_v34  ;;  %v2409_v34 = vld [vmem:[%s2590_s10 + $0x28] sm:$0xff] }
  0xbd   :  { %v245_v52 = vpop.f32.mrf.mxu2 }
  0xbe   :  { %v237_v36 = vpop.f32.mrf.mxu0  ;;  %v330_v37 = vpop.f32.mrf.mxu1 }
  0xbf   :  { %v371_v38 = vpack.c.bf16 %v237_v36, %v235_v32  ;;  %v589_v39 = vpack.c.bf16 %v330_v37, %v328_v33  ;;  %v338_v51 = vpop.f32.mrf.mxu3  ;;  %v1845_v37 = vld [vmem:[%s2569_s14 + $0x38] sm:$0xff] }
  0xc0   :  { %1068 = vmatpush.bf16.msra.mxu0 %v1845_v37  ;;  %v1868_v37 = vld [vmem:[%s2562_s7] ss:$0 sm:$0xff] }
  0xc1   :  { %455 = vmatmul.bf16.gmra.mxu2 %v371_v38  ;;  %673 = vmatmul.bf16.gmra.mxu0 %v589_v39  ;;  %v1836_v38 = vld [vmem:[%s2568_s13 + $0x30] sm:$0xff] }
  0xc2   :  { %v1828_v39 = vld [vmem:[%s2567_s12 + $0x30] sm:$0xff]  ;;  %895 = vmatpush.bf16.msra.mxu2 %v1836_v38 }
  0xc3   :  { %972 = vmatpush.bf16.msra.mxu3 %v1828_v39 }
  0xc4   :  { %1069 = vmatpush.bf16.msra.mxu0 %v1844_v41 }
  0xc5   :  { %v247_v54 = vpop.f32.mrf.mxu2 }
  0xc6   :  { %v373_v56 = vpack.c.bf16 %v247_v54, %v245_v52  ;;  %896 = vmatpush.bf16.msra.mxu2 %v1835_v45  ;;  %v1834_v52 = vld [vmem:[%s2568_s13 + $0x20] sm:$0xff] }
  0xc7   :  { %v340_v53 = vpop.f32.mrf.mxu3  ;;  %973 = vmatpush.bf16.msra.mxu3 %v1827_v46  ;;  %v1826_v54 = vld [vmem:[%s2567_s12 + $0x20] sm:$0xff] }
  0xc8   :  { %v591_v55 = vpack.c.bf16 %v340_v53, %v338_v51  ;;  %1070 = vmatpush.bf16.msra.mxu0 %v1843_v47  ;;  %v2419_v47 = vld [vmem:[%s2590_s10 + $0x30] sm:$0xff] }
  0xca   :  { %897 = vmatpush.bf16.msra.mxu2 %v1834_v52 }
  0xcb   :  { %974 = vmatpush.bf16.msra.mxu3 %v1826_v54 }
  0xce   :  { %898 = vmatpush.bf16.msra.mxu2 %v1833_v59 }
  0xcf   :  { %975 = vmatpush.bf16.msra.mxu3 %v1825_v60  ;;  %v1852_v60 = vld [vmem:[#allocation6 + $0x30] sm:$0xff] }
  0xd1   :  { %460 = vmatmul.bf16.gmra.mxu2 %v372_v50  ;;  %678 = vmatmul.bf16.gmra.mxu0 %v590_v49 }
  0xe1   :  { %465 = vmatmul.bf16.gmra.mxu2 %v373_v56  ;;  %683 = vmatmul.bf16.gmra.mxu0 %v591_v55  ;;  %v1842_v55 = vld [vmem:[%s2569_s14 + $0x20] sm:$0xff] }
  0xe2   :  { %1071 = vmatpush.bf16.msra.mxu0 %v1842_v55 }
  0xe6   :  { %1072 = vmatpush.bf16.msra.mxu0 %v1841_v61 }
 0x12e   :  { %v669_v2 = vpop.f32.mrf.mxu0 }
 0x12f   :  { %v670_v4 = vadd.f32 %v2279_v3, %v669_v2 }
 0x131   :  { %v689_v7 = vmax.f32 %v670_v4, 0.0 }
 0x134   :  { %v451_v5 = vpop.f32.mrf.mxu2 }
 0x135   :  { %v452_v11 = vadd.f32 %v2285_v8, %v451_v5 }
 0x136   :  { %v671_v6 = vpop.f32.mrf.mxu0 }
 0x137   :  { %v672_v9 = vadd.f32 %v2279_v3, %v671_v6  ;;  %v471_v16 = vmax.f32 %v452_v11, 0.0 }
 0x139   :  { %v690_v10 = vmax.f32 %v672_v9, 0.0 }
 0x13b   :  { %v697_v12 = vpack.c.bf16 %v690_v10, %v689_v7 }
 0x13c   :  { %v453_v13 = vpop.f32.mrf.mxu2 }
 0x13d   :  { %v454_v14 = vadd.f32 %v2285_v8, %v453_v13  ;;  %777 = vmatmul.bf16.vlgmr.msrb.gmra.mxu1 %v697_v12  ;;  %v1840_v13 = vld [vmem:[%s2569_s14 + $0x10] sm:$0xff] }
 0x13e   :  { %v674_v15 = vpop.f32.mrf.mxu0  ;;  %1073 = vmatpush.bf16.msra.mxu0 %v1840_v13 }
 0x13f   :  { %v472_v17 = vmax.f32 %v454_v14, 0.0  ;;  %v675_v19 = vadd.f32 %v2279_v3, %v674_v15  ;;  %v1824_v14 = vld [vmem:[%s2567_s12 + $0x10] sm:$0xff]  ;;  %v1823_v15 = vld [vmem:[%s2567_s12 + $0x8] sm:$0xff] }
 0x140   :  { %976 = vmatpush.bf16.msra.mxu3 %v1824_v14 }
 0x141   :  { %v479_v18 = vpack.c.bf16 %v472_v17, %v471_v16  ;;  %v691_v22 = vmax.f32 %v675_v19, 0.0  ;;  %v1838_v16 = vld [vmem:[%s2569_s14] sm:$0xff]  ;;  %v1831_v17 = vld [vmem:[%s2568_s13 + $0x8] sm:$0xff] }
 0x142   :  { %v2374_v19 = vld [vmem:[%s2590_s10] sm:$0xff] }
 0x143   :  { %559 = vmatmul.bf16.vlgmr.msrb.gmra.mxu3 %v479_v18  ;;  %v1822_v18 = vld [vmem:[%s2567_s12] sm:$0xff] }
 0x144   :  { %v456_v20 = vpop.f32.mrf.mxu2  ;;  %977 = vmatpush.bf16.msra.mxu3 %v1823_v15  ;;  %v1848_v15 = vld [vmem:[#allocation6 + $0x10] sm:$0xff] }
 0x145   :  { %v457_v25 = vadd.f32 %v2285_v8, %v456_v20  ;;  %v2379_v20 = vld [vmem:[%s2590_s10 + $0x8] sm:$0xff] }
 0x146   :  { %v676_v21 = vpop.f32.mrf.mxu0 }
 0x147   :  { %v677_v23 = vadd.f32 %v2279_v3, %v676_v21  ;;  %v473_v30 = vmax.f32 %v457_v25, 0.0  ;;  %v806_v21 = vpack.c.bf16 %v2379_v20, %v2374_v19 }
 0x148   :  { %978 = vmatpush.bf16.msra.mxu3 %v1822_v18 }
 0x149   :  { %v692_v24 = vmax.f32 %v677_v23, 0.0  ;;  %v2389_v23 = vld [vmem:[%s2590_s10 + $0x10] sm:$0xff] }
 0x14b   :  { %v698_v26 = vpack.c.bf16 %v692_v24, %v691_v22  ;;  %v1830_v22 = vld [vmem:[%s2568_s13] sm:$0xff]  ;;  %v2394_v24 = vld [vmem:[%s2590_s10 + $0x18] sm:$0xff] }
 0x14c   :  { %v458_v27 = vpop.f32.mrf.mxu2  ;;  %v807_v25 = vpack.c.bf16 %v2394_v24, %v2389_v23 }
 0x14d   :  { %v459_v28 = vadd.f32 %v2285_v8, %v458_v27  ;;  %782 = vmatmul.bf16.gmra.mxu1 %v698_v26  ;;  %v1867_v27 = vld [vmem:[%s2566_s11] ss:$0 sm:$0xff] }
 0x14e   :  { %v679_v29 = vpop.f32.mrf.mxu0 }
 0x14f   :  { %v474_v31 = vmax.f32 %v459_v28, 0.0  ;;  %v680_v33 = vadd.f32 %v2279_v3, %v679_v29 }
 0x151   :  { %v480_v32 = vpack.c.bf16 %v474_v31, %v473_v30  ;;  %v693_v42 = vmax.f32 %v680_v33, 0.0  ;;  %v2404_v33 = vld [vmem:[%s2590_s10 + $0x20] sm:$0xff] }
 0x152   :  { %v808_v35 = vpack.c.bf16 %v2409_v34, %v2404_v33 }
 0x153   :  { %564 = vmatmul.bf16.gmra.mxu3 %v480_v32 }
 0x154   :  { %v461_v36 = vpop.f32.mrf.mxu2 }
 0x155   :  { %v462_v48 = vadd.f32 %v2285_v8, %v461_v36 }
 0x156   :  { %v681_v40 = vpop.f32.mrf.mxu0 }
 0x157   :  { %v682_v43 = vadd.f32 %v2279_v3, %v681_v40  ;;  %v475_v56 = vmax.f32 %v462_v48, 0.0  ;;  %v2424_v48 = vld [vmem:[%s2590_s10 + $0x38] sm:$0xff] }
 0x159   :  { %v694_v44 = vmax.f32 %v682_v43, 0.0 }
 0x15b   :  { %v699_v49 = vpack.c.bf16 %v694_v44, %v693_v42 }
 0x15c   :  { %v463_v50 = vpop.f32.mrf.mxu2 }
 0x15d   :  { %v464_v51 = vadd.f32 %v2285_v8, %v463_v50  ;;  %787 = vmatmul.bf16.gmra.mxu1 %v699_v49  ;;  %v809_v49 = vpack.c.bf16 %v2424_v48, %v2419_v47 }
 0x15e   :  { %v684_v53 = vpop.f32.mrf.mxu0 }
 0x15f   :  { %v476_v57 = vmax.f32 %v464_v51, 0.0  ;;  %v685_v62 = vadd.f32 %v2279_v3, %v684_v53 }
 0x161   :  { %v481_v58 = vpack.c.bf16 %v476_v57, %v475_v56  ;;  %v695_v1 = vmax.f32 %v685_v62, 0.0  ;;  %v1851_v62 = vld [vmem:[#allocation6 + $0x28] sm:$0xff] }
 0x163   :  { %569 = vmatmul.bf16.gmra.mxu3 %v481_v58  ;;  %v1853_v58 = vld [vmem:[#allocation6 + $0x38] sm:$0xff] }
 0x164   :  { %v466_v63 = vpop.f32.mrf.mxu2  ;;  %1197 = vmatpush.bf16.msra.mxu1 %v1853_v58 }
 0x165   :  { %v467_v5 = vadd.f32 %v2285_v8, %v466_v63 }
 0x166   :  { %v686_v0 = vpop.f32.mrf.mxu0 }
 0x167   :  { %v687_v2 = vadd.f32 %v2279_v3, %v686_v0  ;;  %v477_v10 = vmax.f32 %v467_v5, 0.0  ;;  %v1832_v3 = vld [vmem:[%s2568_s13 + $0x10] sm:$0xff]  ;;  %v1850_v0 = vld [vmem:[#allocation6 + $0x20] sm:$0xff] }
 0x168   :  { %899 = vmatpush.bf16.msra.mxu2 %v1832_v3  ;;  %1198 = vmatpush.bf16.msra.mxu1 %v1852_v60 }
 0x169   :  { %v696_v4 = vmax.f32 %v687_v2, 0.0 }
 0x16b   :  { %v700_v6 = vpack.c.bf16 %v696_v4, %v695_v1 }
 0x16c   :  { %v468_v7 = vpop.f32.mrf.mxu2  ;;  %900 = vmatpush.bf16.msra.mxu2 %v1831_v17  ;;  %1199 = vmatpush.bf16.msra.mxu1 %v1851_v62  ;;  %v1846_v17 = vld [vmem:[#allocation6] sm:$0xff] }
 0x16d   :  { %v469_v9 = vadd.f32 %v2285_v8, %v468_v7  ;;  %792 = vmatmul.bf16.gmra.mxu1 %v700_v6  ;;  %v1839_v8 = vld [vmem:[%s2569_s14 + $0x8] sm:$0xff] }
 0x16e   :  { %1074 = vmatpush.bf16.msra.mxu0 %v1839_v8  ;;  %v1849_v8 = vld [vmem:[#allocation6 + $0x18] sm:$0xff] }
 0x16f   :  { %v478_v11 = vmax.f32 %v469_v9, 0.0 }
 0x170   :  { %901 = vmatpush.bf16.msra.mxu2 %v1830_v22  ;;  %1200 = vmatpush.bf16.msra.mxu1 %v1850_v0 }
 0x171   :  { %v482_v12 = vpack.c.bf16 %v478_v11, %v477_v10 }
 0x172   :  { %1075 = vmatpush.bf16.msra.mxu0 %v1838_v16  ;;  %v1847_v16 = vld [vmem:[#allocation6 + $0x8] sm:$0xff] }
 0x173   :  { %574 = vmatmul.bf16.gmra.mxu3 %v482_v12 }
 0x174   :  { %1201 = vmatpush.bf16.msra.mxu1 %v1849_v8 }
 0x178   :  { %1202 = vmatpush.bf16.msra.mxu1 %v1848_v15 }
 0x17c   :  { %1203 = vmatpush.bf16.msra.mxu1 %v1847_v16 }
 0x180   :  { %1204 = vmatpush.bf16.msra.mxu1 %v1846_v17 }
 0x183   :  { %979 = vmatmul.bf16.vlgmr.msra.gmra.mxu3 %v806_v21 }
 0x193   :  { %984 = vmatmul.bf16.gmra.mxu3 %v807_v25 }
 0x1a3   :  { %989 = vmatmul.bf16.gmra.mxu3 %v808_v35 }
 0x1b3   :  { %994 = vmatmul.bf16.gmra.mxu3 %v809_v49 }
 0x1ba   :  { %v778_v26 = vpop.f32.mrf.mxu1 }
 0x1bb   :  { %v779_v29 = vadd.f32 %v1867_v27, %v778_v26 }
 0x1c2   :  { %v780_v28 = vpop.f32.mrf.mxu1 }
 0x1c3   :  { %v781_v30 = vadd.f32 %v1867_v27, %v780_v28 }
 0x1c5   :  { %v1000_v31 = vpack.c.bf16 %v781_v30, %v779_v29  ;;  %v1869_v30 = vld [vmem:[#allocation4] ss:$0 sm:$0xff] }
 0x1c6   :  { %v560_v32 = vpop.f32.mrf.mxu3 }
 0x1c7   :  { %1076 = vmatmul.bf16.vlgmr.msra.gmra.mxu0 %v1000_v31  ;;  %v561_v39 = vadd.f32 %v1868_v37, %v560_v32 }
 0x1ca   :  { %v783_v36 = vpop.f32.mrf.mxu1 }
 0x1cb   :  { %v784_v43 = vadd.f32 %v1867_v27, %v783_v36 }
 0x1ce   :  { %v562_v38 = vpop.f32.mrf.mxu3 }
 0x1cf   :  { %v563_v40 = vadd.f32 %v1868_v37, %v562_v38 }
 0x1d1   :  { %v826_v41 = vpack.c.bf16 %v563_v40, %v561_v39 }
 0x1d2   :  { %v785_v42 = vpop.f32.mrf.mxu1 }
 0x1d3   :  { %v786_v44 = vadd.f32 %v1867_v27, %v785_v42  ;;  %902 = vmatmul.bf16.vlgmr.msra.gmra.mxu2 %v826_v41 }
 0x1d5   :  { %v1001_v45 = vpack.c.bf16 %v786_v44, %v784_v43 }
 0x1d6   :  { %v565_v46 = vpop.f32.mrf.mxu3 }
 0x1d7   :  { %1081 = vmatmul.bf16.gmra.mxu0 %v1001_v45  ;;  %v566_v52 = vadd.f32 %v1868_v37, %v565_v46 }
 0x1da   :  { %v788_v50 = vpop.f32.mrf.mxu1 }
 0x1db   :  { %v789_v56 = vadd.f32 %v1867_v27, %v788_v50 }
 0x1de   :  { %v567_v51 = vpop.f32.mrf.mxu3 }
 0x1df   :  { %v568_v53 = vadd.f32 %v1868_v37, %v567_v51 }
 0x1e1   :  { %v827_v54 = vpack.c.bf16 %v568_v53, %v566_v52 }
 0x1e2   :  { %v790_v55 = vpop.f32.mrf.mxu1 }
 0x1e3   :  { %v791_v57 = vadd.f32 %v1867_v27, %v790_v55  ;;  %907 = vmatmul.bf16.gmra.mxu2 %v827_v54 }
 0x1e5   :  { %v1002_v59 = vpack.c.bf16 %v791_v57, %v789_v56 }
 0x1e6   :  { %v570_v61 = vpop.f32.mrf.mxu3 }
 0x1e7   :  { %1086 = vmatmul.bf16.gmra.mxu0 %v1002_v59  ;;  %v571_v2 = vadd.f32 %v1868_v37, %v570_v61 }
 0x1ea   :  { %v793_v63 = vpop.f32.mrf.mxu1 }
 0x1eb   :  { %v794_v7 = vadd.f32 %v1867_v27, %v793_v63 }
 0x1ee   :  { %v572_v1 = vpop.f32.mrf.mxu3 }
 0x1ef   :  { %v573_v4 = vadd.f32 %v1868_v37, %v572_v1 }
 0x1f1   :  { %v828_v5 = vpack.c.bf16 %v573_v4, %v571_v2 }
 0x1f2   :  { %v795_v6 = vpop.f32.mrf.mxu1 }
 0x1f3   :  { %v796_v9 = vadd.f32 %v1867_v27, %v795_v6  ;;  %912 = vmatmul.bf16.gmra.mxu2 %v828_v5 }
 0x1f5   :  { %v1003_v10 = vpack.c.bf16 %v796_v9, %v794_v7 }
 0x1f6   :  { %v575_v11 = vpop.f32.mrf.mxu3 }
 0x1f7   :  { %1091 = vmatmul.bf16.gmra.mxu0 %v1003_v10  ;;  %v576_v13 = vadd.f32 %v1868_v37, %v575_v11 }
 0x1fe   :  { %v577_v12 = vpop.f32.mrf.mxu3 }
 0x1ff   :  { %v578_v3 = vadd.f32 %v1868_v37, %v577_v12 }
 0x201   :  { %v829_v14 = vpack.c.bf16 %v578_v3, %v576_v13 }
 0x203   :  { %917 = vmatmul.bf16.gmra.mxu2 %v829_v14 }
 0x206   :  { %v980_v18 = vpop.f32.mrf.mxu3 }
 0x20e   :  { %v982_v22 = vpop.f32.mrf.mxu3 }
 0x216   :  { %v985_v28 = vpop.f32.mrf.mxu3 }
 0x21e   :  { %v987_v42 = vpop.f32.mrf.mxu3 }
 0x226   :  { %v990_v51 = vpop.f32.mrf.mxu3 }
 0x22e   :  { %v992_v61 = vpop.f32.mrf.mxu3 }
 0x236   :  { %v995_v6 = vpop.f32.mrf.mxu3 }
 0x23e   :  { %v997_v14 = vpop.f32.mrf.mxu3 }
 0x244   :  { %v1077_v21 = vpop.f32.mrf.mxu0 }
 0x24c   :  { %v1079_v25 = vpop.f32.mrf.mxu0 }
 0x254   :  { %v1082_v31 = vpop.f32.mrf.mxu0 }
 0x256   :  { %v903_v26 = vpop.f32.mrf.mxu2 }
 0x257   :  { %v981_v27 = vadd.f32 %v980_v18, %v903_v26 }
 0x259   :  { %v1097_v29 = vadd.f32 %v1077_v21, %v981_v27  ;;  %v1226_v27 = vlaneseq }
 0x25b   :  { %v1109_v36 = vadd.f32 %v1869_v30, %v1097_v29  ;;  %v1870_v29 = vld [vmem:[#allocation8] ss:$0 sm:$0xff] }
 0x25c   :  { %v1084_v44 = vpop.f32.mrf.mxu0 }
 0x25d   :  { %v1117_v39 = vmax.f32 %v1109_v36, 0.0 }
 0x25e   :  { %v905_v32 = vpop.f32.mrf.mxu2 }
 0x25f   :  { %v983_v35 = vadd.f32 %v982_v22, %v905_v32 }
 0x261   :  { %v1098_v37 = vadd.f32 %v1079_v25, %v983_v35 }
 0x263   :  { %v1110_v38 = vadd.f32 %v1869_v30, %v1098_v37 }
 0x264   :  { %v1087_v54 = vpop.f32.mrf.mxu0 }
 0x265   :  { %v1118_v40 = vmax.f32 %v1110_v38, 0.0 }
 0x266   :  { %v908_v41 = vpop.f32.mrf.mxu2 }
 0x267   :  { %v1125_v43 = vpack.c.bf16 %v1118_v40, %v1117_v39  ;;  %v986_v45 = vadd.f32 %v985_v28, %v908_v41  ;;  %v2428_v28 = vand.u32 127, %v1226_v27 }
 0x269   :  { %1205 = vmatmul.bf16.vlgmr.msra.gmra.mxu1 %v1125_v43  ;;  %v1099_v46 = vadd.f32 %v1082_v31, %v986_v45  ;;  %vm1228_vm1 = vcmp.lt.s32.totalorder %v2428_v28, 32 }
 0x26b   :  { %v1111_v53 = vadd.f32 %v1869_v30, %v1099_v46 }
 0x26c   :  { %v1089_v62 = vpop.f32.mrf.mxu0 }
 0x26d   :  { %v1119_v56 = vmax.f32 %v1111_v53, 0.0 }
 0x26e   :  { %v910_v49 = vpop.f32.mrf.mxu2 }
 0x26f   :  { %v988_v50 = vadd.f32 %v987_v42, %v910_v49 }
 0x271   :  { %v1100_v52 = vadd.f32 %v1084_v44, %v988_v50 }
 0x273   :  { %v1112_v55 = vadd.f32 %v1869_v30, %v1100_v52 }
 0x274   :  { %v1092_v10 = vpop.f32.mrf.mxu0 }
 0x275   :  { %v1120_v57 = vmax.f32 %v1112_v55, 0.0 }
 0x276   :  { %v913_v58 = vpop.f32.mrf.mxu2 }
 0x277   :  { %v1126_v59 = vpack.c.bf16 %v1120_v57, %v1119_v56  ;;  %v991_v60 = vadd.f32 %v990_v51, %v913_v58 }
 0x279   :  { %1210 = vmatmul.bf16.gmra.mxu1 %v1126_v59  ;;  %v1101_v63 = vadd.f32 %v1087_v54, %v991_v60 }
 0x27b   :  { %v1113_v4 = vadd.f32 %v1869_v30, %v1101_v63 }
 0x27c   :  { %v1094_v16 = vpop.f32.mrf.mxu0 }
 0x27d   :  { %v1121_v7 = vmax.f32 %v1113_v4, 0.0 }
 0x27e   :  { %v915_v0 = vpop.f32.mrf.mxu2 }
 0x27f   :  { %v993_v1 = vadd.f32 %v992_v61, %v915_v0 }
 0x281   :  { %v1102_v2 = vadd.f32 %v1089_v62, %v993_v1 }
 0x283   :  { %v1114_v5 = vadd.f32 %v1869_v30, %v1102_v2 }
 0x285   :  { %v1122_v9 = vmax.f32 %v1114_v5, 0.0 }
 0x286   :  { %v918_v11 = vpop.f32.mrf.mxu2 }
 0x287   :  { %v1127_v12 = vpack.c.bf16 %v1122_v9, %v1121_v7  ;;  %v996_v13 = vadd.f32 %v995_v6, %v918_v11 }
 0x289   :  { %1215 = vmatmul.bf16.gmra.mxu1 %v1127_v12  ;;  %v1103_v3 = vadd.f32 %v1092_v10, %v996_v13 }
 0x28b   :  { %v1115_v18 = vadd.f32 %v1869_v30, %v1103_v3 }
 0x28d   :  { %v1123_v22 = vmax.f32 %v1115_v18, 0.0 }
 0x28e   :  { %v920_v8 = vpop.f32.mrf.mxu2 }
 0x28f   :  { %v998_v15 = vadd.f32 %v997_v14, %v920_v8 }
 0x291   :  { %v1104_v17 = vadd.f32 %v1094_v16, %v998_v15 }
 0x293   :  { %v1116_v21 = vadd.f32 %v1869_v30, %v1104_v17 }
 0x295   :  { %v1124_v25 = vmax.f32 %v1116_v21, 0.0 }
 0x297   :  { %v1128_v26 = vpack.c.bf16 %v1124_v25, %v1123_v22 }
 0x299   :  { %1220 = vmatmul.bf16.gmra.mxu1 %v1128_v26 }
 0x2e6   :  { %v1206_v31 = vpop.f32.mrf.mxu1 }
 0x2e7   :  { %v1207_v32 = vadd.f32 %v1870_v29, %v1206_v31 }
 0x2e9   :  { %v1229_v35 = vsel %vm1228_vm1, %v1207_v32, 0.0 }
 0x2ea   :  { %1237 = vadd.xlane.f32.xlu0 %v1229_v35 }
 0x2ee   :  { %v1208_v36 = vpop.f32.mrf.mxu1 }
 0x2ef   :  { %v1209_v37 = vadd.f32 %v1870_v29, %v1208_v36 }
 0x2f1   :  { %v1230_v30 = vsel %vm1228_vm1, %v1209_v37, 0.0 }
 0x2f2   :  { %1239 = vadd.xlane.f32.xlu0 %v1230_v30 }
 0x2f6   :  { %v1211_v38 = vpop.f32.mrf.mxu1 }
 0x2f7   :  { %v1212_v39 = vadd.f32 %v1870_v29, %v1211_v38 }
 0x2f9   :  { %v1231_v40 = vsel %vm1228_vm1, %v1212_v39, 0.0 }
 0x2fa   :  { %1241 = vadd.xlane.f32.xlu1 %v1231_v40 }
 0x2fe   :  { %v1213_v41 = vpop.f32.mrf.mxu1 }
 0x2ff   :  { %v1214_v42 = vadd.f32 %v1870_v29, %v1213_v41 }
 0x301   :  { %v1232_v43 = vsel %vm1228_vm1, %v1214_v42, 0.0 }
 0x302   :  { %1243 = vadd.xlane.f32.xlu1 %v1232_v43 }
 0x306   :  { %v1216_v44 = vpop.f32.mrf.mxu1 }
 0x307   :  { %v1217_v45 = vadd.f32 %v1870_v29, %v1216_v44 }
 0x309   :  { %v1233_v46 = vsel %vm1228_vm1, %v1217_v45, 0.0 }
 0x30a   :  { %1245 = vadd.xlane.f32.xlu2 %v1233_v46 }
 0x30e   :  { %v1218_v49 = vpop.f32.mrf.mxu1 }
 0x30f   :  { %v1219_v50 = vadd.f32 %v1870_v29, %v1218_v49 }
 0x311   :  { %v1234_v51 = vsel %vm1228_vm1, %v1219_v50, 0.0 }
 0x312   :  { %1247 = vadd.xlane.f32.xlu2 %v1234_v51 }
 0x316   :  { %v1221_v52 = vpop.f32.mrf.mxu1 }
 0x317   :  { %v1222_v53 = vadd.f32 %v1870_v29, %v1221_v52 }
 0x319   :  { %v1235_v54 = vsel %vm1228_vm1, %v1222_v53, 0.0 }
 0x31a   :  { %1249 = vadd.xlane.f32.xlu0 %v1235_v54 }
 0x31e   :  { %v1223_v55 = vpop.f32.mrf.mxu1 }
 0x31f   :  { %v1224_v56 = vadd.f32 %v1870_v29, %v1223_v55 }
 0x321   :  { %v1236_v57 = vsel %vm1228_vm1, %v1224_v56, 0.0 }
 0x322   :  { %1251 = vadd.xlane.f32.xlu1 %v1236_v57 }
 0x35d   :  { %v1238_v58 = vpop.xlane.xlu0 %1237 }
 0x35e   :  { %v1253_v59 = vmul.f32 0.03125, %v1238_v58 }
 0x360   :  { %v1261_v60 = vsub.f32 %v1207_v32, %v1253_v59  ;;  %v2495_v59 = vld [vmem:[#allocation9] ss:$0 sm:$0xff] }
 0x362   :  { %v2449_v61 = vsel %vm1228_vm1, %v1261_v60, 0.0 }
 0x363   :  { %v1277_v62 = vmul.f32 %v2449_v61, %v2449_v61 }
 0x365   :  { %v1240_v63 = vpop.xlane.xlu0 %1239  ;;  %1285 = vadd.xlane.f32.xlu2 %v1277_v62 }
 0x366   :  { %v1254_v0 = vmul.f32 0.03125, %v1240_v63  ;;  %v2497_v63 = vld [vmem:[#allocation11] ss:$0 sm:$0xff] }
 0x368   :  { %v1262_v1 = vsub.f32 %v1209_v37, %v1254_v0 }
 0x36a   :  { %v2455_v2 = vsel %vm1228_vm1, %v1262_v1, 0.0 }
 0x36b   :  { %v1278_v4 = vmul.f32 %v2455_v2, %v2455_v2 }
 0x36d   :  { %v1242_v5 = vpop.xlane.xlu1 %1241  ;;  %1287 = vadd.xlane.f32.xlu0 %v1278_v4 }
 0x36e   :  { %v1255_v6 = vmul.f32 0.03125, %v1242_v5 }
 0x370   :  { %v1263_v7 = vsub.f32 %v1212_v39, %v1255_v6 }
 0x372   :  { %v2461_v9 = vsel %vm1228_vm1, %v1263_v7, 0.0 }
 0x373   :  { %v1279_v10 = vmul.f32 %v2461_v9, %v2461_v9 }
 0x375   :  { %v1244_v11 = vpop.xlane.xlu1 %1243  ;;  %1289 = vadd.xlane.f32.xlu1 %v1279_v10 }
 0x376   :  { %v1256_v12 = vmul.f32 0.03125, %v1244_v11 }
 0x378   :  { %v1264_v13 = vsub.f32 %v1214_v42, %v1256_v12 }
 0x37a   :  { %v2467_v3 = vsel %vm1228_vm1, %v1264_v13, 0.0 }
 0x37b   :  { %v1280_v14 = vmul.f32 %v2467_v3, %v2467_v3 }
 0x37d   :  { %1291 = vadd.xlane.f32.xlu2 %v1280_v14  ;;  %v1246_v8 = vpop.xlane.xlu2 %1245 }
 0x37e   :  { %v1257_v15 = vmul.f32 0.03125, %v1246_v8 }
 0x380   :  { %v1265_v16 = vsub.f32 %v1217_v45, %v1257_v15 }
 0x382   :  { %v2473_v17 = vsel %vm1228_vm1, %v1265_v16, 0.0 }
 0x383   :  { %v1281_v18 = vmul.f32 %v2473_v17, %v2473_v17 }
 0x385   :  { %v1248_v21 = vpop.xlane.xlu2 %1247  ;;  %1293 = vadd.xlane.f32.xlu0 %v1281_v18 }
 0x386   :  { %v1258_v22 = vmul.f32 0.03125, %v1248_v21 }
 0x388   :  { %v1266_v25 = vsub.f32 %v1219_v50, %v1258_v22 }
 0x38a   :  { %v2479_v26 = vsel %vm1228_vm1, %v1266_v25, 0.0 }
 0x38b   :  { %v1282_v27 = vmul.f32 %v2479_v26, %v2479_v26 }
 0x38d   :  { %1295 = vadd.xlane.f32.xlu1 %v1282_v27  ;;  %v1250_v29 = vpop.xlane.xlu0 %1249 }
 0x38e   :  { %v1259_v31 = vmul.f32 0.03125, %v1250_v29 }
 0x390   :  { %v1267_v32 = vsub.f32 %v1222_v53, %v1259_v31 }
 0x392   :  { %v2485_v35 = vsel %vm1228_vm1, %v1267_v32, 0.0 }
 0x393   :  { %v1283_v36 = vmul.f32 %v2485_v35, %v2485_v35 }
 0x395   :  { %v1252_v37 = vpop.xlane.xlu1 %1251  ;;  %1297 = vadd.xlane.f32.xlu2 %v1283_v36 }
 0x396   :  { %v1260_v30 = vmul.f32 0.03125, %v1252_v37 }
 0x398   :  { %v1268_v38 = vsub.f32 %v1224_v56, %v1260_v30 }
 0x39a   :  { %v2491_v39 = vsel %vm1228_vm1, %v1268_v38, 0.0 }
 0x39b   :  { %v1284_v40 = vmul.f32 %v2491_v39, %v2491_v39 }
 0x39d   :  { %1299 = vadd.xlane.f32.xlu0 %v1284_v40 }
 0x3d8   :  { %v1286_v41 = vpop.xlane.xlu2 %1285 }
 0x3d9   :  { %v1301_v42 = vmul.f32 0.03125, %v1286_v41 }
 0x3db   :  { %v1309_v43 = vadd.f32 1e-05, %v1301_v42 }
 0x3dd   :  { %1873 = vrsqrt.f32 %v1309_v43  ;;  %vm1323_vm3 = vweird.f32 %v1309_v43 }
 0x3e0   :  { %v1288_v44 = vpop.xlane.xlu0 %1287 }
 0x3e1   :  { %v1302_v45 = vmul.f32 0.03125, %v1288_v44 }
 0x3e3   :  { %v1874_v46 = vpop.eup %1873  ;;  %v1310_v49 = vadd.f32 1e-05, %v1302_v45 }
 0x3e4   :  { %v1318_v50 = vmul.f32 %v1874_v46, %v1309_v43  ;;  %vm1324_vm2 = vweird.f32 %v1874_v46 }
 0x3e5   :  { %1875 = vrsqrt.f32 %v1310_v49  ;;  %vm1325_vm4 = vmor %vm1323_vm3, %vm1324_vm2  ;;  %vm1333_vm6 = vweird.f32 %v1310_v49 }
 0x3e6   :  { %v1319_v51 = vmul.f32 %v1874_v46, %v1318_v50 }
 0x3e8   :  { %v1320_v52 = vmul.f32 0.5, %v1319_v51  ;;  %v1290_v53 = vpop.xlane.xlu1 %1289 }
 0x3e9   :  { %v1303_v28 = vmul.f32 0.03125, %v1290_v53 }
 0x3ea   :  { %v1321_v54 = vsub.f32 1.5, %v1320_v52 }
 0x3eb   :  { %v1876_v55 = vpop.eup %1875  ;;  %v1311_v56 = vadd.f32 1e-05, %v1303_v28 }
 0x3ec   :  { %v1322_v57 = vmul.f32 %v1874_v46, %v1321_v54  ;;  %v1328_v58 = vmul.f32 %v1876_v55, %v1310_v49  ;;  %vm1334_vm5 = vweird.f32 %v1876_v55 }
 0x3ed   :  { %1877 = vrsqrt.f32 %v1311_v56  ;;  %vm1335_vm8 = vmor %vm1333_vm6, %vm1334_vm5  ;;  %vm1343_vm10 = vweird.f32 %v1311_v56 }
 0x3ee   :  { %v1326_v60 = vsel %vm1325_vm4, %v1874_v46, %v1322_v57  ;;  %v1329_v62 = vmul.f32 %v1876_v55, %v1328_v58 }
 0x3ef   :  { %v1397_v0 = vmul.f32 %v1326_v60, %v2449_v61 }
 0x3f0   :  { %v1330_v1 = vmul.f32 0.5, %v1329_v62  ;;  %v1292_v4 = vpop.xlane.xlu2 %1291 }
 0x3f1   :  { %v1409_v5 = vmul.f32 %v2495_v59, %v1397_v0  ;;  %v1304_v6 = vmul.f32 0.03125, %v1292_v4 }
 0x3f2   :  { %v1331_v7 = vsub.f32 1.5, %v1330_v1 }
 0x3f3   :  { %v1878_v10 = vpop.eup %1877  ;;  %v1421_v11 = vadd.f32 %v2497_v63, %v1409_v5  ;;  %v1312_v12 = vadd.f32 1e-05, %v1304_v6 }
 0x3f4   :  { %v1332_v13 = vmul.f32 %v1876_v55, %v1331_v7  ;;  %v1338_v14 = vmul.f32 %v1878_v10, %v1311_v56  ;;  %vm1344_vm9 = vweird.f32 %v1878_v10 }
 0x3f5   :  { %vm1429_vm7 = vcmp.gt.f32.partialorder %v1421_v11, 0.0  ;;  %v1437_v8 = vmul.f32 0.1, %v1421_v11  ;;  %1879 = vrsqrt.f32 %v1312_v12  ;;  %vm1345_vm12 = vmor %vm1343_vm10, %vm1344_vm9  ;;  %vm1353_vm14 = vweird.f32 %v1312_v12 }
 0x3f6   :  { %v1336_v15 = vsel %vm1335_vm8, %v1876_v55, %v1332_v13  ;;  %v1339_v61 = vmul.f32 %v1878_v10, %v1338_v14 }
 0x3f7   :  { %v1445_v16 = vsel %vm1429_vm7, %v1421_v11, %v1437_v8  ;;  %v1398_v18 = vmul.f32 %v1336_v15, %v2455_v2 }
 0x3f8   :  { %v1453_v21 = vadd.f32 %v1445_v16, %v2374_v19  ;;  %v1340_v22 = vmul.f32 0.5, %v1339_v61  ;;  %v1294_v25 = vpop.xlane.xlu0 %1293 }
 0x3f9   :  { %v1410_v27 = vmul.f32 %v2495_v59, %v1398_v18  ;;  %v1305_v29 = vmul.f32 0.03125, %v1294_v25 }
 0x3fa   :  { %1461 = vst [vmem:[%s2575_s20] sm:$0xff] %v1453_v21  ;;  %v1341_v31 = vsub.f32 1.5, %v1340_v22 }
 0x3fb   :  { %v1880_v32 = vpop.eup %1879  ;;  %v1422_v36 = vadd.f32 %v2497_v63, %v1410_v27  ;;  %v1313_v37 = vadd.f32 1e-05, %v1305_v29 }
 0x3fc   :  { %v1342_v30 = vmul.f32 %v1878_v10, %v1341_v31  ;;  %v1348_v2 = vmul.f32 %v1880_v32, %v1312_v12  ;;  %vm1354_vm13 = vweird.f32 %v1880_v32 }
 0x3fd   :  { %vm1430_vm11 = vcmp.gt.f32.partialorder %v1422_v36, 0.0  ;;  %v1438_v19 = vmul.f32 0.1, %v1422_v36  ;;  %1881 = vrsqrt.f32 %v1313_v37  ;;  %vm1355_vm0 = vmor %vm1353_vm14, %vm1354_vm13  ;;  %vm1363_vm2 = vweird.f32 %v1313_v37 }
 0x3fe   :  { %v1346_v38 = vsel %vm1345_vm12, %v1878_v10, %v1342_v30  ;;  %v1349_v40 = vmul.f32 %v1880_v32, %v1348_v2 }
 0x3ff   :  { %v1446_v41 = vsel %vm1430_vm11, %v1422_v36, %v1438_v19  ;;  %v1399_v42 = vmul.f32 %v1346_v38, %v2461_v9 }
 0x400   :  { %v1454_v43 = vadd.f32 %v1446_v41, %v2379_v20  ;;  %v1350_v44 = vmul.f32 0.5, %v1349_v40  ;;  %v1296_v45 = vpop.xlane.xlu1 %1295 }
 0x401   :  { %v1411_v46 = vmul.f32 %v2495_v59, %v1399_v42  ;;  %v1306_v49 = vmul.f32 0.03125, %v1296_v45 }
 0x402   :  { %1462 = vst [vmem:[%s2575_s20 + $0x8] sm:$0xff] %v1454_v43  ;;  %v1351_v50 = vsub.f32 1.5, %v1350_v44 }
 0x403   :  { %v1882_v51 = vpop.eup %1881  ;;  %v1423_v52 = vadd.f32 %v2497_v63, %v1411_v46  ;;  %v1314_v53 = vadd.f32 1e-05, %v1306_v49 }
 0x404   :  { %v1352_v28 = vmul.f32 %v1880_v32, %v1351_v50  ;;  %v1358_v9 = vmul.f32 %v1882_v51, %v1313_v37  ;;  %vm1364_vm1 = vweird.f32 %v1882_v51 }
 0x405   :  { %vm1431_vm15 = vcmp.gt.f32.partialorder %v1423_v52, 0.0  ;;  %v1439_v20 = vmul.f32 0.1, %v1423_v52  ;;  %1883 = vrsqrt.f32 %v1314_v53  ;;  %vm1365_vm4 = vmor %vm1363_vm2, %vm1364_vm1  ;;  %vm1373_vm6 = vweird.f32 %v1314_v53 }
 0x406   :  { %v1356_v54 = vsel %vm1355_vm0, %v1880_v32, %v1352_v28  ;;  %v1359_v55 = vmul.f32 %v1882_v51, %v1358_v9 }
 0x407   :  { %v1447_v56 = vsel %vm1431_vm15, %v1423_v52, %v1439_v20  ;;  %v1400_v57 = vmul.f32 %v1356_v54, %v2467_v3 }
 0x408   :  { %v1455_v58 = vadd.f32 %v1447_v56, %v2389_v23  ;;  %v1360_v60 = vmul.f32 0.5, %v1359_v55  ;;  %v1298_v62 = vpop.xlane.xlu2 %1297 }
 0x409   :  { %v1412_v0 = vmul.f32 %v2495_v59, %v1400_v57  ;;  %v1307_v1 = vmul.f32 0.03125, %v1298_v62 }
 0x40a   :  { %1463 = vst [vmem:[%s2575_s20 + $0x10] sm:$0xff] %v1455_v58  ;;  %v1361_v4 = vsub.f32 1.5, %v1360_v60 }
 0x40b   :  { %v1884_v5 = vpop.eup %1883  ;;  %v1424_v6 = vadd.f32 %v2497_v63, %v1412_v0  ;;  %v1315_v7 = vadd.f32 1e-05, %v1307_v1 }
 0x40c   :  { %v1362_v10 = vmul.f32 %v1882_v51, %v1361_v4  ;;  %v1368_v3 = vmul.f32 %v1884_v5, %v1314_v53  ;;  %vm1374_vm5 = vweird.f32 %v1884_v5 }
 0x40d   :  { %vm1432_vm3 = vcmp.gt.f32.partialorder %v1424_v6, 0.0  ;;  %v1440_v23 = vmul.f32 0.1, %v1424_v6  ;;  %1885 = vrsqrt.f32 %v1315_v7  ;;  %vm1375_vm8 = vmor %vm1373_vm6, %vm1374_vm5  ;;  %vm1383_vm10 = vweird.f32 %v1315_v7 }
 0x40e   :  { %v1366_v11 = vsel %vm1365_vm4, %v1882_v51, %v1362_v10  ;;  %v1369_v12 = vmul.f32 %v1884_v5, %v1368_v3 }
 0x40f   :  { %v1448_v13 = vsel %vm1432_vm3, %v1424_v6, %v1440_v23  ;;  %v1401_v14 = vmul.f32 %v1366_v11, %v2473_v17 }
 0x410   :  { %v1456_v8 = vadd.f32 %v1448_v13, %v2394_v24  ;;  %v1370_v15 = vmul.f32 0.5, %v1369_v12  ;;  %v1300_v61 = vpop.xlane.xlu0 %1299 }
 0x411   :  { %v1413_v16 = vmul.f32 %v2495_v59, %v1401_v14  ;;  %v1308_v18 = vmul.f32 0.03125, %v1300_v61 }
 0x412   :  { %1464 = vst [vmem:[%s2575_s20 + $0x18] sm:$0xff] %v1456_v8  ;;  %v1371_v21 = vsub.f32 1.5, %v1370_v15 }
 0x413   :  { %v1886_v22 = vpop.eup %1885  ;;  %v1425_v25 = vadd.f32 %v2497_v63, %v1413_v16  ;;  %v1316_v27 = vadd.f32 1e-05, %v1308_v18 }
 0x414   :  { %v1372_v29 = vmul.f32 %v1884_v5, %v1371_v21  ;;  %v1378_v17 = vmul.f32 %v1886_v22, %v1315_v7  ;;  %vm1384_vm9 = vweird.f32 %v1886_v22 }
 0x415   :  { %vm1433_vm7 = vcmp.gt.f32.partialorder %v1425_v25, 0.0  ;;  %v1441_v24 = vmul.f32 0.1, %v1425_v25  ;;  %1887 = vrsqrt.f32 %v1316_v27  ;;  %vm1385_vm12 = vmor %vm1383_vm10, %vm1384_vm9  ;;  %vm1393_vm14 = vweird.f32 %v1316_v27 }
 0x416   :  { %v1376_v31 = vsel %vm1375_vm8, %v1884_v5, %v1372_v29  ;;  %v1379_v32 = vmul.f32 %v1886_v22, %v1378_v17 }
 0x417   :  { %v1449_v36 = vsel %vm1433_vm7, %v1425_v25, %v1441_v24  ;;  %v1402_v37 = vmul.f32 %v1376_v31, %v2479_v26 }
 0x418   :  { %v1457_v30 = vadd.f32 %v1449_v36, %v2404_v33  ;;  %v1380_v2 = vmul.f32 0.5, %v1379_v32 }
 0x419   :  { %v1414_v19 = vmul.f32 %v2495_v59, %v1402_v37 }
 0x41a   :  { %1465 = vst [vmem:[%s2575_s20 + $0x20] sm:$0xff] %v1457_v30  ;;  %v1381_v38 = vsub.f32 1.5, %v1380_v2 }
 0x41b   :  { %v1888_v40 = vpop.eup %1887  ;;  %v1426_v41 = vadd.f32 %v2497_v63, %v1414_v19 }
 0x41c   :  { %v1382_v42 = vmul.f32 %v1886_v22, %v1381_v38  ;;  %v1388_v43 = vmul.f32 %v1888_v40, %v1316_v27  ;;  %vm1394_vm13 = vweird.f32 %v1888_v40 }
 0x41d   :  { %vm1434_vm11 = vcmp.gt.f32.partialorder %v1426_v41, 0.0  ;;  %v1442_v44 = vmul.f32 0.1, %v1426_v41  ;;  %vm1395_vm0 = vmor %vm1393_vm14, %vm1394_vm13 }
 0x41e   :  { %v1386_v26 = vsel %vm1385_vm12, %v1886_v22, %v1382_v42  ;;  %v1389_v33 = vmul.f32 %v1888_v40, %v1388_v43 }
 0x41f   :  { %v1450_v45 = vsel %vm1434_vm11, %v1426_v41, %v1442_v44  ;;  %v1403_v46 = vmul.f32 %v1386_v26, %v2485_v35 }
 0x420   :  { %v1458_v49 = vadd.f32 %v1450_v45, %v2409_v34  ;;  %v1390_v50 = vmul.f32 0.5, %v1389_v33 }
 0x421   :  { %v1415_v51 = vmul.f32 %v2495_v59, %v1403_v46 }
 0x422   :  { %1466 = vst [vmem:[%s2575_s20 + $0x28] sm:$0xff] %v1458_v49  ;;  %v1391_v52 = vsub.f32 1.5, %v1390_v50 }
 0x423   :  { %v1427_v53 = vadd.f32 %v2497_v63, %v1415_v51 }
 0x424   :  { %v1392_v28 = vmul.f32 %v1888_v40, %v1391_v52 }
 0x425   :  { %vm1435_vm15 = vcmp.gt.f32.partialorder %v1427_v53, 0.0  ;;  %v1443_v9 = vmul.f32 0.1, %v1427_v53 }
 0x426   :  { %v1396_v20 = vsel %vm1395_vm0, %v1888_v40, %v1392_v28 }
 0x427   :  { %v1451_v35 = vsel %vm1435_vm15, %v1427_v53, %v1443_v9  ;;  %v1404_v34 = vmul.f32 %v1396_v20, %v2491_v39 }
 0x428   :  { %v1459_v54 = vadd.f32 %v1451_v35, %v2419_v47 }
 0x429   :  { %v1416_v55 = vmul.f32 %v2495_v59, %v1404_v34 }
 0x42a   :  { %1467 = vst [vmem:[%s2575_s20 + $0x30] sm:$0xff] %v1459_v54 }
 0x42b   :  { %v1428_v56 = vadd.f32 %v2497_v63, %v1416_v55 }
 0x42d   :  { %vm1436_vm1 = vcmp.gt.f32.partialorder %v1428_v56, 0.0  ;;  %v1444_v57 = vmul.f32 0.1, %v1428_v56 }
 0x42f   :  { %v1452_v58 = vsel %vm1436_vm1, %v1428_v56, %v1444_v57 }
 0x430   :  { %v1460_v60 = vadd.f32 %v1452_v58, %v2424_v48 }
 0x432   :  { %1468 = vst [vmem:[%s2575_s20 + $0x38] sm:$0xff] %v1460_v60 }
 0x433   :  { %1473 = vsyncpa [#allocation5], 1 }
 0x434   :  { %1474 = vsyncpa [#allocation7], 1 }
 0x435   :  { %1475 = vsyncpa [#allocation10], 1 }

// kernel: gnn_node_forward.13
= control target key start
LH: loop header
LB: loop body
LE: loop exit
PB: predicated region body
PF: predicated region fallthrough
CT: control target
= control target key end

     0   :  { %vm138_vm0 = vcmask 261120   ;;  %s2363_s3 = inlined_call_operand.vmem [shape: bf16[32,128], index: 3, kind: input, shape index: {}]   ;;  %s2364_s4 = inlined_call_operand.vmem [shape: bf16[128,128], index: 4, kind: input, shape index: {}]   ;;  %s2365_s8 = inlined_call_operand.vmem [shape: bf16[128,128], index: 8, kind: input, shape index: {}]   ;;  %s2366_s1 = inlined_call_operand.vmem [shape: bf16[64,32], index: 1, kind: input, shape index: {}, may-alias: {1,2}]   ;;  %s2367_s2 = inlined_call_operand.vmem [shape: bf16[64,32], index: 2, kind: input, shape index: {}, may-alias: {1,2}]   ;;  %s2368_s9 = inlined_call_operand.vmem [shape: f32[1,128], index: 9, kind: input, shape index: {}]   ;;  %s2369_s5 = inlined_call_operand.vmem [shape: f32[1,128], index: 5, kind: input, shape index: {}]   ;;  %s2370_s10 = inlined_call_operand.vmem [shape: bf16[128,128], index: 10, kind: input, shape index: {}]   ;;  %s2371_s6 = inlined_call_operand.vmem [shape: bf16[128,128], index: 6, kind: input, shape index: {}]   ;;  %s2372_s11 = inlined_call_operand.vmem [shape: f32[1,128], index: 11, kind: input, shape index: {}]   ;;  %s2373_s7 = inlined_call_operand.vmem [shape: f32[1,128], index: 7, kind: input, shape index: {}]   ;;  %s2374_s13 = inlined_call_operand.vmem [shape: bf16[128,128], index: 13, kind: input, shape index: {}]   ;;  %s2375_s12 = inlined_call_operand.vmem [shape: bf16[128,128], index: 12, kind: input, shape index: {}]   ;;  %s2376_s14 = inlined_call_operand.vmem [shape: bf16[128,128], index: 14, kind: input, shape index: {}]   ;;  %s2377_s0 = inlined_call_operand.vmem [shape: f32[64,128], index: 0, kind: input, shape index: {}]   ;;  %s2378_s15 = inlined_call_operand.vmem [shape: f32[1,128], index: 15, kind: input, shape index: {}]   ;;  %s2379_s16 = inlined_call_operand.vmem [shape: bf16[128,128], index: 16, kind: input, shape index: {}]   ;;  %s2380_s17 = inlined_call_operand.vmem [shape: f32[1,128], index: 17, kind: input, shape index: {}]   ;;  %s2381_s18 = inlined_call_operand.vmem [shape: f32[1,128], index: 18, kind: input, shape index: {}]   ;;  %s2382_s19 = inlined_call_operand.vmem [shape: f32[1,128], index: 19, kind: input, shape index: {}]   ;;  %s2383_s20 = inlined_call_operand.vmem [shape: f32[64,128], index: 20, kind: output, shape index: {}]  }
   0x1   :  { %2390 = sst [smem:[#allocation4_spill]] %s2363_s3  ;;  %v1748_v40 = vld [vmem:[%s2370_s10 + $0x38] sm:$0xff]  ;;  %v1747_v42 = vld [vmem:[%s2370_s10 + $0x30] sm:$0xff]  ;;  %v1746_v45 = vld [vmem:[%s2370_s10 + $0x28] sm:$0xff] }
   0x2   :  { %2391 = sst [smem:[#allocation5_spill]] %s2364_s4  ;;  %v1732_v41 = vld [vmem:[%s2371_s6 + $0x38] sm:$0xff]  ;;  %v1731_v43 = vld [vmem:[%s2371_s6 + $0x30] sm:$0xff]  ;;  %v1730_v46 = vld [vmem:[%s2371_s6 + $0x28] sm:$0xff] }
   0x3   :  { %2392 = sst [smem:[#allocation6_spill]] %s2365_s8  ;;  %v1745_v48 = vld [vmem:[%s2370_s10 + $0x20] sm:$0xff]  ;;  %v1744_v57 = vld [vmem:[%s2370_s10 + $0x18] sm:$0xff]  ;;  %v1743_v59 = vld [vmem:[%s2370_s10 + $0x10] sm:$0xff] }
   0x4   :  { %2393 = sst [smem:[#allocation7_spill]] %s2366_s1  ;;  %v1729_v58 = vld [vmem:[%s2371_s6 + $0x20] sm:$0xff]  ;;  %v1728_v60 = vld [vmem:[%s2371_s6 + $0x18] sm:$0xff]  ;;  %v1742_v61 = vld [vmem:[%s2370_s10 + $0x8] sm:$0xff] }
   0x5   :  { %2394 = sst [smem:[#allocation8_spill]] %s2367_s2  ;;  %v1727_v62 = vld [vmem:[%s2371_s6 + $0x10] sm:$0xff]  ;;  %v1741_v63 = vld [vmem:[%s2370_s10] sm:$0xff] }
   0x6   :  { %2395 = sst [smem:[#allocation9_spill]] %s2383_s20 }
   0x7   :  { %s2396_s23 = sld [smem:[#allocation4_spill]] }
   0x8   :  { %s2397_s26 = sld [smem:[#allocation5_spill]] }
   0x9   :  { %s2398_s2 = sld [smem:[#allocation6_spill]] }
   0xa   :  { %s2399_s3 = sld [smem:[#allocation7_spill]] }
   0xb   :  { %s2400_s22 = sld [smem:[#allocation8_spill]] }
   0xc   :  { %s2401_s25 = sld [smem:[#allocation9_spill]] }
   0xd   :  { %v1708_v0 = vld [vmem:[%s2396_s23 + $0x8] sm:$0xff]  ;;  %v1707_v1 = vld [vmem:[%s2396_s23] sm:$0xff] }
   0xe   :  { %157 = vmatpush.bf16.msra.mxu0 %v1708_v0  ;;  %250 = vmatpush.bf16.msra.mxu1 %v1708_v0  ;;  %v1724_v2 = vld [vmem:[%s2397_s26 + $0x38] sm:$0xff]  ;;  %v1723_v8 = vld [vmem:[%s2397_s26 + $0x30] sm:$0xff]  ;;  %v1722_v10 = vld [vmem:[%s2397_s26 + $0x28] sm:$0xff] }
   0xf   :  { %1781 = vmatpush.bf16.msra.mxu2 %v1708_v0  ;;  %1783 = vmatpush.bf16.msra.mxu3 %v1708_v0  ;;  %v1740_v3 = vld [vmem:[%s2398_s2 + $0x38] sm:$0xff]  ;;  %v1739_v9 = vld [vmem:[%s2398_s2 + $0x30] sm:$0xff]  ;;  %v1738_v11 = vld [vmem:[%s2398_s2 + $0x28] sm:$0xff] }
  0x10   :  { %v1709_v4 = vld [vmem:[%s2399_s3] sm:$0xff]  ;;  %v1711_v6 = vld [vmem:[%s2399_s3 + $0x10] sm:$0xff]  ;;  %v1720_v14 = vld [vmem:[%s2397_s26 + $0x18] sm:$0xff] }
  0x11   :  { %v1713_v5 = vld [vmem:[%s2400_s22] sm:$0xff]  ;;  %v1715_v7 = vld [vmem:[%s2400_s22 + $0x10] sm:$0xff]  ;;  %v1736_v15 = vld [vmem:[%s2398_s2 + $0x18] sm:$0xff] }
  0x12   :  { %158 = vmatpush.bf16.msra.mxu0 %v1707_v1  ;;  %251 = vmatpush.bf16.msra.mxu1 %v1707_v1  ;;  %v1721_v12 = vld [vmem:[%s2397_s26 + $0x20] sm:$0xff]  ;;  %v1710_v16 = vld [vmem:[%s2399_s3 + $0x8] sm:$0xff]  ;;  %v1712_v18 = vld [vmem:[%s2399_s3 + $0x18] sm:$0xff] }
  0x13   :  { %1782 = vmatpush.bf16.msra.mxu2 %v1707_v1  ;;  %1784 = vmatpush.bf16.msra.mxu3 %v1707_v1  ;;  %v1737_v13 = vld [vmem:[%s2398_s2 + $0x20] sm:$0xff]  ;;  %v1714_v17 = vld [vmem:[%s2400_s22 + $0x8] sm:$0xff]  ;;  %v1716_v19 = vld [vmem:[%s2400_s22 + $0x18] sm:$0xff] }
  0x14   :  { %v1719_v20 = vld [vmem:[%s2397_s26 + $0x10] sm:$0xff]  ;;  %v1718_v22 = vld [vmem:[%s2397_s26 + $0x8] sm:$0xff]  ;;  %v1717_v24 = vld [vmem:[%s2397_s26] sm:$0xff] }
  0x15   :  { %1427 = vmatmul.msk.bf16.vlgmr.msra.gmra.mxu0 %vm138_vm0, %v1709_v4  ;;  %1447 = vmatmul.msk.bf16.vlgmr.msra.gmra.mxu1 %vm138_vm0, %v1713_v5  ;;  %v1735_v21 = vld [vmem:[%s2398_s2 + $0x10] sm:$0xff]  ;;  %v1734_v23 = vld [vmem:[%s2398_s2 + $0x8] sm:$0xff]  ;;  %v1733_v25 = vld [vmem:[%s2398_s2] sm:$0xff] }
  0x16   :  { %590 = vmatpush.bf16.msrb.mxu0 %v1740_v3  ;;  %1429 = vmatmul.msk.bf16.vlgmr.msra.gmra.mxu2 %vm138_vm0, %v1711_v6  ;;  %v1726_v0 = vld [vmem:[%s2371_s6 + $0x8] sm:$0xff]  ;;  %v1725_v1 = vld [vmem:[%s2371_s6] sm:$0xff] }
  0x17   :  { %372 = vmatpush.bf16.msrb.mxu2 %v1724_v2  ;;  %1449 = vmatmul.msk.bf16.vlgmr.msra.gmra.mxu3 %vm138_vm0, %v1715_v7  ;;  %v2051_v3 = vld [vmem:[%s2368_s9] ss:$0 sm:$0xff] }
  0x18   :  { %699 = vmatpush.bf16.msrb.mxu1 %v1748_v40  ;;  %481 = vmatpush.bf16.msrb.mxu3 %v1732_v41  ;;  %v1771_v41 = vld [vmem:[%s2376_s14 + $0x30] sm:$0xff] }
  0x1a   :  { %591 = vmatpush.bf16.msrb.mxu0 %v1739_v9 }
  0x1b   :  { %373 = vmatpush.bf16.msrb.mxu2 %v1723_v8  ;;  %v2057_v8 = vld [vmem:[%s2369_s5] ss:$0 sm:$0xff] }
  0x1c   :  { %700 = vmatpush.bf16.msrb.mxu1 %v1747_v42  ;;  %482 = vmatpush.bf16.msrb.mxu3 %v1731_v43 }
  0x1e   :  { %592 = vmatpush.bf16.msrb.mxu0 %v1738_v11 }
  0x1f   :  { %374 = vmatpush.bf16.msrb.mxu2 %v1722_v10 }
  0x20   :  { %701 = vmatpush.bf16.msrb.mxu1 %v1746_v45  ;;  %483 = vmatpush.bf16.msrb.mxu3 %v1730_v46  ;;  %v1762_v45 = vld [vmem:[%s2374_s13 + $0x28] sm:$0xff] }
  0x21   :  { %v1754_v46 = vld [vmem:[%s2375_s12 + $0x28] sm:$0xff] }
  0x22   :  { %593 = vmatpush.bf16.msrb.mxu0 %v1737_v13 }
  0x23   :  { %375 = vmatpush.bf16.msrb.mxu2 %v1721_v12 }
  0x24   :  { %702 = vmatpush.bf16.msrb.mxu1 %v1745_v48  ;;  %484 = vmatpush.bf16.msrb.mxu3 %v1729_v58 }
  0x25   :  { %1428 = vmatmul.msk.bf16.gmra.mxu0 %vm138_vm0, %v1710_v16  ;;  %1448 = vmatmul.msk.bf16.gmra.mxu1 %vm138_vm0, %v1714_v17 }
  0x26   :  { %594 = vmatpush.bf16.msrb.mxu0 %v1736_v15  ;;  %1430 = vmatmul.msk.bf16.gmra.mxu2 %vm138_vm0, %v1712_v18 }
  0x27   :  { %376 = vmatpush.bf16.msrb.mxu2 %v1720_v14  ;;  %1450 = vmatmul.msk.bf16.gmra.mxu3 %vm138_vm0, %v1716_v19 }
  0x28   :  { %703 = vmatpush.bf16.msrb.mxu1 %v1744_v57  ;;  %485 = vmatpush.bf16.msrb.mxu3 %v1728_v60  ;;  %v1752_v60 = vld [vmem:[%s2375_s12 + $0x18] sm:$0xff] }
  0x2a   :  { %595 = vmatpush.bf16.msrb.mxu0 %v1735_v21 }
  0x2b   :  { %377 = vmatpush.bf16.msrb.mxu2 %v1719_v20 }
  0x2c   :  { %704 = vmatpush.bf16.msrb.mxu1 %v1743_v59  ;;  %486 = vmatpush.bf16.msrb.mxu3 %v1727_v62  ;;  %v1760_v59 = vld [vmem:[%s2374_s13 + $0x18] sm:$0xff] }
  0x2e   :  { %596 = vmatpush.bf16.msrb.mxu0 %v1734_v23 }
  0x2f   :  { %378 = vmatpush.bf16.msrb.mxu2 %v1718_v22 }
  0x30   :  { %705 = vmatpush.bf16.msrb.mxu1 %v1742_v61  ;;  %487 = vmatpush.bf16.msrb.mxu3 %v1726_v0  ;;  %v1768_v61 = vld [vmem:[%s2376_s14 + $0x18] sm:$0xff] }
  0x32   :  { %597 = vmatpush.bf16.msrb.mxu0 %v1733_v25 }
  0x33   :  { %379 = vmatpush.bf16.msrb.mxu2 %v1717_v24 }
  0x34   :  { %706 = vmatpush.bf16.msrb.mxu1 %v1741_v63  ;;  %488 = vmatpush.bf16.msrb.mxu3 %v1725_v1 }
  0x92   :  { %v160_v26 = vpop.f32.mrf.mxu0  ;;  %v253_v27 = vpop.f32.mrf.mxu1 }
  0x99   :  { %v170_v35 = vpop.f32.mrf.mxu2 }
  0x9a   :  { %v162_v28 = vpop.f32.mrf.mxu0  ;;  %v255_v29 = vpop.f32.mrf.mxu1 }
  0x9b   :  { %v300_v30 = vpack.c.bf16 %v162_v28, %v160_v26  ;;  %v518_v31 = vpack.c.bf16 %v255_v29, %v253_v27  ;;  %v263_v34 = vpop.f32.mrf.mxu3 }
  0x9d   :  { %380 = vmatmul.bf16.vlgmr.msrb.gmra.mxu2 %v300_v30  ;;  %598 = vmatmul.bf16.vlgmr.msrb.gmra.mxu0 %v518_v31 }
  0xa1   :  { %v172_v47 = vpop.f32.mrf.mxu2 }
  0xa2   :  { %v165_v32 = vpop.f32.mrf.mxu0  ;;  %v258_v33 = vpop.f32.mrf.mxu1  ;;  %v302_v50 = vpack.c.bf16 %v172_v47, %v170_v35  ;;  %v1756_v35 = vld [vmem:[%s2375_s12 + $0x38] sm:$0xff]  ;;  %v1770_v47 = vld [vmem:[%s2376_s14 + $0x28] sm:$0xff] }
  0xa3   :  { %v265_v44 = vpop.f32.mrf.mxu3  ;;  %901 = vmatpush.bf16.msra.mxu3 %v1756_v35 }
  0xa4   :  { %v520_v49 = vpack.c.bf16 %v265_v44, %v263_v34  ;;  %v1764_v34 = vld [vmem:[%s2374_s13 + $0x38] sm:$0xff] }
  0xa5   :  { %824 = vmatpush.bf16.msra.mxu2 %v1764_v34  ;;  %v2181_v34 = vld [vmem:[%s2377_s0 + $0x28] sm:$0xff] }
  0xa9   :  { %v175_v52 = vpop.f32.mrf.mxu2 }
  0xaa   :  { %v167_v36 = vpop.f32.mrf.mxu0  ;;  %v260_v37 = vpop.f32.mrf.mxu1 }
  0xab   :  { %v301_v38 = vpack.c.bf16 %v167_v36, %v165_v32  ;;  %v519_v39 = vpack.c.bf16 %v260_v37, %v258_v33  ;;  %v268_v51 = vpop.f32.mrf.mxu3  ;;  %v1772_v37 = vld [vmem:[%s2376_s14 + $0x38] sm:$0xff] }
  0xac   :  { %998 = vmatpush.bf16.msra.mxu0 %v1772_v37  ;;  %v1788_v37 = vld [vmem:[%s2373_s7] ss:$0 sm:$0xff] }
  0xad   :  { %385 = vmatmul.bf16.gmra.mxu2 %v301_v38  ;;  %603 = vmatmul.bf16.gmra.mxu0 %v519_v39  ;;  %v1763_v38 = vld [vmem:[%s2374_s13 + $0x30] sm:$0xff] }
  0xae   :  { %v1755_v39 = vld [vmem:[%s2375_s12 + $0x30] sm:$0xff]  ;;  %825 = vmatpush.bf16.msra.mxu2 %v1763_v38 }
  0xaf   :  { %902 = vmatpush.bf16.msra.mxu3 %v1755_v39 }
  0xb0   :  { %999 = vmatpush.bf16.msra.mxu0 %v1771_v41 }
  0xb1   :  { %v177_v54 = vpop.f32.mrf.mxu2 }
  0xb2   :  { %v303_v56 = vpack.c.bf16 %v177_v54, %v175_v52  ;;  %826 = vmatpush.bf16.msra.mxu2 %v1762_v45  ;;  %v1761_v52 = vld [vmem:[%s2374_s13 + $0x20] sm:$0xff] }
  0xb3   :  { %v270_v53 = vpop.f32.mrf.mxu3  ;;  %903 = vmatpush.bf16.msra.mxu3 %v1754_v46  ;;  %v1753_v54 = vld [vmem:[%s2375_s12 + $0x20] sm:$0xff] }
  0xb4   :  { %v521_v55 = vpack.c.bf16 %v270_v53, %v268_v51  ;;  %1000 = vmatpush.bf16.msra.mxu0 %v1770_v47  ;;  %v2191_v47 = vld [vmem:[%s2377_s0 + $0x30] sm:$0xff] }
  0xb6   :  { %827 = vmatpush.bf16.msra.mxu2 %v1761_v52 }
  0xb7   :  { %904 = vmatpush.bf16.msra.mxu3 %v1753_v54 }
  0xba   :  { %828 = vmatpush.bf16.msra.mxu2 %v1760_v59 }
  0xbb   :  { %905 = vmatpush.bf16.msra.mxu3 %v1752_v60  ;;  %v1779_v60 = vld [vmem:[%s2379_s16 + $0x30] sm:$0xff] }
  0xbd   :  { %390 = vmatmul.bf16.gmra.mxu2 %v302_v50  ;;  %608 = vmatmul.bf16.gmra.mxu0 %v520_v49 }
  0xcd   :  { %395 = vmatmul.bf16.gmra.mxu2 %v303_v56  ;;  %613 = vmatmul.bf16.gmra.mxu0 %v521_v55  ;;  %v1769_v55 = vld [vmem:[%s2376_s14 + $0x20] sm:$0xff] }
  0xce   :  { %1001 = vmatpush.bf16.msra.mxu0 %v1769_v55 }
  0xd2   :  { %1002 = vmatpush.bf16.msra.mxu0 %v1768_v61 }
 0x11a   :  { %v599_v2 = vpop.f32.mrf.mxu0 }
 0x11b   :  { %v600_v4 = vadd.f32 %v2051_v3, %v599_v2 }
 0x11d   :  { %v619_v7 = vmax.f32 %v600_v4, 0.0 }
 0x120   :  { %v381_v5 = vpop.f32.mrf.mxu2 }
 0x121   :  { %v382_v11 = vadd.f32 %v2057_v8, %v381_v5 }
 0x122   :  { %v601_v6 = vpop.f32.mrf.mxu0 }
 0x123   :  { %v602_v9 = vadd.f32 %v2051_v3, %v601_v6  ;;  %v401_v16 = vmax.f32 %v382_v11, 0.0 }
 0x125   :  { %v620_v10 = vmax.f32 %v602_v9, 0.0 }
 0x127   :  { %v627_v12 = vpack.c.bf16 %v620_v10, %v619_v7 }
 0x128   :  { %v383_v13 = vpop.f32.mrf.mxu2 }
 0x129   :  { %v384_v14 = vadd.f32 %v2057_v8, %v383_v13  ;;  %707 = vmatmul.bf16.vlgmr.msrb.gmra.mxu1 %v627_v12  ;;  %v1767_v13 = vld [vmem:[%s2376_s14 + $0x10] sm:$0xff] }
 0x12a   :  { %v604_v15 = vpop.f32.mrf.mxu0  ;;  %1003 = vmatpush.bf16.msra.mxu0 %v1767_v13 }
 0x12b   :  { %v402_v17 = vmax.f32 %v384_v14, 0.0  ;;  %v605_v19 = vadd.f32 %v2051_v3, %v604_v15  ;;  %v1751_v14 = vld [vmem:[%s2375_s12 + $0x10] sm:$0xff]  ;;  %v1750_v15 = vld [vmem:[%s2375_s12 + $0x8] sm:$0xff] }
 0x12c   :  { %906 = vmatpush.bf16.msra.mxu3 %v1751_v14 }
 0x12d   :  { %v409_v18 = vpack.c.bf16 %v402_v17, %v401_v16  ;;  %v621_v22 = vmax.f32 %v605_v19, 0.0  ;;  %v1765_v16 = vld [vmem:[%s2376_s14] sm:$0xff]  ;;  %v1758_v17 = vld [vmem:[%s2374_s13 + $0x8] sm:$0xff] }
 0x12e   :  { %v2146_v19 = vld [vmem:[%s2377_s0] sm:$0xff] }
 0x12f   :  { %489 = vmatmul.bf16.vlgmr.msrb.gmra.mxu3 %v409_v18  ;;  %v1749_v18 = vld [vmem:[%s2375_s12] sm:$0xff] }
 0x130   :  { %v386_v20 = vpop.f32.mrf.mxu2  ;;  %907 = vmatpush.bf16.msra.mxu3 %v1750_v15  ;;  %v1775_v15 = vld [vmem:[%s2379_s16 + $0x10] sm:$0xff] }
 0x131   :  { %v387_v25 = vadd.f32 %v2057_v8, %v386_v20  ;;  %v2151_v20 = vld [vmem:[%s2377_s0 + $0x8] sm:$0xff] }
 0x132   :  { %v606_v21 = vpop.f32.mrf.mxu0 }
 0x133   :  { %v607_v23 = vadd.f32 %v2051_v3, %v606_v21  ;;  %v403_v30 = vmax.f32 %v387_v25, 0.0  ;;  %v736_v21 = vpack.c.bf16 %v2151_v20, %v2146_v19 }
 0x134   :  { %908 = vmatpush.bf16.msra.mxu3 %v1749_v18 }
 0x135   :  { %v622_v24 = vmax.f32 %v607_v23, 0.0  ;;  %v2161_v23 = vld [vmem:[%s2377_s0 + $0x10] sm:$0xff] }
 0x137   :  { %v628_v26 = vpack.c.bf16 %v622_v24, %v621_v22  ;;  %v1757_v22 = vld [vmem:[%s2374_s13] sm:$0xff]  ;;  %v2166_v24 = vld [vmem:[%s2377_s0 + $0x18] sm:$0xff] }
 0x138   :  { %v388_v27 = vpop.f32.mrf.mxu2  ;;  %v737_v25 = vpack.c.bf16 %v2166_v24, %v2161_v23 }
 0x139   :  { %v389_v28 = vadd.f32 %v2057_v8, %v388_v27  ;;  %712 = vmatmul.bf16.gmra.mxu1 %v628_v26  ;;  %v1787_v27 = vld [vmem:[%s2372_s11] ss:$0 sm:$0xff] }
 0x13a   :  { %v609_v29 = vpop.f32.mrf.mxu0 }
 0x13b   :  { %v404_v31 = vmax.f32 %v389_v28, 0.0  ;;  %v610_v33 = vadd.f32 %v2051_v3, %v609_v29 }
 0x13d   :  { %v410_v32 = vpack.c.bf16 %v404_v31, %v403_v30  ;;  %v623_v42 = vmax.f32 %v610_v33, 0.0  ;;  %v2176_v33 = vld [vmem:[%s2377_s0 + $0x20] sm:$0xff] }
 0x13e   :  { %v738_v35 = vpack.c.bf16 %v2181_v34, %v2176_v33 }
 0x13f   :  { %494 = vmatmul.bf16.gmra.mxu3 %v410_v32 }
 0x140   :  { %v391_v36 = vpop.f32.mrf.mxu2 }
 0x141   :  { %v392_v48 = vadd.f32 %v2057_v8, %v391_v36 }
 0x142   :  { %v611_v40 = vpop.f32.mrf.mxu0 }
 0x143   :  { %v612_v43 = vadd.f32 %v2051_v3, %v611_v40  ;;  %v405_v56 = vmax.f32 %v392_v48, 0.0  ;;  %v2196_v48 = vld [vmem:[%s2377_s0 + $0x38] sm:$0xff] }
 0x145   :  { %v624_v44 = vmax.f32 %v612_v43, 0.0 }
 0x147   :  { %v629_v49 = vpack.c.bf16 %v624_v44, %v623_v42 }
 0x148   :  { %v393_v50 = vpop.f32.mrf.mxu2 }
 0x149   :  { %v394_v51 = vadd.f32 %v2057_v8, %v393_v50  ;;  %717 = vmatmul.bf16.gmra.mxu1 %v629_v49  ;;  %v739_v49 = vpack.c.bf16 %v2196_v48, %v2191_v47 }
 0x14a   :  { %v614_v53 = vpop.f32.mrf.mxu0 }
 0x14b   :  { %v406_v57 = vmax.f32 %v394_v51, 0.0  ;;  %v615_v62 = vadd.f32 %v2051_v3, %v614_v53 }
 0x14d   :  { %v411_v58 = vpack.c.bf16 %v406_v57, %v405_v56  ;;  %v625_v1 = vmax.f32 %v615_v62, 0.0  ;;  %v1778_v62 = vld [vmem:[%s2379_s16 + $0x28] sm:$0xff] }
 0x14f   :  { %499 = vmatmul.bf16.gmra.mxu3 %v411_v58  ;;  %v1780_v58 = vld [vmem:[%s2379_s16 + $0x38] sm:$0xff] }
 0x150   :  { %v396_v63 = vpop.f32.mrf.mxu2  ;;  %1127 = vmatpush.bf16.msra.mxu1 %v1780_v58 }
 0x151   :  { %v397_v5 = vadd.f32 %v2057_v8, %v396_v63 }
 0x152   :  { %v616_v0 = vpop.f32.mrf.mxu0 }
 0x153   :  { %v617_v2 = vadd.f32 %v2051_v3, %v616_v0  ;;  %v407_v10 = vmax.f32 %v397_v5, 0.0  ;;  %v1759_v3 = vld [vmem:[%s2374_s13 + $0x10] sm:$0xff]  ;;  %v1777_v0 = vld [vmem:[%s2379_s16 + $0x20] sm:$0xff] }
 0x154   :  { %829 = vmatpush.bf16.msra.mxu2 %v1759_v3  ;;  %1128 = vmatpush.bf16.msra.mxu1 %v1779_v60 }
 0x155   :  { %v626_v4 = vmax.f32 %v617_v2, 0.0 }
 0x157   :  { %v630_v6 = vpack.c.bf16 %v626_v4, %v625_v1 }
 0x158   :  { %v398_v7 = vpop.f32.mrf.mxu2  ;;  %830 = vmatpush.bf16.msra.mxu2 %v1758_v17  ;;  %1129 = vmatpush.bf16.msra.mxu1 %v1778_v62  ;;  %v1773_v17 = vld [vmem:[%s2379_s16] sm:$0xff] }
 0x159   :  { %v399_v9 = vadd.f32 %v2057_v8, %v398_v7  ;;  %722 = vmatmul.bf16.gmra.mxu1 %v630_v6  ;;  %v1766_v8 = vld [vmem:[%s2376_s14 + $0x8] sm:$0xff] }
 0x15a   :  { %1004 = vmatpush.bf16.msra.mxu0 %v1766_v8  ;;  %v1776_v8 = vld [vmem:[%s2379_s16 + $0x18] sm:$0xff] }
 0x15b   :  { %v408_v11 = vmax.f32 %v399_v9, 0.0 }
 0x15c   :  { %831 = vmatpush.bf16.msra.mxu2 %v1757_v22  ;;  %1130 = vmatpush.bf16.msra.mxu1 %v1777_v0 }
 0x15d   :  { %v412_v12 = vpack.c.bf16 %v408_v11, %v407_v10 }
 0x15e   :  { %1005 = vmatpush.bf16.msra.mxu0 %v1765_v16  ;;  %v1774_v16 = vld [vmem:[%s2379_s16 + $0x8] sm:$0xff] }
 0x15f   :  { %504 = vmatmul.bf16.gmra.mxu3 %v412_v12 }
 0x160   :  { %1131 = vmatpush.bf16.msra.mxu1 %v1776_v8 }
 0x164   :  { %1132 = vmatpush.bf16.msra.mxu1 %v1775_v15 }
 0x168   :  { %1133 = vmatpush.bf16.msra.mxu1 %v1774_v16 }
 0x16c   :  { %1134 = vmatpush.bf16.msra.mxu1 %v1773_v17 }
 0x16f   :  { %909 = vmatmul.bf16.vlgmr.msra.gmra.mxu3 %v736_v21 }
 0x17f   :  { %914 = vmatmul.bf16.gmra.mxu3 %v737_v25 }
 0x18f   :  { %919 = vmatmul.bf16.gmra.mxu3 %v738_v35 }
 0x19f   :  { %924 = vmatmul.bf16.gmra.mxu3 %v739_v49 }
 0x1a6   :  { %v708_v26 = vpop.f32.mrf.mxu1 }
 0x1a7   :  { %v709_v29 = vadd.f32 %v1787_v27, %v708_v26 }
 0x1ae   :  { %v710_v28 = vpop.f32.mrf.mxu1 }
 0x1af   :  { %v711_v30 = vadd.f32 %v1787_v27, %v710_v28 }
 0x1b1   :  { %v930_v31 = vpack.c.bf16 %v711_v30, %v709_v29  ;;  %v1789_v30 = vld [vmem:[%s2378_s15] ss:$0 sm:$0xff] }
 0x1b2   :  { %v490_v32 = vpop.f32.mrf.mxu3 }
 0x1b3   :  { %1006 = vmatmul.bf16.vlgmr.msra.gmra.mxu0 %v930_v31  ;;  %v491_v39 = vadd.f32 %v1788_v37, %v490_v32 }
 0x1b6   :  { %v713_v36 = vpop.f32.mrf.mxu1 }
 0x1b7   :  { %v714_v43 = vadd.f32 %v1787_v27, %v713_v36 }
 0x1ba   :  { %v492_v38 = vpop.f32.mrf.mxu3 }
 0x1bb   :  { %v493_v40 = vadd.f32 %v1788_v37, %v492_v38 }
 0x1bd   :  { %v756_v41 = vpack.c.bf16 %v493_v40, %v491_v39 }
 0x1be   :  { %v715_v42 = vpop.f32.mrf.mxu1 }
 0x1bf   :  { %v716_v44 = vadd.f32 %v1787_v27, %v715_v42  ;;  %832 = vmatmul.bf16.vlgmr.msra.gmra.mxu2 %v756_v41 }
 0x1c1   :  { %v931_v45 = vpack.c.bf16 %v716_v44, %v714_v43 }
 0x1c2   :  { %v495_v46 = vpop.f32.mrf.mxu3 }
 0x1c3   :  { %1011 = vmatmul.bf16.gmra.mxu0 %v931_v45  ;;  %v496_v52 = vadd.f32 %v1788_v37, %v495_v46 }
 0x1c6   :  { %v718_v50 = vpop.f32.mrf.mxu1 }
 0x1c7   :  { %v719_v56 = vadd.f32 %v1787_v27, %v718_v50 }
 0x1ca   :  { %v497_v51 = vpop.f32.mrf.mxu3 }
 0x1cb   :  { %v498_v53 = vadd.f32 %v1788_v37, %v497_v51 }
 0x1cd   :  { %v757_v54 = vpack.c.bf16 %v498_v53, %v496_v52 }
 0x1ce   :  { %v720_v55 = vpop.f32.mrf.mxu1 }
 0x1cf   :  { %v721_v57 = vadd.f32 %v1787_v27, %v720_v55  ;;  %837 = vmatmul.bf16.gmra.mxu2 %v757_v54 }
 0x1d1   :  { %v932_v59 = vpack.c.bf16 %v721_v57, %v719_v56 }
 0x1d2   :  { %v500_v61 = vpop.f32.mrf.mxu3 }
 0x1d3   :  { %1016 = vmatmul.bf16.gmra.mxu0 %v932_v59  ;;  %v501_v2 = vadd.f32 %v1788_v37, %v500_v61 }
 0x1d6   :  { %v723_v63 = vpop.f32.mrf.mxu1 }
 0x1d7   :  { %v724_v7 = vadd.f32 %v1787_v27, %v723_v63 }
 0x1da   :  { %v502_v1 = vpop.f32.mrf.mxu3 }
 0x1db   :  { %v503_v4 = vadd.f32 %v1788_v37, %v502_v1 }
 0x1dd   :  { %v758_v5 = vpack.c.bf16 %v503_v4, %v501_v2 }
 0x1de   :  { %v725_v6 = vpop.f32.mrf.mxu1 }
 0x1df   :  { %v726_v9 = vadd.f32 %v1787_v27, %v725_v6  ;;  %842 = vmatmul.bf16.gmra.mxu2 %v758_v5 }
 0x1e1   :  { %v933_v10 = vpack.c.bf16 %v726_v9, %v724_v7 }
 0x1e2   :  { %v505_v11 = vpop.f32.mrf.mxu3 }
 0x1e3   :  { %1021 = vmatmul.bf16.gmra.mxu0 %v933_v10  ;;  %v506_v13 = vadd.f32 %v1788_v37, %v505_v11 }
 0x1ea   :  { %v507_v12 = vpop.f32.mrf.mxu3 }
 0x1eb   :  { %v508_v3 = vadd.f32 %v1788_v37, %v507_v12 }
 0x1ed   :  { %v759_v14 = vpack.c.bf16 %v508_v3, %v506_v13 }
 0x1ef   :  { %847 = vmatmul.bf16.gmra.mxu2 %v759_v14 }
 0x1f2   :  { %v910_v18 = vpop.f32.mrf.mxu3 }
 0x1fa   :  { %v912_v22 = vpop.f32.mrf.mxu3 }
 0x202   :  { %v915_v28 = vpop.f32.mrf.mxu3 }
 0x20a   :  { %v917_v42 = vpop.f32.mrf.mxu3 }
 0x212   :  { %v920_v51 = vpop.f32.mrf.mxu3 }
 0x21a   :  { %v922_v61 = vpop.f32.mrf.mxu3 }
 0x222   :  { %v925_v6 = vpop.f32.mrf.mxu3 }
 0x22a   :  { %v927_v14 = vpop.f32.mrf.mxu3 }
 0x230   :  { %v1007_v21 = vpop.f32.mrf.mxu0 }
 0x238   :  { %v1009_v25 = vpop.f32.mrf.mxu0 }
 0x240   :  { %v1012_v31 = vpop.f32.mrf.mxu0 }
 0x242   :  { %v833_v26 = vpop.f32.mrf.mxu2 }
 0x243   :  { %v911_v27 = vadd.f32 %v910_v18, %v833_v26 }
 0x245   :  { %v1027_v29 = vadd.f32 %v1007_v21, %v911_v27  ;;  %v1156_v27 = vlaneseq }
 0x247   :  { %v1039_v36 = vadd.f32 %v1789_v30, %v1027_v29  ;;  %v1790_v29 = vld [vmem:[%s2380_s17] ss:$0 sm:$0xff] }
 0x248   :  { %v1014_v44 = vpop.f32.mrf.mxu0 }
 0x249   :  { %v1047_v39 = vmax.f32 %v1039_v36, 0.0 }
 0x24a   :  { %v835_v32 = vpop.f32.mrf.mxu2 }
 0x24b   :  { %v913_v35 = vadd.f32 %v912_v22, %v835_v32 }
 0x24d   :  { %v1028_v37 = vadd.f32 %v1009_v25, %v913_v35 }
 0x24f   :  { %v1040_v38 = vadd.f32 %v1789_v30, %v1028_v37 }
 0x250   :  { %v1017_v54 = vpop.f32.mrf.mxu0 }
 0x251   :  { %v1048_v40 = vmax.f32 %v1040_v38, 0.0 }
 0x252   :  { %v838_v41 = vpop.f32.mrf.mxu2 }
 0x253   :  { %v1055_v43 = vpack.c.bf16 %v1048_v40, %v1047_v39  ;;  %v916_v45 = vadd.f32 %v915_v28, %v838_v41  ;;  %v2227_v28 = vand.u32 127, %v1156_v27 }
 0x255   :  { %1135 = vmatmul.bf16.vlgmr.msra.gmra.mxu1 %v1055_v43  ;;  %v1029_v46 = vadd.f32 %v1012_v31, %v916_v45  ;;  %vm1158_vm1 = vcmp.lt.s32.totalorder %v2227_v28, 32 }
 0x257   :  { %v1041_v53 = vadd.f32 %v1789_v30, %v1029_v46 }
 0x258   :  { %v1019_v62 = vpop.f32.mrf.mxu0 }
 0x259   :  { %v1049_v56 = vmax.f32 %v1041_v53, 0.0 }
 0x25a   :  { %v840_v49 = vpop.f32.mrf.mxu2 }
 0x25b   :  { %v918_v50 = vadd.f32 %v917_v42, %v840_v49 }
 0x25d   :  { %v1030_v52 = vadd.f32 %v1014_v44, %v918_v50 }
 0x25f   :  { %v1042_v55 = vadd.f32 %v1789_v30, %v1030_v52 }
 0x260   :  { %v1022_v10 = vpop.f32.mrf.mxu0 }
 0x261   :  { %v1050_v57 = vmax.f32 %v1042_v55, 0.0 }
 0x262   :  { %v843_v58 = vpop.f32.mrf.mxu2 }
 0x263   :  { %v1056_v59 = vpack.c.bf16 %v1050_v57, %v1049_v56  ;;  %v921_v60 = vadd.f32 %v920_v51, %v843_v58 }
 0x265   :  { %1140 = vmatmul.bf16.gmra.mxu1 %v1056_v59  ;;  %v1031_v63 = vadd.f32 %v1017_v54, %v921_v60 }
 0x267   :  { %v1043_v4 = vadd.f32 %v1789_v30, %v1031_v63 }
 0x268   :  { %v1024_v16 = vpop.f32.mrf.mxu0 }
 0x269   :  { %v1051_v7 = vmax.f32 %v1043_v4, 0.0 }
 0x26a   :  { %v845_v0 = vpop.f32.mrf.mxu2 }
 0x26b   :  { %v923_v1 = vadd.f32 %v922_v61, %v845_v0 }
 0x26d   :  { %v1032_v2 = vadd.f32 %v1019_v62, %v923_v1 }
 0x26f   :  { %v1044_v5 = vadd.f32 %v1789_v30, %v1032_v2 }
 0x271   :  { %v1052_v9 = vmax.f32 %v1044_v5, 0.0 }
 0x272   :  { %v848_v11 = vpop.f32.mrf.mxu2 }
 0x273   :  { %v1057_v12 = vpack.c.bf16 %v1052_v9, %v1051_v7  ;;  %v926_v13 = vadd.f32 %v925_v6, %v848_v11 }
 0x275   :  { %1145 = vmatmul.bf16.gmra.mxu1 %v1057_v12  ;;  %v1033_v3 = vadd.f32 %v1022_v10, %v926_v13 }
 0x277   :  { %v1045_v18 = vadd.f32 %v1789_v30, %v1033_v3 }
 0x279   :  { %v1053_v22 = vmax.f32 %v1045_v18, 0.0 }
 0x27a   :  { %v850_v8 = vpop.f32.mrf.mxu2 }
 0x27b   :  { %v928_v15 = vadd.f32 %v927_v14, %v850_v8 }
 0x27d   :  { %v1034_v17 = vadd.f32 %v1024_v16, %v928_v15 }
 0x27f   :  { %v1046_v21 = vadd.f32 %v1789_v30, %v1034_v17 }
 0x281   :  { %v1054_v25 = vmax.f32 %v1046_v21, 0.0 }
 0x283   :  { %v1058_v26 = vpack.c.bf16 %v1054_v25, %v1053_v22 }
 0x285   :  { %1150 = vmatmul.bf16.gmra.mxu1 %v1058_v26 }
 0x2d2   :  { %v1136_v31 = vpop.f32.mrf.mxu1 }
 0x2d3   :  { %v1137_v32 = vadd.f32 %v1790_v29, %v1136_v31 }
 0x2d5   :  { %v1159_v35 = vsel %vm1158_vm1, %v1137_v32, 0.0 }
 0x2d6   :  { %1167 = vadd.xlane.f32.xlu0 %v1159_v35 }
 0x2da   :  { %v1138_v30 = vpop.f32.mrf.mxu1 }
 0x2db   :  { %v1139_v36 = vadd.f32 %v1790_v29, %v1138_v30 }
 0x2dd   :  { %v1160_v37 = vsel %vm1158_vm1, %v1139_v36, 0.0 }
 0x2de   :  { %1169 = vadd.xlane.f32.xlu0 %v1160_v37 }
 0x2e2   :  { %v1141_v38 = vpop.f32.mrf.mxu1 }
 0x2e3   :  { %v1142_v39 = vadd.f32 %v1790_v29, %v1141_v38 }
 0x2e5   :  { %v1161_v40 = vsel %vm1158_vm1, %v1142_v39, 0.0 }
 0x2e6   :  { %1171 = vadd.xlane.f32.xlu1 %v1161_v40 }
 0x2ea   :  { %v1143_v41 = vpop.f32.mrf.mxu1 }
 0x2eb   :  { %v1144_v42 = vadd.f32 %v1790_v29, %v1143_v41 }
 0x2ed   :  { %v1162_v43 = vsel %vm1158_vm1, %v1144_v42, 0.0 }
 0x2ee   :  { %1173 = vadd.xlane.f32.xlu1 %v1162_v43 }
 0x2f2   :  { %v1146_v44 = vpop.f32.mrf.mxu1 }
 0x2f3   :  { %v1147_v45 = vadd.f32 %v1790_v29, %v1146_v44 }
 0x2f5   :  { %v1163_v46 = vsel %vm1158_vm1, %v1147_v45, 0.0 }
 0x2f6   :  { %1175 = vadd.xlane.f32.xlu2 %v1163_v46 }
 0x2fa   :  { %v1148_v49 = vpop.f32.mrf.mxu1 }
 0x2fb   :  { %v1149_v50 = vadd.f32 %v1790_v29, %v1148_v49 }
 0x2fd   :  { %v1164_v51 = vsel %vm1158_vm1, %v1149_v50, 0.0 }
 0x2fe   :  { %1177 = vadd.xlane.f32.xlu2 %v1164_v51 }
 0x302   :  { %v1151_v52 = vpop.f32.mrf.mxu1 }
 0x303   :  { %v1152_v53 = vadd.f32 %v1790_v29, %v1151_v52 }
 0x305   :  { %v1165_v54 = vsel %vm1158_vm1, %v1152_v53, 0.0 }
 0x306   :  { %1179 = vadd.xlane.f32.xlu0 %v1165_v54 }
 0x30a   :  { %v1153_v55 = vpop.f32.mrf.mxu1 }
 0x30b   :  { %v1154_v56 = vadd.f32 %v1790_v29, %v1153_v55 }
 0x30d   :  { %v1166_v57 = vsel %vm1158_vm1, %v1154_v56, 0.0 }
 0x30e   :  { %1181 = vadd.xlane.f32.xlu1 %v1166_v57 }
 0x349   :  { %v1168_v58 = vpop.xlane.xlu0 %1167 }
 0x34a   :  { %v1183_v59 = vmul.f32 0.03125, %v1168_v58 }
 0x34c   :  { %v1191_v60 = vsub.f32 %v1137_v32, %v1183_v59  ;;  %v2300_v59 = vld [vmem:[%s2381_s18] ss:$0 sm:$0xff] }
 0x34e   :  { %v2251_v61 = vsel %vm1158_vm1, %v1191_v60, 0.0 }
 0x34f   :  { %v1207_v62 = vmul.f32 %v2251_v61, %v2251_v61 }
 0x351   :  { %1215 = vadd.xlane.f32.xlu2 %v1207_v62  ;;  %v1170_v63 = vpop.xlane.xlu0 %1169 }
 0x352   :  { %v1184_v0 = vmul.f32 0.03125, %v1170_v63  ;;  %v2305_v63 = vld [vmem:[%s2382_s19] ss:$0 sm:$0xff] }
 0x354   :  { %v1192_v1 = vsub.f32 %v1139_v36, %v1184_v0 }
 0x356   :  { %v2257_v2 = vsel %vm1158_vm1, %v1192_v1, 0.0 }
 0x357   :  { %v1208_v4 = vmul.f32 %v2257_v2, %v2257_v2 }
 0x359   :  { %v1172_v5 = vpop.xlane.xlu1 %1171  ;;  %1217 = vadd.xlane.f32.xlu0 %v1208_v4 }
 0x35a   :  { %v1185_v6 = vmul.f32 0.03125, %v1172_v5 }
 0x35c   :  { %v1193_v7 = vsub.f32 %v1142_v39, %v1185_v6 }
 0x35e   :  { %v2263_v9 = vsel %vm1158_vm1, %v1193_v7, 0.0 }
 0x35f   :  { %v1209_v10 = vmul.f32 %v2263_v9, %v2263_v9 }
 0x361   :  { %1219 = vadd.xlane.f32.xlu1 %v1209_v10  ;;  %v1174_v11 = vpop.xlane.xlu1 %1173 }
 0x362   :  { %v1186_v12 = vmul.f32 0.03125, %v1174_v11 }
 0x364   :  { %v1194_v13 = vsub.f32 %v1144_v42, %v1186_v12 }
 0x366   :  { %v2269_v3 = vsel %vm1158_vm1, %v1194_v13, 0.0 }
 0x367   :  { %v1210_v14 = vmul.f32 %v2269_v3, %v2269_v3 }
 0x369   :  { %v1176_v8 = vpop.xlane.xlu2 %1175  ;;  %1221 = vadd.xlane.f32.xlu2 %v1210_v14 }
 0x36a   :  { %v1187_v15 = vmul.f32 0.03125, %v1176_v8 }
 0x36c   :  { %v1195_v16 = vsub.f32 %v1147_v45, %v1187_v15 }
 0x36e   :  { %v2275_v17 = vsel %vm1158_vm1, %v1195_v16, 0.0 }
 0x36f   :  { %v1211_v18 = vmul.f32 %v2275_v17, %v2275_v17 }
 0x371   :  { %v1178_v21 = vpop.xlane.xlu2 %1177  ;;  %1223 = vadd.xlane.f32.xlu0 %v1211_v18 }
 0x372   :  { %v1188_v22 = vmul.f32 0.03125, %v1178_v21 }
 0x374   :  { %v1196_v25 = vsub.f32 %v1149_v50, %v1188_v22 }
 0x376   :  { %v2281_v26 = vsel %vm1158_vm1, %v1196_v25, 0.0 }
 0x377   :  { %v1212_v27 = vmul.f32 %v2281_v26, %v2281_v26 }
 0x379   :  { %1225 = vadd.xlane.f32.xlu1 %v1212_v27  ;;  %v1180_v29 = vpop.xlane.xlu0 %1179 }
 0x37a   :  { %v1189_v31 = vmul.f32 0.03125, %v1180_v29 }
 0x37c   :  { %v1197_v32 = vsub.f32 %v1152_v53, %v1189_v31 }
 0x37e   :  { %v2287_v35 = vsel %vm1158_vm1, %v1197_v32, 0.0 }
 0x37f   :  { %v1213_v30 = vmul.f32 %v2287_v35, %v2287_v35 }
 0x381   :  { %v1182_v36 = vpop.xlane.xlu1 %1181  ;;  %1227 = vadd.xlane.f32.xlu2 %v1213_v30 }
 0x382   :  { %v1190_v37 = vmul.f32 0.03125, %v1182_v36 }
 0x384   :  { %v1198_v38 = vsub.f32 %v1154_v56, %v1190_v37 }
 0x386   :  { %v2293_v39 = vsel %vm1158_vm1, %v1198_v38, 0.0 }
 0x387   :  { %v1214_v40 = vmul.f32 %v2293_v39, %v2293_v39 }
 0x389   :  { %1229 = vadd.xlane.f32.xlu0 %v1214_v40 }
 0x3c4   :  { %v1216_v41 = vpop.xlane.xlu2 %1215 }
 0x3c5   :  { %v1231_v42 = vmul.f32 0.03125, %v1216_v41 }
 0x3c7   :  { %v1239_v43 = vadd.f32 1e-05, %v1231_v42 }
 0x3c9   :  { %1793 = vrsqrt.f32 %v1239_v43  ;;  %vm1253_vm3 = vweird.f32 %v1239_v43 }
 0x3cc   :  { %v1218_v44 = vpop.xlane.xlu0 %1217 }
 0x3cd   :  { %v1232_v45 = vmul.f32 0.03125, %v1218_v44 }
 0x3cf   :  { %v1794_v46 = vpop.eup %1793  ;;  %v1240_v49 = vadd.f32 1e-05, %v1232_v45 }
 0x3d0   :  { %v1248_v50 = vmul.f32 %v1794_v46, %v1239_v43  ;;  %vm1254_vm2 = vweird.f32 %v1794_v46 }
 0x3d1   :  { %1795 = vrsqrt.f32 %v1240_v49  ;;  %vm1255_vm4 = vmor %vm1253_vm3, %vm1254_vm2  ;;  %vm1263_vm6 = vweird.f32 %v1240_v49 }
 0x3d2   :  { %v1249_v51 = vmul.f32 %v1794_v46, %v1248_v50 }
 0x3d4   :  { %v1250_v52 = vmul.f32 0.5, %v1249_v51  ;;  %v1220_v53 = vpop.xlane.xlu1 %1219 }
 0x3d5   :  { %v1233_v28 = vmul.f32 0.03125, %v1220_v53 }
 0x3d6   :  { %v1251_v54 = vsub.f32 1.5, %v1250_v52 }
 0x3d7   :  { %v1796_v55 = vpop.eup %1795  ;;  %v1241_v56 = vadd.f32 1e-05, %v1233_v28 }
 0x3d8   :  { %v1252_v57 = vmul.f32 %v1794_v46, %v1251_v54  ;;  %v1258_v58 = vmul.f32 %v1796_v55, %v1240_v49  ;;  %vm1264_vm5 = vweird.f32 %v1796_v55 }
 0x3d9   :  { %1797 = vrsqrt.f32 %v1241_v56  ;;  %vm1265_vm8 = vmor %vm1263_vm6, %vm1264_vm5  ;;  %vm1273_vm10 = vweird.f32 %v1241_v56 }
 0x3da   :  { %v1256_v60 = vsel %vm1255_vm4, %v1794_v46, %v1252_v57  ;;  %v1259_v62 = vmul.f32 %v1796_v55, %v1258_v58 }
 0x3db   :  { %v1327_v0 = vmul.f32 %v1256_v60, %v2251_v61 }
 0x3dc   :  { %v1260_v1 = vmul.f32 0.5, %v1259_v62  ;;  %v1222_v4 = vpop.xlane.xlu2 %1221 }
 0x3dd   :  { %v1339_v5 = vmul.f32 %v2300_v59, %v1327_v0  ;;  %v1234_v6 = vmul.f32 0.03125, %v1222_v4 }
 0x3de   :  { %v1261_v7 = vsub.f32 1.5, %v1260_v1 }
 0x3df   :  { %v1798_v10 = vpop.eup %1797  ;;  %v1351_v11 = vadd.f32 %v2305_v63, %v1339_v5  ;;  %v1242_v12 = vadd.f32 1e-05, %v1234_v6 }
 0x3e0   :  { %v1262_v13 = vmul.f32 %v1796_v55, %v1261_v7  ;;  %v1268_v14 = vmul.f32 %v1798_v10, %v1241_v56  ;;  %vm1274_vm9 = vweird.f32 %v1798_v10 }
 0x3e1   :  { %vm1359_vm7 = vcmp.gt.f32.partialorder %v1351_v11, 0.0  ;;  %v1367_v8 = vmul.f32 0.1, %v1351_v11  ;;  %1799 = vrsqrt.f32 %v1242_v12  ;;  %vm1275_vm12 = vmor %vm1273_vm10, %vm1274_vm9  ;;  %vm1283_vm14 = vweird.f32 %v1242_v12 }
 0x3e2   :  { %v1266_v15 = vsel %vm1265_vm8, %v1796_v55, %v1262_v13  ;;  %v1269_v61 = vmul.f32 %v1798_v10, %v1268_v14 }
 0x3e3   :  { %v1375_v16 = vsel %vm1359_vm7, %v1351_v11, %v1367_v8  ;;  %v1328_v18 = vmul.f32 %v1266_v15, %v2257_v2 }
 0x3e4   :  { %v1383_v21 = vadd.f32 %v1375_v16, %v2146_v19  ;;  %v1270_v22 = vmul.f32 0.5, %v1269_v61  ;;  %v1224_v25 = vpop.xlane.xlu0 %1223 }
 0x3e5   :  { %v1340_v27 = vmul.f32 %v2300_v59, %v1328_v18  ;;  %v1235_v29 = vmul.f32 0.03125, %v1224_v25 }
 0x3e6   :  { %1391 = vst [vmem:[%s2401_s25] sm:$0xff] %v1383_v21  ;;  %v1271_v31 = vsub.f32 1.5, %v1270_v22 }
 0x3e7   :  { %v1800_v32 = vpop.eup %1799  ;;  %v1352_v30 = vadd.f32 %v2305_v63, %v1340_v27  ;;  %v1243_v36 = vadd.f32 1e-05, %v1235_v29 }
 0x3e8   :  { %v1272_v37 = vmul.f32 %v1798_v10, %v1271_v31  ;;  %v1278_v2 = vmul.f32 %v1800_v32, %v1242_v12  ;;  %vm1284_vm13 = vweird.f32 %v1800_v32 }
 0x3e9   :  { %vm1360_vm11 = vcmp.gt.f32.partialorder %v1352_v30, 0.0  ;;  %v1368_v19 = vmul.f32 0.1, %v1352_v30  ;;  %1801 = vrsqrt.f32 %v1243_v36  ;;  %vm1285_vm0 = vmor %vm1283_vm14, %vm1284_vm13  ;;  %vm1293_vm2 = vweird.f32 %v1243_v36 }
 0x3ea   :  { %v1276_v38 = vsel %vm1275_vm12, %v1798_v10, %v1272_v37  ;;  %v1279_v40 = vmul.f32 %v1800_v32, %v1278_v2 }
 0x3eb   :  { %v1376_v41 = vsel %vm1360_vm11, %v1352_v30, %v1368_v19  ;;  %v1329_v42 = vmul.f32 %v1276_v38, %v2263_v9 }
 0x3ec   :  { %v1384_v43 = vadd.f32 %v1376_v41, %v2151_v20  ;;  %v1280_v44 = vmul.f32 0.5, %v1279_v40  ;;  %v1226_v45 = vpop.xlane.xlu1 %1225 }
 0x3ed   :  { %v1341_v46 = vmul.f32 %v2300_v59, %v1329_v42  ;;  %v1236_v49 = vmul.f32 0.03125, %v1226_v45 }
 0x3ee   :  { %1392 = vst [vmem:[%s2401_s25 + $0x8] sm:$0xff] %v1384_v43  ;;  %v1281_v50 = vsub.f32 1.5, %v1280_v44 }
 0x3ef   :  { %v1802_v51 = vpop.eup %1801  ;;  %v1353_v52 = vadd.f32 %v2305_v63, %v1341_v46  ;;  %v1244_v53 = vadd.f32 1e-05, %v1236_v49 }
 0x3f0   :  { %v1282_v28 = vmul.f32 %v1800_v32, %v1281_v50  ;;  %v1288_v9 = vmul.f32 %v1802_v51, %v1243_v36  ;;  %vm1294_vm1 = vweird.f32 %v1802_v51 }
 0x3f1   :  { %vm1361_vm15 = vcmp.gt.f32.partialorder %v1353_v52, 0.0  ;;  %v1369_v20 = vmul.f32 0.1, %v1353_v52  ;;  %1803 = vrsqrt.f32 %v1244_v53  ;;  %vm1295_vm4 = vmor %vm1293_vm2, %vm1294_vm1  ;;  %vm1303_vm6 = vweird.f32 %v1244_v53 }
 0x3f2   :  { %v1286_v54 = vsel %vm1285_vm0, %v1800_v32, %v1282_v28  ;;  %v1289_v55 = vmul.f32 %v1802_v51, %v1288_v9 }
 0x3f3   :  { %v1377_v56 = vsel %vm1361_vm15, %v1353_v52, %v1369_v20  ;;  %v1330_v57 = vmul.f32 %v1286_v54, %v2269_v3 }
 0x3f4   :  { %v1385_v58 = vadd.f32 %v1377_v56, %v2161_v23  ;;  %v1290_v60 = vmul.f32 0.5, %v1289_v55  ;;  %v1228_v62 = vpop.xlane.xlu2 %1227 }
 0x3f5   :  { %v1342_v0 = vmul.f32 %v2300_v59, %v1330_v57  ;;  %v1237_v1 = vmul.f32 0.03125, %v1228_v62 }
 0x3f6   :  { %1393 = vst [vmem:[%s2401_s25 + $0x10] sm:$0xff] %v1385_v58  ;;  %v1291_v4 = vsub.f32 1.5, %v1290_v60 }
 0x3f7   :  { %v1804_v5 = vpop.eup %1803  ;;  %v1354_v6 = vadd.f32 %v2305_v63, %v1342_v0  ;;  %v1245_v7 = vadd.f32 1e-05, %v1237_v1 }
 0x3f8   :  { %v1292_v10 = vmul.f32 %v1802_v51, %v1291_v4  ;;  %v1298_v3 = vmul.f32 %v1804_v5, %v1244_v53  ;;  %vm1304_vm5 = vweird.f32 %v1804_v5 }
 0x3f9   :  { %vm1362_vm3 = vcmp.gt.f32.partialorder %v1354_v6, 0.0  ;;  %v1370_v23 = vmul.f32 0.1, %v1354_v6  ;;  %1805 = vrsqrt.f32 %v1245_v7  ;;  %vm1305_vm8 = vmor %vm1303_vm6, %vm1304_vm5  ;;  %vm1313_vm10 = vweird.f32 %v1245_v7 }
 0x3fa   :  { %v1296_v11 = vsel %vm1295_vm4, %v1802_v51, %v1292_v10  ;;  %v1299_v12 = vmul.f32 %v1804_v5, %v1298_v3 }
 0x3fb   :  { %v1378_v13 = vsel %vm1362_vm3, %v1354_v6, %v1370_v23  ;;  %v1331_v14 = vmul.f32 %v1296_v11, %v2275_v17 }
 0x3fc   :  { %v1386_v8 = vadd.f32 %v1378_v13, %v2166_v24  ;;  %v1300_v15 = vmul.f32 0.5, %v1299_v12  ;;  %v1230_v61 = vpop.xlane.xlu0 %1229 }
 0x3fd   :  { %v1343_v16 = vmul.f32 %v2300_v59, %v1331_v14  ;;  %v1238_v18 = vmul.f32 0.03125, %v1230_v61 }
 0x3fe   :  { %1394 = vst [vmem:[%s2401_s25 + $0x18] sm:$0xff] %v1386_v8  ;;  %v1301_v21 = vsub.f32 1.5, %v1300_v15 }
 0x3ff   :  { %v1806_v22 = vpop.eup %1805  ;;  %v1355_v25 = vadd.f32 %v2305_v63, %v1343_v16  ;;  %v1246_v27 = vadd.f32 1e-05, %v1238_v18 }
 0x400   :  { %v1302_v29 = vmul.f32 %v1804_v5, %v1301_v21  ;;  %v1308_v17 = vmul.f32 %v1806_v22, %v1245_v7  ;;  %vm1314_vm9 = vweird.f32 %v1806_v22 }
 0x401   :  { %vm1363_vm7 = vcmp.gt.f32.partialorder %v1355_v25, 0.0  ;;  %v1371_v24 = vmul.f32 0.1, %v1355_v25  ;;  %1807 = vrsqrt.f32 %v1246_v27  ;;  %vm1315_vm12 = vmor %vm1313_vm10, %vm1314_vm9  ;;  %vm1323_vm14 = vweird.f32 %v1246_v27 }
 0x402   :  { %v1306_v31 = vsel %vm1305_vm8, %v1804_v5, %v1302_v29  ;;  %v1309_v32 = vmul.f32 %v1806_v22, %v1308_v17 }
 0x403   :  { %v1379_v30 = vsel %vm1363_vm7, %v1355_v25, %v1371_v24  ;;  %v1332_v36 = vmul.f32 %v1306_v31, %v2281_v26 }
 0x404   :  { %v1387_v37 = vadd.f32 %v1379_v30, %v2176_v33  ;;  %v1310_v2 = vmul.f32 0.5, %v1309_v32 }
 0x405   :  { %v1344_v19 = vmul.f32 %v2300_v59, %v1332_v36 }
 0x406   :  { %1395 = vst [vmem:[%s2401_s25 + $0x20] sm:$0xff] %v1387_v37  ;;  %v1311_v38 = vsub.f32 1.5, %v1310_v2 }
 0x407   :  { %v1808_v40 = vpop.eup %1807  ;;  %v1356_v41 = vadd.f32 %v2305_v63, %v1344_v19 }
 0x408   :  { %v1312_v42 = vmul.f32 %v1806_v22, %v1311_v38  ;;  %v1318_v43 = vmul.f32 %v1808_v40, %v1246_v27  ;;  %vm1324_vm13 = vweird.f32 %v1808_v40 }
 0x409   :  { %vm1364_vm11 = vcmp.gt.f32.partialorder %v1356_v41, 0.0  ;;  %v1372_v44 = vmul.f32 0.1, %v1356_v41  ;;  %vm1325_vm0 = vmor %vm1323_vm14, %vm1324_vm13 }
 0x40a   :  { %v1316_v26 = vsel %vm1315_vm12, %v1806_v22, %v1312_v42  ;;  %v1319_v33 = vmul.f32 %v1808_v40, %v1318_v43 }
 0x40b   :  { %v1380_v45 = vsel %vm1364_vm11, %v1356_v41, %v1372_v44  ;;  %v1333_v46 = vmul.f32 %v1316_v26, %v2287_v35 }
 0x40c   :  { %v1388_v49 = vadd.f32 %v1380_v45, %v2181_v34  ;;  %v1320_v50 = vmul.f32 0.5, %v1319_v33 }
 0x40d   :  { %v1345_v51 = vmul.f32 %v2300_v59, %v1333_v46 }
 0x40e   :  { %1396 = vst [vmem:[%s2401_s25 + $0x28] sm:$0xff] %v1388_v49  ;;  %v1321_v52 = vsub.f32 1.5, %v1320_v50 }
 0x40f   :  { %v1357_v53 = vadd.f32 %v2305_v63, %v1345_v51 }
 0x410   :  { %v1322_v28 = vmul.f32 %v1808_v40, %v1321_v52 }
 0x411   :  { %vm1365_vm15 = vcmp.gt.f32.partialorder %v1357_v53, 0.0  ;;  %v1373_v9 = vmul.f32 0.1, %v1357_v53 }
 0x412   :  { %v1326_v20 = vsel %vm1325_vm0, %v1808_v40, %v1322_v28 }
 0x413   :  { %v1381_v35 = vsel %vm1365_vm15, %v1357_v53, %v1373_v9  ;;  %v1334_v34 = vmul.f32 %v1326_v20, %v2293_v39 }
 0x414   :  { %v1389_v54 = vadd.f32 %v1381_v35, %v2191_v47 }
 0x415   :  { %v1346_v55 = vmul.f32 %v2300_v59, %v1334_v34 }
 0x416   :  { %1397 = vst [vmem:[%s2401_s25 + $0x30] sm:$0xff] %v1389_v54 }
 0x417   :  { %v1358_v56 = vadd.f32 %v2305_v63, %v1346_v55 }
 0x419   :  { %vm1366_vm1 = vcmp.gt.f32.partialorder %v1358_v56, 0.0  ;;  %v1374_v57 = vmul.f32 0.1, %v1358_v56 }
 0x41b   :  { %v1382_v58 = vsel %vm1366_vm1, %v1358_v56, %v1374_v57 }
 0x41c   :  { %v1390_v60 = vadd.f32 %v1382_v58, %v2196_v48 }
 0x41e   :  { %1398 = vst [vmem:[%s2401_s25 + $0x38] sm:$0xff] %v1390_v60 }

</bundles_post_ra>
